<compile_context>
chip_gen: v7x
topology: tpu7x:2x2x1
jax: 0.10.0
libtpu: 0.0.40
codegen_flags: <defaults>
</compile_context>

<pallas_src>
import math
import functools

import numpy as np
import jax
import jax.numpy as jnp
from jax.experimental import pallas as pl
from jax.experimental.pallas import tpu as pltpu

F32 = jnp.float32
_EPS = 1e-6
_MM_DTYPE = jnp.bfloat16     # MXU operand dtype; accumulation stays f32 everywhere.


# ----------------------------------------------------------------------------- hw sizing

def _vmem_capacity_bytes():
    try:
        info = pltpu.get_tpu_info()
        cap = getattr(info, "vmem_capacity_bytes", None)
        if cap:
            return int(cap)
    except Exception:
        pass
    return 64 * 1024 * 1024          # conservative fallback (v7x-sized)


_VMEM_CAP = _vmem_capacity_bytes()
_BIG_VMEM = _VMEM_CAP >= 96 * 1024 * 1024
# ~40 MiB scoped limit on v7x (64 MiB physical), ~80 MiB on v5e/v6e (128 MiB physical).
_VMEM_LIMIT = min(int(_VMEM_CAP * 5 // 8), 100 * 1024 * 1024)

_TM_DEFAULT = 512 if _BIG_VMEM else 256    # row tiles
_TN_DEFAULT = 512 if _BIG_VMEM else 256    # output-feature tiles
_TK_DEFAULT = 1024 if _BIG_VMEM else 512   # contraction tiles
_TQ_DEFAULT = 512 if _BIG_VMEM else 256    # query tiles
_TKV_DEFAULT = 512                         # key/value tiles


def _cparams(dim_sem):
    return pltpu.CompilerParams(dimension_semantics=dim_sem,
                                vmem_limit_bytes=_VMEM_LIMIT)


def _pick_tile(dim, target, align):
    """Largest tile <= target that is a multiple of `align` and divides `dim`,
    else the full dim (a block equal to the array extent is always legal)."""
    if dim <= target:
        return dim
    t = (target // align) * align
    while t >= align:
        if dim % t == 0:
            return t
        t -= align
    return dim


def _split_for_cores(dim, target, align):
    """Like _pick_tile, but aims for >= 2 tiles so both v7x TensorCores get work."""
    half = (dim // 2 // align) * align
    if half >= align:
        target = min(target, half)
    return _pick_tile(dim, target, align)


# ----------------------------------------------------------------------------- matmul helper

def _dot_nn(x, w):
    """Plain NN matmul (x: (m, k), w: (k, n)); bf16 operands, f32 accumulation on MXU."""
    return jax.lax.dot_general(
        x.astype(_MM_DTYPE), w.astype(_MM_DTYPE),
        (((1,), (0,)), ((), ())),
        preferred_element_type=jnp.float32)


# ----------------------------------------------------------------------------- kernels

def _norm_linear_kernel(x_ref, g_ref, w_ref, b_ref, o_ref, n_sc, *, eps):
    # fused RMSNorm(x) @ W + b; normed tile cached in VMEM scratch across the N axis.
    @pl.when(pl.program_id(1) == 0)
    def _():
        x = x_ref[...]                                                   # (tm, D) f32
        inv = jax.lax.rsqrt(jnp.mean(x * x, axis=-1, keepdims=True) + eps)
        n_sc[...] = (x * inv * g_ref[...]).astype(n_sc.dtype)           # bf16 for the MXU

    o_ref[...] = (_dot_nn(n_sc[...], w_ref[...]) + b_ref[...]).astype(o_ref.dtype)


def _norm_swiglu_kernel(x_ref, g_ref, wg_ref, bg_ref, wu_ref, bu_ref, o_ref, n_sc, *, eps):
    # fused RMSNorm + gate/up projections + SiLU gating; gate/up never hit HBM.
    # TODO(synk): single (tm, 2*tn) dot with a tile-interleaved fused gate/up weight
    # would cut DMA descriptors further; kept as two dots sharing the cached lhs.
    @pl.when(pl.program_id(1) == 0)
    def _():
        x = x_ref[...]
        inv = jax.lax.rsqrt(jnp.mean(x * x, axis=-1, keepdims=True) + eps)
        n_sc[...] = (x * inv * g_ref[...]).astype(n_sc.dtype)

    normed = n_sc[...]
    gate = _dot_nn(normed, wg_ref[...]) + bg_ref[...]                    # f32
    up = _dot_nn(normed, wu_ref[...]) + bu_ref[...]                      # f32
    o_ref[...] = (gate * jax.nn.sigmoid(gate) * up).astype(o_ref.dtype)  # silu(gate)*up


def _linear_residual_kernel(x_ref, w_ref, b_ref, r_ref, o_ref, acc_ref):
    # tiled x @ W with f32 accumulator over K; bias + residual fused into finalize.
    k = pl.program_id(2)

    @pl.when(k == 0)
    def _():
        acc_ref[...] = jnp.zeros(acc_ref.shape, acc_ref.dtype)

    acc_ref[...] += _dot_nn(x_ref[...], w_ref[...])

    @pl.when(k == pl.num_programs(2) - 1)
    def _():
        o_ref[...] = (acc_ref[...] + b_ref[...] + r_ref[...]).astype(o_ref.dtype)


def _flash_attn_kernel(q_ref, k_ref, v_ref, bias_ref, o_ref, m_sc, l_sc, acc_sc,
                       *, scale, n_heads, head_dim):
    # head-packed online-softmax attention.  q/k/v refs are lane-dense (tile, D) blocks
    # sliced per head inside the kernel; softmax stats/accumulators live in f32 scratch.
    ki = pl.program_id(2)

    @pl.when(ki == 0)
    def _():
        m_sc[...] = jnp.full(m_sc.shape, -jnp.inf, m_sc.dtype)
        l_sc[...] = jnp.zeros(l_sc.shape, l_sc.dtype)
        acc_sc[...] = jnp.zeros(acc_sc.shape, acc_sc.dtype)

    q = q_ref[...]                         # (tq, D) bf16
    k = k_ref[...]                         # (tk, D) bf16
    v = v_ref[...]                         # (tk, D) bf16
    bias = bias_ref[...]                   # (1, tk) f32 additive mask

    # TODO(synk): for large n_heads use a head-block grid axis instead of full unroll.
    for h in range(n_heads):
        sl = slice(h * head_dim, (h + 1) * head_dim)
        s = jax.lax.dot_general(           # QK^T, contraction over head_dim
            q[:, sl], k[:, sl], (((1,), (1,)), ((), ())),
            preferred_element_type=jnp.float32)
        s = s * scale + bias               # (tq, tk) f32

        m_prev = m_sc[h]                   # (tq, 1)
        m_new = jnp.maximum(m_prev, jnp.max(s, axis=-1, keepdims=True))
        alpha = jnp.exp(m_prev - m_new)
        p = jnp.exp(s - m_new)
        l_sc[h] = alpha * l_sc[h] + jnp.sum(p, axis=-1, keepdims=True)
        acc_sc[h] = alpha * acc_sc[h] + jax.lax.dot_general(
            p.astype(v.dtype), v[:, sl], (((1,), (0,)), ((), ())),
            preferred_element_type=jnp.float32)
        m_sc[h] = m_new

    @pl.when(ki == pl.num_programs(2) - 1)
    def _():
        # NOTE: pl.reciprocal(approx=True) assumes no query row has all keys masked.
        outs = [acc_sc[h] * pl.reciprocal(l_sc[h], approx=True) for h in range(n_heads)]
        o_ref[...] = jnp.concatenate(outs, axis=-1).astype(o_ref.dtype)  # lane-dense (tq, D)


# ----------------------------------------------------------------------------- wrappers

def fused_norm_linear(x, gamma, w_t, b, *, eps=_EPS, tm=None, tn=None):
    M, D = x.shape
    N = w_t.shape[1]
    tm = _split_for_cores(M, tm or _TM_DEFAULT, 16)
    tn = _pick_tile(N, tn or _TN_DEFAULT, 128)
    return pl.pallas_call(
        functools.partial(_norm_linear_kernel, eps=eps),
        grid=(M // tm, N // tn),
        in_specs=[pl.BlockSpec((tm, D), lambda i, j: (i, 0)),
                  pl.BlockSpec((1, D), lambda i, j: (0, 0)),
                  pl.BlockSpec((D, tn), lambda i, j: (0, j)),
                  pl.BlockSpec((1, tn), lambda i, j: (0, j))],
        out_specs=pl.BlockSpec((tm, tn), lambda i, j: (i, j)),
        out_shape=jax.ShapeDtypeStruct((M, N), _MM_DTYPE),
        scratch_shapes=[pltpu.VMEM((tm, D), _MM_DTYPE)],
        compiler_params=_cparams(("parallel", "arbitrary")),
    )(x, gamma, w_t, b)


def fused_norm_swiglu(x, gamma, wg_t, bg, wu_t, bu, *, eps=_EPS, tm=None, tn=None):
    M, D = x.shape
    N = wg_t.shape[1]
    tm = _split_for_cores(M, tm or _TM_DEFAULT, 16)
    tn = _pick_tile(N, tn or _TN_DEFAULT, 128)
    return pl.pallas_call(
        functools.partial(_norm_swiglu_kernel, eps=eps),
        grid=(M // tm, N // tn),
        in_specs=[pl.BlockSpec((tm, D), lambda i, j: (i, 0)),
                  pl.BlockSpec((1, D), lambda i, j: (0, 0)),
                  pl.BlockSpec((D, tn), lambda i, j: (0, j)),
                  pl.BlockSpec((1, tn), lambda i, j: (0, j)),
                  pl.BlockSpec((D, tn), lambda i, j: (0, j)),
                  pl.BlockSpec((1, tn), lambda i, j: (0, j))],
        out_specs=pl.BlockSpec((tm, tn), lambda i, j: (i, j)),
        out_shape=jax.ShapeDtypeStruct((M, N), _MM_DTYPE),
        scratch_shapes=[pltpu.VMEM((tm, D), _MM_DTYPE)],
        compiler_params=_cparams(("parallel", "arbitrary")),
    )(x, gamma, wg_t, bg, wu_t, bu)


def linear_residual(x, w_t, b, resid, *, tm=None, tn=None, tk=None):
    M, K = x.shape
    N = w_t.shape[1]
    tm = _split_for_cores(M, tm or _TM_DEFAULT, 16)
    tn = _pick_tile(N, tn or _TN_DEFAULT, 128)
    tk = _pick_tile(K, tk or _TK_DEFAULT, 128)
    return pl.pallas_call(
        _linear_residual_kernel,
        grid=(M // tm, N // tn, K // tk),
        in_specs=[pl.BlockSpec((tm, tk), lambda i, j, k: (i, k)),
                  pl.BlockSpec((tk, tn), lambda i, j, k: (k, j)),
                  pl.BlockSpec((1, tn), lambda i, j, k: (0, j)),
                  pl.BlockSpec((tm, tn), lambda i, j, k: (i, j))],
        out_specs=pl.BlockSpec((tm, tn), lambda i, j, k: (i, j)),
        out_shape=jax.ShapeDtypeStruct((M, N), jnp.float32),
        scratch_shapes=[pltpu.VMEM((tm, tn), jnp.float32)],
        compiler_params=_cparams(("parallel", "parallel", "arbitrary")),
    )(x, w_t, b, resid)


def flash_attention(qkv, bias, *, n_heads, tq=None, tk=None):
    """qkv: (B, S, 3*D) bf16 fused projections; bias: (B, 1, S) f32 additive mask.
    Returns attention output already in (B, S, D) layout (no head transposes)."""
    B, S, threeD = qkv.shape
    D = threeD // 3
    hd = D // n_heads
    assert D % 128 == 0, "embed_dim must be a multiple of 128 for lane-dense blocks"
    tq = _pick_tile(S, tq or _TQ_DEFAULT, 16)
    tk = _pick_tile(S, tk or _TKV_DEFAULT, 128)
    scale = 1.0 / math.sqrt(hd)
    return pl.pallas_call(
        functools.partial(_flash_attn_kernel, scale=scale, n_heads=n_heads, head_dim=hd),
        grid=(B, S // tq, S // tk),
        in_specs=[pl.BlockSpec((None, tq, D), lambda b, qi, ki: (b, qi, 0)),   # Q slab
                  pl.BlockSpec((None, tk, D), lambda b, qi, ki: (b, ki, 1)),   # K slab
                  pl.BlockSpec((None, tk, D), lambda b, qi, ki: (b, ki, 2)),   # V slab
                  pl.BlockSpec((None, 1, tk), lambda b, qi, ki: (b, 0, ki))],  # mask bias
        out_specs=pl.BlockSpec((None, tq, D), lambda b, qi, ki: (b, qi, 0)),
        out_shape=jax.ShapeDtypeStruct((B, S, D), _MM_DTYPE),
        scratch_shapes=[pltpu.VMEM((n_heads, tq, 1), jnp.float32),
                        pltpu.VMEM((n_heads, tq, 1), jnp.float32),
                        pltpu.VMEM((n_heads, tq, hd), jnp.float32)],
        compiler_params=_cparams(("parallel", "parallel", "arbitrary")),
    )(qkv, qkv, qkv, bias)


# ----------------------------------------------------------------------------- param prep

def prepare_params(p):
    """One-time (outside jit) weight fusion: concat QKV, transpose all weights to
    (in, out), cast matmul operands to bf16.  Biases / gammas stay f32."""
    w_qkv = jnp.concatenate([p['wq'], p['wk'], p['wv']], axis=0)          # (3D, D)
    b_qkv = jnp.concatenate([p['bq'], p['bk'], p['bv']], axis=0)          # (3D,)
    return dict(
        w_qkv_t=w_qkv.T.astype(_MM_DTYPE),
        b_qkv=b_qkv.reshape(1, -1).astype(F32),
        w_o_t=p['wo'].T.astype(_MM_DTYPE),
        b_o=p['bo'].reshape(1, -1).astype(F32),
        w_gate_t=p['w_gate'].T.astype(_MM_DTYPE),
        b_gate=p['b_gate'].reshape(1, -1).astype(F32),
        w_up_t=p['w_up'].T.astype(_MM_DTYPE),
        b_up=p['b_up'].reshape(1, -1).astype(F32),
        w_down_t=p['w_down'].T.astype(_MM_DTYPE),
        b_down=p['b_down'].reshape(1, -1).astype(F32),
        norm1_gamma=p['norm1_gamma'].reshape(1, -1).astype(F32),
        norm2_gamma=p['norm2_gamma'].reshape(1, -1).astype(F32),
    )


# ----------------------------------------------------------------------------- layer forward

def transformer_layer_forward(pp, x, mask, *, n_heads, eps=_EPS):
    B, S, D = x.shape
    assert D % n_heads == 0
    M = B * S
    x2 = x.reshape(M, D)                                                  # f32 residual stream

    # attention block: fused RMSNorm + QKV projection (single pass over x)
    qkv = fused_norm_linear(x2, pp['norm1_gamma'], pp['w_qkv_t'], pp['b_qkv'], eps=eps)

    # additive bias matching masked_fill(mask == 0, -1e9)
    bias = jnp.where(mask == 0, jnp.float32(-1e9), jnp.float32(0.0))      # (B, 1, S)

    # head-packed flash attention straight off the fused qkv buffer (no split/transpose)
    attn = flash_attention(qkv.reshape(B, S, 3 * D), bias, n_heads=n_heads)   # (B, S, D)

    # o_proj with fused residual add (dropout = identity in eval mode)
    x2 = linear_residual(attn.reshape(M, D), pp['w_o_t'], pp['b_o'], x2)      # f32

    # FFN block: fused RMSNorm + gate/up + SwiGLU gating, then down proj + residual
    gated = fused_norm_swiglu(x2, pp['norm2_gamma'],
                              pp['w_gate_t'], pp['b_gate'],
                              pp['w_up_t'], pp['b_up'], eps=eps)              # (M, Hd) bf16
    x2 = linear_residual(gated, pp['w_down_t'], pp['b_down'], x2)             # f32
    return x2.reshape(B, S, D)


# ----------------------------------------------------------------------------- pure-JAX reference

def ref_layer(params, x, mask, *, n_heads, eps=_EPS):
    B, S, D = x.shape
    hd = D // n_heads

    def rms(t, g):
        return t * jax.lax.rsqrt(jnp.mean(t * t, axis=-1, keepdims=True) + eps) * g

    normed = rms(x, params['norm1_gamma'])
    q = normed @ params['wq'].T + params['bq']
    k = normed @ params['wk'].T + params['bk']
    v = normed @ params['wv'].T + params['bv']

    def th(t):
        return t.reshape(B, S, n_heads, hd).transpose(0, 2, 1, 3)

    qh, kh, vh = th(q), th(k), th(v)
    scores = qh @ kh.transpose(0, 1, 3, 2) / math.sqrt(hd)
    scores = jnp.where(mask[:, None, :, :] == 0, -1e9, scores)
    w = jax.nn.softmax(scores, axis=-1)
    attn = (w @ vh).transpose(0, 2, 1, 3).reshape(B, S, D)
    x = x + attn @ params['wo'].T + params['bo']

    normed = rms(x, params['norm2_gamma'])
    gate = normed @ params['w_gate'].T + params['b_gate']
    up = normed @ params['w_up'].T + params['b_up']
    x = x + (jax.nn.silu(gate) * up) @ params['w_down'].T + params['b_down']
    return x


# ----------------------------------------------------------------------------- init / main

def init_layer_params(key, D, Hd):
    def lin(k, dout, din):
        k1, k2 = jax.random.split(k)
        lim = 1.0 / math.sqrt(din)
        return (jax.random.uniform(k1, (dout, din), F32, -lim, lim),
                jax.random.uniform(k2, (dout,), F32, -lim, lim))

    ks = jax.random.split(key, 7)
    wq, bq = lin(ks[0], D, D)
    wk, bk = lin(ks[1], D, D)
    wv, bv = lin(ks[2], D, D)
    wo, bo = lin(ks[3], D, D)
    wg, bg = lin(ks[4], Hd, D)
    wu, bu = lin(ks[5], Hd, D)
    wd, bd = lin(ks[6], D, Hd)
    return dict(wq=wq, bq=bq, wk=wk, bk=bk, wv=wv, bv=bv, wo=wo, bo=bo,
                norm1_gamma=jnp.ones((D,), F32), norm2_gamma=jnp.ones((D,), F32),
                w_gate=wg, b_gate=bg, w_up=wu, b_up=bu, w_down=wd, b_down=bd)


if __name__ == "__main__":
    B, S, D, H, FFN_MULT = 2, 64, 128, 4, 2
    Hd = D * FFN_MULT

    key = jax.random.PRNGKey(0)
    kp, kx = jax.random.split(key)
    params = init_layer_params(kp, D, Hd)
    x = jax.random.normal(kx, (B, S, D), F32)
    mask = jnp.ones((B, 1, S), F32)
    mask = mask.at[1, 0, S - 8:].set(0.0)   # pad out the last 8 tokens of batch 1

    prepared = prepare_params(params)        # one-time fuse / transpose / bf16 cast
    fwd = jax.jit(functools.partial(transformer_layer_forward, n_heads=H))
    out = jax.block_until_ready(fwd(prepared, x, mask))

    # Tolerance is sized for bf16 MXU operands (f32 accumulation) vs. the f32 reference.
    ref = ref_layer(params, x, mask, n_heads=H)
    np.testing.assert_allclose(np.asarray(out), np.asarray(ref), rtol=3e-2, atol=3e-2)
    print("KERNEL_OK")
</pallas_src>

<mosaic_0001>
module attributes {stable_mosaic.version = 11 : i64} {
  func.func @_linear_residual_kernel(%arg0: i32, %arg1: i32, %arg2: i32, %arg3: memref<64x128xbf16, #tpu.memory_space<vmem>>, %arg4: memref<128x128xbf16, #tpu.memory_space<vmem>>, %arg5: memref<1x128xf32, #tpu.memory_space<vmem>>, %arg6: memref<64x128xf32, #tpu.memory_space<vmem>>, %arg7: memref<64x128xf32, #tpu.memory_space<vmem>>, %arg8: memref<64x128xf32, #tpu.memory_space<vmem>>) attributes {dimension_semantics = [#tpu.dimension_semantics<parallel>, #tpu.dimension_semantics<parallel>, #tpu.dimension_semantics<arbitrary>], iteration_bounds = array<i64: 2, 1, 1>, scalar_prefetch = 0 : i64, scratch_operands = 1 : i64, tpu.core_type = #tpu.core_type<tc>, window_params = [{transform_indices = @transform_0, window_bounds = array<i64: 64, 128>}, {transform_indices = @transform_1, window_bounds = array<i64: 128, 128>}, {transform_indices = @transform_2, window_bounds = array<i64: 1, 128>}, {transform_indices = @transform_3, window_bounds = array<i64: 64, 128>}, {transform_indices = @transform_4, window_bounds = array<i64: 64, 128>}]} {
    %c0_i32 = arith.constant 0 : i32
    %0 = arith.cmpi eq, %arg2, %c0_i32 : i32
    %1 = arith.extui %0 : i1 to i32
    %c0_i32_0 = arith.constant 0 : i32
    %2 = arith.cmpi ne, %1, %c0_i32_0 : i32
    scf.if %2 {
      %cst_10 = arith.constant 0.000000e+00 : f32
      %12 = vector.broadcast %cst_10 : f32 to vector<64x128xf32>
      %c0_11 = arith.constant 0 : index
      %c0_12 = arith.constant 0 : index
      %13 = vector.load %arg8[%c0_11, %c0_12] : memref<64x128xf32, #tpu.memory_space<vmem>>, vector<64x128xf32>
      tpu.vector_store %arg8[%c0_11, %c0_12], %12 {strides = array<i32>} : memref<64x128xf32, #tpu.memory_space<vmem>>, vector<64x128xf32>,
    } else {
    }
    %c0 = arith.constant 0 : index
    %c0_1 = arith.constant 0 : index
    %3 = vector.load %arg8[%c0, %c0_1] : memref<64x128xf32, #tpu.memory_space<vmem>>, vector<64x128xf32>
    %c0_2 = arith.constant 0 : index
    %c0_3 = arith.constant 0 : index
    %4 = vector.load %arg3[%c0_2, %c0_3] : memref<64x128xbf16, #tpu.memory_space<vmem>>, vector<64x128xbf16>
    %c0_4 = arith.constant 0 : index
    %c0_5 = arith.constant 0 : index
    %5 = vector.load %arg4[%c0_4, %c0_5] : memref<128x128xbf16, #tpu.memory_space<vmem>>, vector<128x128xbf16>
    %cst = arith.constant dense<0.000000e+00> : vector<64x128xf32>
    %6 = tpu.matmul %4, %5, %cst {dimension_numbers = #tpu.dot_dimension_numbers<[1], [0], [0], [1], [0, 0, 1, 1], [], []>} : vector<64x128xbf16>, vector<128x128xbf16>, vector<64x128xf32> -> vector<64x128xf32>
    %7 = arith.addf %3, %6 : vector<64x128xf32>
    %c0_6 = arith.constant 0 : index
    %c0_7 = arith.constant 0 : index
    %8 = vector.load %arg8[%c0_6, %c0_7] : memref<64x128xf32, #tpu.memory_space<vmem>>, vector<64x128xf32>
    tpu.vector_store %arg8[%c0_6, %c0_7], %7 {strides = array<i32>} : memref<64x128xf32, #tpu.memory_space<vmem>>, vector<64x128xf32>,
    %c0_i32_8 = arith.constant 0 : i32
    %9 = arith.cmpi eq, %arg2, %c0_i32_8 : i32
    %10 = arith.extui %9 : i1 to i32
    %c0_i32_9 = arith.constant 0 : i32
    %11 = arith.cmpi ne, %10, %c0_i32_9 : i32
    scf.if %11 {
      %c0_10 = arith.constant 0 : index
      %c0_11 = arith.constant 0 : index
      %12 = vector.load %arg8[%c0_10, %c0_11] : memref<64x128xf32, #tpu.memory_space<vmem>>, vector<64x128xf32>
      %c0_12 = arith.constant 0 : index
      %c0_13 = arith.constant 0 : index
      %13 = vector.load %arg5[%c0_12, %c0_13] : memref<1x128xf32, #tpu.memory_space<vmem>>, vector<1x128xf32>
      %14 = vector.broadcast %13 : vector<1x128xf32> to vector<64x128xf32>
      %15 = arith.addf %12, %14 : vector<64x128xf32>
      %c0_14 = arith.constant 0 : index
      %c0_15 = arith.constant 0 : index
      %16 = vector.load %arg6[%c0_14, %c0_15] : memref<64x128xf32, #tpu.memory_space<vmem>>, vector<64x128xf32>
      %17 = arith.addf %15, %16 : vector<64x128xf32>
      %c0_16 = arith.constant 0 : index
      %c0_17 = arith.constant 0 : index
      %18 = vector.load %arg7[%c0_16, %c0_17] : memref<64x128xf32, #tpu.memory_space<vmem>>, vector<64x128xf32>
      tpu.vector_store %arg7[%c0_16, %c0_17], %17 {strides = array<i32>} : memref<64x128xf32, #tpu.memory_space<vmem>>, vector<64x128xf32>,
    } else {
    }
    return
  }
  func.func @transform_0(%arg0: i32, %arg1: i32, %arg2: i32) -> (i32, i32) {
    %c0_i32 = arith.constant 0 : i32
    return %arg0, %arg2 : i32, i32
  }
  func.func @transform_1(%arg0: i32, %arg1: i32, %arg2: i32) -> (i32, i32) {
    %c0_i32 = arith.constant 0 : i32
    return %arg2, %arg1 : i32, i32
  }
  func.func @transform_2(%arg0: i32, %arg1: i32, %arg2: i32) -> (i32, i32) {
    %c0_i32 = arith.constant 0 : i32
    %c0_i32_0 = arith.constant 0 : i32
    return %c0_i32, %arg1 : i32, i32
  }
  func.func @transform_3(%arg0: i32, %arg1: i32, %arg2: i32) -> (i32, i32) {
    %c0_i32 = arith.constant 0 : i32
    return %arg0, %arg1 : i32, i32
  }
  func.func @transform_4(%arg0: i32, %arg1: i32, %arg2: i32) -> (i32, i32) {
    %c0_i32 = arith.constant 0 : i32
    return %arg0, %arg1 : i32, i32
  }
}

module attributes {stable_mosaic.version = 11 : i64} {
  func.func @_norm_linear_kernel(%arg0: i32, %arg1: i32, %arg2: memref<64x128xf32, #tpu.memory_space<vmem>>, %arg3: memref<1x128xf32, #tpu.memory_space<vmem>>, %arg4: memref<128x128xbf16, #tpu.memory_space<vmem>>, %arg5: memref<1x128xf32, #tpu.memory_space<vmem>>, %arg6: memref<64x128xbf16, #tpu.memory_space<vmem>>, %arg7: memref<64x128xbf16, #tpu.memory_space<vmem>>) attributes {dimension_semantics = [#tpu.dimension_semantics<parallel>, #tpu.dimension_semantics<arbitrary>], iteration_bounds = array<i64: 2, 3>, scalar_prefetch = 0 : i64, scratch_operands = 1 : i64, tpu.core_type = #tpu.core_type<tc>, window_params = [{transform_indices = @transform_0, window_bounds = array<i64: 64, 128>}, {pipeline_mode = #tpu.pipeline_mode<synchronous>, transform_indices = @transform_1, window_bounds = array<i64: 1, 128>}, {transform_indices = @transform_2, window_bounds = array<i64: 128, 128>}, {transform_indices = @transform_3, window_bounds = array<i64: 1, 128>}, {transform_indices = @transform_4, window_bounds = array<i64: 64, 128>}]} {
    %c0_i32 = arith.constant 0 : i32
    %0 = arith.cmpi eq, %arg1, %c0_i32 : i32
    %1 = arith.extui %0 : i1 to i32
    %c0_i32_0 = arith.constant 0 : i32
    %2 = arith.cmpi ne, %1, %c0_i32_0 : i32
    scf.if %2 {
      %c0_8 = arith.constant 0 : index
      %c0_9 = arith.constant 0 : index
      %11 = vector.load %arg2[%c0_8, %c0_9] : memref<64x128xf32, #tpu.memory_space<vmem>>, vector<64x128xf32>
      %12 = arith.mulf %11, %11 : vector<64x128xf32>
      %cst_10 = arith.constant dense<0.000000e+00> : vector<64xf32>
      %13 = vector.multi_reduction <add>, %12, %cst_10 [1] : vector<64x128xf32> to vector<64xf32>
      %14 = vector.shape_cast %13 : vector<64xf32> to vector<64x1xf32>
      %cst_11 = arith.constant 1.280000e+02 : f32
      %15 = vector.broadcast %cst_11 : f32 to vector<64x1xf32>
      %16 = arith.divf %14, %15 : vector<64x1xf32>
      %cst_12 = arith.constant 9.99999997E-7 : f32
      %17 = vector.broadcast %cst_12 : f32 to vector<64x1xf32>
      %18 = arith.addf %16, %17 : vector<64x1xf32>
      %19 = math.rsqrt %18 : vector<64x1xf32>
      %20 = vector.broadcast %19 : vector<64x1xf32> to vector<64x128xf32>
      %21 = arith.mulf %11, %20 : vector<64x128xf32>
      %c0_13 = arith.constant 0 : index
      %c0_14 = arith.constant 0 : index
      %22 = vector.load %arg3[%c0_13, %c0_14] : memref<1x128xf32, #tpu.memory_space<vmem>>, vector<1x128xf32>
      %23 = vector.broadcast %22 : vector<1x128xf32> to vector<64x128xf32>
      %24 = arith.mulf %21, %23 : vector<64x128xf32>
      %25 = arith.truncf %24 : vector<64x128xf32> to vector<64x128xbf16>
      %c0_15 = arith.constant 0 : index
      %c0_16 = arith.constant 0 : index
      %26 = vector.load %arg7[%c0_15, %c0_16] : memref<64x128xbf16, #tpu.memory_space<vmem>>, vector<64x128xbf16>
      tpu.vector_store %arg7[%c0_15, %c0_16], %25 {strides = array<i32>} : memref<64x128xbf16, #tpu.memory_space<vmem>>, vector<64x128xbf16>,
    } else {
    }
    %c0 = arith.constant 0 : index
    %c0_1 = arith.constant 0 : index
    %3 = vector.load %arg7[%c0, %c0_1] : memref<64x128xbf16, #tpu.memory_space<vmem>>, vector<64x128xbf16>
    %c0_2 = arith.constant 0 : index
    %c0_3 = arith.constant 0 : index
    %4 = vector.load %arg4[%c0_2, %c0_3] : memref<128x128xbf16, #tpu.memory_space<vmem>>, vector<128x128xbf16>
    %cst = arith.constant dense<0.000000e+00> : vector<64x128xf32>
    %5 = tpu.matmul %3, %4, %cst {dimension_numbers = #tpu.dot_dimension_numbers<[1], [0], [0], [1], [0, 0, 1, 1], [], []>} : vector<64x128xbf16>, vector<128x128xbf16>, vector<64x128xf32> -> vector<64x128xf32>
    %c0_4 = arith.constant 0 : index
    %c0_5 = arith.constant 0 : index
    %6 = vector.load %arg5[%c0_4, %c0_5] : memref<1x128xf32, #tpu.memory_space<vmem>>, vector<1x128xf32>
    %7 = vector.broadcast %6 : vector<1x128xf32> to vector<64x128xf32>
    %8 = arith.addf %5, %7 : vector<64x128xf32>
    %9 = arith.truncf %8 : vector<64x128xf32> to vector<64x128xbf16>
    %c0_6 = arith.constant 0 : index
    %c0_7 = arith.constant 0 : index
    %10 = vector.load %arg6[%c0_6, %c0_7] : memref<64x128xbf16, #tpu.memory_space<vmem>>, vector<64x128xbf16>
    tpu.vector_store %arg6[%c0_6, %c0_7], %9 {strides = array<i32>} : memref<64x128xbf16, #tpu.memory_space<vmem>>, vector<64x128xbf16>,
    return
  }
  func.func @transform_0(%arg0: i32, %arg1: i32) -> (i32, i32) {
    %c0_i32 = arith.constant 0 : i32
    %c0_i32_0 = arith.constant 0 : i32
    return %arg0, %c0_i32 : i32, i32
  }
  func.func @transform_1(%arg0: i32, %arg1: i32) -> (i32, i32) {
    %c0_i32 = arith.constant 0 : i32
    %c0_i32_0 = arith.constant 0 : i32
    %c0_i32_1 = arith.constant 0 : i32
    return %c0_i32, %c0_i32_0 : i32, i32
  }
  func.func @transform_2(%arg0: i32, %arg1: i32) -> (i32, i32) {
    %c0_i32 = arith.constant 0 : i32
    %c0_i32_0 = arith.constant 0 : i32
    return %c0_i32, %arg1 : i32, i32
  }
  func.func @transform_3(%arg0: i32, %arg1: i32) -> (i32, i32) {
    %c0_i32 = arith.constant 0 : i32
    %c0_i32_0 = arith.constant 0 : i32
    return %c0_i32, %arg1 : i32, i32
  }
  func.func @transform_4(%arg0: i32, %arg1: i32) -> (i32, i32) {
    %c0_i32 = arith.constant 0 : i32
    return %arg0, %arg1 : i32, i32
  }
}

module attributes {stable_mosaic.version = 11 : i64} {
  func.func @_flash_attn_kernel(%arg0: i32, %arg1: i32, %arg2: i32, %arg3: memref<1x64x128xbf16, #tpu.memory_space<vmem>>, %arg4: memref<1x64x128xbf16, #tpu.memory_space<vmem>>, %arg5: memref<1x64x128xbf16, #tpu.memory_space<vmem>>, %arg6: memref<1x1x64xf32, #tpu.memory_space<vmem>>, %arg7: memref<1x64x128xbf16, #tpu.memory_space<vmem>>, %arg8: memref<4x64x1xf32, #tpu.memory_space<vmem>>, %arg9: memref<4x64x1xf32, #tpu.memory_space<vmem>>, %arg10: memref<4x64x32xf32, #tpu.memory_space<vmem>>) attributes {dimension_semantics = [#tpu.dimension_semantics<parallel>, #tpu.dimension_semantics<parallel>, #tpu.dimension_semantics<arbitrary>], iteration_bounds = array<i64: 2, 1, 1>, scalar_prefetch = 0 : i64, scratch_operands = 3 : i64, tpu.core_type = #tpu.core_type<tc>, window_params = [{transform_indices = @transform_0, window_bounds = array<i64: 1, 64, 128>}, {transform_indices = @transform_1, window_bounds = array<i64: 1, 64, 128>}, {transform_indices = @transform_2, window_bounds = array<i64: 1, 64, 128>}, {transform_indices = @transform_3, window_bounds = array<i64: 1, 1, 64>}, {transform_indices = @transform_4, window_bounds = array<i64: 1, 64, 128>}]} {
    %c0_i32 = arith.constant 0 : i32
    %0 = arith.cmpi eq, %arg2, %c0_i32 : i32
    %1 = arith.extui %0 : i1 to i32
    %c0_i32_0 = arith.constant 0 : i32
    %2 = arith.cmpi ne, %1, %c0_i32_0 : i32
    scf.if %2 {
      %cst_102 = arith.constant 0xFF800000 : f32
      %174 = vector.broadcast %cst_102 : f32 to vector<4x64x1xf32>
      %c0_103 = arith.constant 0 : index
      %c0_104 = arith.constant 0 : index
      %c0_105 = arith.constant 0 : index
      %175 = vector.load %arg8[%c0_103, %c0_104, %c0_105] : memref<4x64x1xf32, #tpu.memory_space<vmem>>, vector<4x64x1xf32>
      tpu.vector_store %arg8[%c0_103, %c0_104, %c0_105], %174 {strides = array<i32>} : memref<4x64x1xf32, #tpu.memory_space<vmem>>, vector<4x64x1xf32>,
      %cst_106 = arith.constant 0.000000e+00 : f32
      %176 = vector.broadcast %cst_106 : f32 to vector<4x64x1xf32>
      %c0_107 = arith.constant 0 : index
      %c0_108 = arith.constant 0 : index
      %c0_109 = arith.constant 0 : index
      %177 = vector.load %arg9[%c0_107, %c0_108, %c0_109] : memref<4x64x1xf32, #tpu.memory_space<vmem>>, vector<4x64x1xf32>
      tpu.vector_store %arg9[%c0_107, %c0_108, %c0_109], %176 {strides = array<i32>} : memref<4x64x1xf32, #tpu.memory_space<vmem>>, vector<4x64x1xf32>,
      %cst_110 = arith.constant 0.000000e+00 : f32
      %178 = vector.broadcast %cst_110 : f32 to vector<4x64x32xf32>
      %c0_111 = arith.constant 0 : index
      %c0_112 = arith.constant 0 : index
      %c0_113 = arith.constant 0 : index
      %179 = vector.load %arg10[%c0_111, %c0_112, %c0_113] : memref<4x64x32xf32, #tpu.memory_space<vmem>>, vector<4x64x32xf32>
      tpu.vector_store %arg10[%c0_111, %c0_112, %c0_113], %178 {strides = array<i32>} : memref<4x64x32xf32, #tpu.memory_space<vmem>>, vector<4x64x32xf32>,
    } else {
    }
    %c0 = arith.constant 0 : index
    %c0_1 = arith.constant 0 : index
    %c0_2 = arith.constant 0 : index
    %3 = vector.load %arg3[%c0, %c0_1, %c0_2] : memref<1x64x128xbf16, #tpu.memory_space<vmem>>, vector<1x64x128xbf16>
    %4 = vector.shape_cast %3 : vector<1x64x128xbf16> to vector<64x128xbf16>
    %c0_3 = arith.constant 0 : index
    %c0_4 = arith.constant 0 : index
    %c0_5 = arith.constant 0 : index
    %5 = vector.load %arg4[%c0_3, %c0_4, %c0_5] : memref<1x64x128xbf16, #tpu.memory_space<vmem>>, vector<1x64x128xbf16>
    %6 = vector.shape_cast %5 : vector<1x64x128xbf16> to vector<64x128xbf16>
    %c0_6 = arith.constant 0 : index
    %c0_7 = arith.constant 0 : index
    %c0_8 = arith.constant 0 : index
    %7 = vector.load %arg5[%c0_6, %c0_7, %c0_8] : memref<1x64x128xbf16, #tpu.memory_space<vmem>>, vector<1x64x128xbf16>
    %8 = vector.shape_cast %7 : vector<1x64x128xbf16> to vector<64x128xbf16>
    %c0_9 = arith.constant 0 : index
    %c0_10 = arith.constant 0 : index
    %c0_11 = arith.constant 0 : index
    %9 = vector.load %arg6[%c0_9, %c0_10, %c0_11] : memref<1x1x64xf32, #tpu.memory_space<vmem>>, vector<1x1x64xf32>
    %10 = vector.shape_cast %9 : vector<1x1x64xf32> to vector<1x64xf32>
    %11 = vector.extract_strided_slice %4 {offsets = [0, 0], sizes = [64, 32], strides = [1, 1]} : vector<64x128xbf16> to vector<64x32xbf16>
    %12 = vector.extract_strided_slice %6 {offsets = [0, 0], sizes = [64, 32], strides = [1, 1]} : vector<64x128xbf16> to vector<64x32xbf16>
    %cst = arith.constant dense<0.000000e+00> : vector<64x64xf32>
    %13 = tpu.matmul %11, %12, %cst {dimension_numbers = #tpu.dot_dimension_numbers<[1], [1], [0], [0], [0, 0, 1, 0], [], []>} : vector<64x32xbf16>, vector<64x32xbf16>, vector<64x64xf32> -> vector<64x64xf32>
    %cst_12 = arith.constant 0.176776692 : f32
    %14 = vector.broadcast %cst_12 : f32 to vector<64x64xf32>
    %15 = arith.mulf %13, %14 : vector<64x64xf32>
    %16 = vector.broadcast %10 : vector<1x64xf32> to vector<64x64xf32>
    %17 = arith.addf %15, %16 : vector<64x64xf32>
    %c0_13 = arith.constant 0 : index
    %c0_14 = arith.constant 0 : index
    %c0_15 = arith.constant 0 : index
    %18 = vector.load %arg8[%c0_13, %c0_14, %c0_15] : memref<4x64x1xf32, #tpu.memory_space<vmem>>, vector<1x64x1xf32>
    %19 = vector.shape_cast %18 : vector<1x64x1xf32> to vector<64x1xf32>
    %cst_16 = arith.constant dense<0xFF800000> : vector<64xf32>
    %20 = vector.multi_reduction <maximumf>, %17, %cst_16 [1] : vector<64x64xf32> to vector<64xf32>
    %21 = vector.shape_cast %20 : vector<64xf32> to vector<64x1xf32>
    %22 = arith.maximumf %19, %21 : vector<64x1xf32>
    %23 = arith.subf %19, %22 : vector<64x1xf32>
    %24 = math.exp %23 : vector<64x1xf32>
    %25 = vector.broadcast %22 : vector<64x1xf32> to vector<64x64xf32>
    %26 = arith.subf %17, %25 : vector<64x64xf32>
    %27 = math.exp %26 : vector<64x64xf32>
    %c0_17 = arith.constant 0 : index
    %c0_18 = arith.constant 0 : index
    %c0_19 = arith.constant 0 : index
    %28 = vector.load %arg9[%c0_17, %c0_18, %c0_19] : memref<4x64x1xf32, #tpu.memory_space<vmem>>, vector<1x64x1xf32>
    %29 = vector.shape_cast %28 : vector<1x64x1xf32> to vector<64x1xf32>
    %30 = arith.mulf %24, %29 : vector<64x1xf32>
    %cst_20 = arith.constant dense<0.000000e+00> : vector<64xf32>
    %31 = vector.multi_reduction <add>, %27, %cst_20 [1] : vector<64x64xf32> to vector<64xf32>
    %32 = vector.shape_cast %31 : vector<64xf32> to vector<64x1xf32>
    %33 = arith.addf %30, %32 : vector<64x1xf32>
    %c0_21 = arith.constant 0 : index
    %c0_22 = arith.constant 0 : index
    %c0_23 = arith.constant 0 : index
    %34 = vector.load %arg9[%c0_21, %c0_22, %c0_23] : memref<4x64x1xf32, #tpu.memory_space<vmem>>, vector<1x64x1xf32>
    %35 = vector.shape_cast %34 : vector<1x64x1xf32> to vector<64x1xf32>
    %36 = vector.shape_cast %33 : vector<64x1xf32> to vector<1x64x1xf32>
    tpu.vector_store %arg9[%c0_21, %c0_22, %c0_23], %36 {strides = array<i32>} : memref<4x64x1xf32, #tpu.memory_space<vmem>>, vector<1x64x1xf32>,
    %c0_24 = arith.constant 0 : index
    %c0_25 = arith.constant 0 : index
    %c0_26 = arith.constant 0 : index
    %37 = vector.load %arg10[%c0_24, %c0_25, %c0_26] : memref<4x64x32xf32, #tpu.memory_space<vmem>>, vector<1x64x32xf32>
    %38 = vector.shape_cast %37 : vector<1x64x32xf32> to vector<64x32xf32>
    %39 = vector.broadcast %24 : vector<64x1xf32> to vector<64x32xf32>
    %40 = arith.mulf %39, %38 : vector<64x32xf32>
    %41 = arith.truncf %27 : vector<64x64xf32> to vector<64x64xbf16>
    %42 = vector.extract_strided_slice %8 {offsets = [0, 0], sizes = [64, 32], strides = [1, 1]} : vector<64x128xbf16> to vector<64x32xbf16>
    %cst_27 = arith.constant dense<0.000000e+00> : vector<64x32xf32>
    %43 = tpu.matmul %41, %42, %cst_27 {dimension_numbers = #tpu.dot_dimension_numbers<[1], [0], [0], [1], [0, 0, 1, 1], [], []>} : vector<64x64xbf16>, vector<64x32xbf16>, vector<64x32xf32> -> vector<64x32xf32>
    %44 = arith.addf %40, %43 : vector<64x32xf32>
    %c0_28 = arith.constant 0 : index
    %c0_29 = arith.constant 0 : index
    %c0_30 = arith.constant 0 : index
    %45 = vector.load %arg10[%c0_28, %c0_29, %c0_30] : memref<4x64x32xf32, #tpu.memory_space<vmem>>, vector<1x64x32xf32>
    %46 = vector.shape_cast %45 : vector<1x64x32xf32> to vector<64x32xf32>
    %47 = vector.shape_cast %44 : vector<64x32xf32> to vector<1x64x32xf32>
    tpu.vector_store %arg10[%c0_28, %c0_29, %c0_30], %47 {strides = array<i32>} : memref<4x64x32xf32, #tpu.memory_space<vmem>>, vector<1x64x32xf32>,
    %c0_31 = arith.constant 0 : index
    %c0_32 = arith.constant 0 : index
    %c0_33 = arith.constant 0 : index
    %48 = vector.load %arg8[%c0_31, %c0_32, %c0_33] : memref<4x64x1xf32, #tpu.memory_space<vmem>>, vector<1x64x1xf32>
    %49 = vector.shape_cast %48 : vector<1x64x1xf32> to vector<64x1xf32>
    %50 = vector.shape_cast %22 : vector<64x1xf32> to vector<1x64x1xf32>
    tpu.vector_store %arg8[%c0_31, %c0_32, %c0_33], %50 {strides = array<i32>} : memref<4x64x1xf32, #tpu.memory_space<vmem>>, vector<1x64x1xf32>,
    %51 = vector.extract_strided_slice %4 {offsets = [0, 32], sizes = [64, 32], strides = [1, 1]} : vector<64x128xbf16> to vector<64x32xbf16>
    %52 = vector.extract_strided_slice %6 {offsets = [0, 32], sizes = [64, 32], strides = [1, 1]} : vector<64x128xbf16> to vector<64x32xbf16>
    %cst_34 = arith.constant dense<0.000000e+00> : vector<64x64xf32>
    %53 = tpu.matmul %51, %52, %cst_34 {dimension_numbers = #tpu.dot_dimension_numbers<[1], [1], [0], [0], [0, 0, 1, 0], [], []>} : vector<64x32xbf16>, vector<64x32xbf16>, vector<64x64xf32> -> vector<64x64xf32>
    %cst_35 = arith.constant 0.176776692 : f32
    %54 = vector.broadcast %cst_35 : f32 to vector<64x64xf32>
    %55 = arith.mulf %53, %54 : vector<64x64xf32>
    %56 = vector.broadcast %10 : vector<1x64xf32> to vector<64x64xf32>
    %57 = arith.addf %55, %56 : vector<64x64xf32>
    %c1 = arith.constant 1 : index
    %c0_36 = arith.constant 0 : index
    %c0_37 = arith.constant 0 : index
    %58 = vector.load %arg8[%c1, %c0_36, %c0_37] : memref<4x64x1xf32, #tpu.memory_space<vmem>>, vector<1x64x1xf32>
    %59 = vector.shape_cast %58 : vector<1x64x1xf32> to vector<64x1xf32>
    %cst_38 = arith.constant dense<0xFF800000> : vector<64xf32>
    %60 = vector.multi_reduction <maximumf>, %57, %cst_38 [1] : vector<64x64xf32> to vector<64xf32>
    %61 = vector.shape_cast %60 : vector<64xf32> to vector<64x1xf32>
    %62 = arith.maximumf %59, %61 : vector<64x1xf32>
    %63 = arith.subf %59, %62 : vector<64x1xf32>
    %64 = math.exp %63 : vector<64x1xf32>
    %65 = vector.broadcast %62 : vector<64x1xf32> to vector<64x64xf32>
    %66 = arith.subf %57, %65 : vector<64x64xf32>
    %67 = math.exp %66 : vector<64x64xf32>
    %c1_39 = arith.constant 1 : index
    %c0_40 = arith.constant 0 : index
    %c0_41 = arith.constant 0 : index
    %68 = vector.load %arg9[%c1_39, %c0_40, %c0_41] : memref<4x64x1xf32, #tpu.memory_space<vmem>>, vector<1x64x1xf32>
    %69 = vector.shape_cast %68 : vector<1x64x1xf32> to vector<64x1xf32>
    %70 = arith.mulf %64, %69 : vector<64x1xf32>
    %cst_42 = arith.constant dense<0.000000e+00> : vector<64xf32>
    %71 = vector.multi_reduction <add>, %67, %cst_42 [1] : vector<64x64xf32> to vector<64xf32>
    %72 = vector.shape_cast %71 : vector<64xf32> to vector<64x1xf32>
    %73 = arith.addf %70, %72 : vector<64x1xf32>
    %c1_43 = arith.constant 1 : index
    %c0_44 = arith.constant 0 : index
    %c0_45 = arith.constant 0 : index
    %74 = vector.load %arg9[%c1_43, %c0_44, %c0_45] : memref<4x64x1xf32, #tpu.memory_space<vmem>>, vector<1x64x1xf32>
    %75 = vector.shape_cast %74 : vector<1x64x1xf32> to vector<64x1xf32>
    %76 = vector.shape_cast %73 : vector<64x1xf32> to vector<1x64x1xf32>
    tpu.vector_store %arg9[%c1_43, %c0_44, %c0_45], %76 {strides = array<i32>} : memref<4x64x1xf32, #tpu.memory_space<vmem>>, vector<1x64x1xf32>,
    %c1_46 = arith.constant 1 : index
    %c0_47 = arith.constant 0 : index
    %c0_48 = arith.constant 0 : index
    %77 = vector.load %arg10[%c1_46, %c0_47, %c0_48] : memref<4x64x32xf32, #tpu.memory_space<vmem>>, vector<1x64x32xf32>
    %78 = vector.shape_cast %77 : vector<1x64x32xf32> to vector<64x32xf32>
    %79 = vector.broadcast %64 : vector<64x1xf32> to vector<64x32xf32>
    %80 = arith.mulf %79, %78 : vector<64x32xf32>
    %81 = arith.truncf %67 : vector<64x64xf32> to vector<64x64xbf16>
    %82 = vector.extract_strided_slice %8 {offsets = [0, 32], sizes = [64, 32], strides = [1, 1]} : vector<64x128xbf16> to vector<64x32xbf16>
    %cst_49 = arith.constant dense<0.000000e+00> : vector<64x32xf32>
    %83 = tpu.matmul %81, %82, %cst_49 {dimension_numbers = #tpu.dot_dimension_numbers<[1], [0], [0], [1], [0, 0, 1, 1], [], []>} : vector<64x64xbf16>, vector<64x32xbf16>, vector<64x32xf32> -> vector<64x32xf32>
    %84 = arith.addf %80, %83 : vector<64x32xf32>
    %c1_50 = arith.constant 1 : index
    %c0_51 = arith.constant 0 : index
    %c0_52 = arith.constant 0 : index
    %85 = vector.load %arg10[%c1_50, %c0_51, %c0_52] : memref<4x64x32xf32, #tpu.memory_space<vmem>>, vector<1x64x32xf32>
    %86 = vector.shape_cast %85 : vector<1x64x32xf32> to vector<64x32xf32>
    %87 = vector.shape_cast %84 : vector<64x32xf32> to vector<1x64x32xf32>
    tpu.vector_store %arg10[%c1_50, %c0_51, %c0_52], %87 {strides = array<i32>} : memref<4x64x32xf32, #tpu.memory_space<vmem>>, vector<1x64x32xf32>,
    %c1_53 = arith.constant 1 : index
    %c0_54 = arith.constant 0 : index
    %c0_55 = arith.constant 0 : index
    %88 = vector.load %arg8[%c1_53, %c0_54, %c0_55] : memref<4x64x1xf32, #tpu.memory_space<vmem>>, vector<1x64x1xf32>
    %89 = vector.shape_cast %88 : vector<1x64x1xf32> to vector<64x1xf32>
    %90 = vector.shape_cast %62 : vector<64x1xf32> to vector<1x64x1xf32>
    tpu.vector_store %arg8[%c1_53, %c0_54, %c0_55], %90 {strides = array<i32>} : memref<4x64x1xf32, #tpu.memory_space<vmem>>, vector<1x64x1xf32>,
    %91 = vector.extract_strided_slice %4 {offsets = [0, 64], sizes = [64, 32], strides = [1, 1]} : vector<64x128xbf16> to vector<64x32xbf16>
    %92 = vector.extract_strided_slice %6 {offsets = [0, 64], sizes = [64, 32], strides = [1, 1]} : vector<64x128xbf16> to vector<64x32xbf16>
    %cst_56 = arith.constant dense<0.000000e+00> : vector<64x64xf32>
    %93 = tpu.matmul %91, %92, %cst_56 {dimension_numbers = #tpu.dot_dimension_numbers<[1], [1], [0], [0], [0, 0, 1, 0], [], []>} : vector<64x32xbf16>, vector<64x32xbf16>, vector<64x64xf32> -> vector<64x64xf32>
    %cst_57 = arith.constant 0.176776692 : f32
    %94 = vector.broadcast %cst_57 : f32 to vector<64x64xf32>
    %95 = arith.mulf %93, %94 : vector<64x64xf32>
    %96 = vector.broadcast %10 : vector<1x64xf32> to vector<64x64xf32>
    %97 = arith.addf %95, %96 : vector<64x64xf32>
    %c2 = arith.constant 2 : index
    %c0_58 = arith.constant 0 : index
    %c0_59 = arith.constant 0 : index
    %98 = vector.load %arg8[%c2, %c0_58, %c0_59] : memref<4x64x1xf32, #tpu.memory_space<vmem>>, vector<1x64x1xf32>
    %99 = vector.shape_cast %98 : vector<1x64x1xf32> to vector<64x1xf32>
    %cst_60 = arith.constant dense<0xFF800000> : vector<64xf32>
    %100 = vector.multi_reduction <maximumf>, %97, %cst_60 [1] : vector<64x64xf32> to vector<64xf32>
    %101 = vector.shape_cast %100 : vector<64xf32> to vector<64x1xf32>
    %102 = arith.maximumf %99, %101 : vector<64x1xf32>
    %103 = arith.subf %99, %102 : vector<64x1xf32>
    %104 = math.exp %103 : vector<64x1xf32>
    %105 = vector.broadcast %102 : vector<64x1xf32> to vector<64x64xf32>
    %106 = arith.subf %97, %105 : vector<64x64xf32>
    %107 = math.exp %106 : vector<64x64xf32>
    %c2_61 = arith.constant 2 : index
    %c0_62 = arith.constant 0 : index
    %c0_63 = arith.constant 0 : index
    %108 = vector.load %arg9[%c2_61, %c0_62, %c0_63] : memref<4x64x1xf32, #tpu.memory_space<vmem>>, vector<1x64x1xf32>
    %109 = vector.shape_cast %108 : vector<1x64x1xf32> to vector<64x1xf32>
    %110 = arith.mulf %104, %109 : vector<64x1xf32>
    %cst_64 = arith.constant dense<0.000000e+00> : vector<64xf32>
    %111 = vector.multi_reduction <add>, %107, %cst_64 [1] : vector<64x64xf32> to vector<64xf32>
    %112 = vector.shape_cast %111 : vector<64xf32> to vector<64x1xf32>
    %113 = arith.addf %110, %112 : vector<64x1xf32>
    %c2_65 = arith.constant 2 : index
    %c0_66 = arith.constant 0 : index
    %c0_67 = arith.constant 0 : index
    %114 = vector.load %arg9[%c2_65, %c0_66, %c0_67] : memref<4x64x1xf32, #tpu.memory_space<vmem>>, vector<1x64x1xf32>
    %115 = vector.shape_cast %114 : vector<1x64x1xf32> to vector<64x1xf32>
    %116 = vector.shape_cast %113 : vector<64x1xf32> to vector<1x64x1xf32>
    tpu.vector_store %arg9[%c2_65, %c0_66, %c0_67], %116 {strides = array<i32>} : memref<4x64x1xf32, #tpu.memory_space<vmem>>, vector<1x64x1xf32>,
    %c2_68 = arith.constant 2 : index
    %c0_69 = arith.constant 0 : index
    %c0_70 = arith.constant 0 : index
    %117 = vector.load %arg10[%c2_68, %c0_69, %c0_70] : memref<4x64x32xf32, #tpu.memory_space<vmem>>, vector<1x64x32xf32>
    %118 = vector.shape_cast %117 : vector<1x64x32xf32> to vector<64x32xf32>
    %119 = vector.broadcast %104 : vector<64x1xf32> to vector<64x32xf32>
    %120 = arith.mulf %119, %118 : vector<64x32xf32>
    %121 = arith.truncf %107 : vector<64x64xf32> to vector<64x64xbf16>
    %122 = vector.extract_strided_slice %8 {offsets = [0, 64], sizes = [64, 32], strides = [1, 1]} : vector<64x128xbf16> to vector<64x32xbf16>
    %cst_71 = arith.constant dense<0.000000e+00> : vector<64x32xf32>
    %123 = tpu.matmul %121, %122, %cst_71 {dimension_numbers = #tpu.dot_dimension_numbers<[1], [0], [0], [1], [0, 0, 1, 1], [], []>} : vector<64x64xbf16>, vector<64x32xbf16>, vector<64x32xf32> -> vector<64x32xf32>
    %124 = arith.addf %120, %123 : vector<64x32xf32>
    %c2_72 = arith.constant 2 : index
    %c0_73 = arith.constant 0 : index
    %c0_74 = arith.constant 0 : index
    %125 = vector.load %arg10[%c2_72, %c0_73, %c0_74] : memref<4x64x32xf32, #tpu.memory_space<vmem>>, vector<1x64x32xf32>
    %126 = vector.shape_cast %125 : vector<1x64x32xf32> to vector<64x32xf32>
    %127 = vector.shape_cast %124 : vector<64x32xf32> to vector<1x64x32xf32>
    tpu.vector_store %arg10[%c2_72, %c0_73, %c0_74], %127 {strides = array<i32>} : memref<4x64x32xf32, #tpu.memory_space<vmem>>, vector<1x64x32xf32>,
    %c2_75 = arith.constant 2 : index
    %c0_76 = arith.constant 0 : index
    %c0_77 = arith.constant 0 : index
    %128 = vector.load %arg8[%c2_75, %c0_76, %c0_77] : memref<4x64x1xf32, #tpu.memory_space<vmem>>, vector<1x64x1xf32>
    %129 = vector.shape_cast %128 : vector<1x64x1xf32> to vector<64x1xf32>
    %130 = vector.shape_cast %102 : vector<64x1xf32> to vector<1x64x1xf32>
    tpu.vector_store %arg8[%c2_75, %c0_76, %c0_77], %130 {strides = array<i32>} : memref<4x64x1xf32, #tpu.memory_space<vmem>>, vector<1x64x1xf32>,
    %131 = vector.extract_strided_slice %4 {offsets = [0, 96], sizes = [64, 32], strides = [1, 1]} : vector<64x128xbf16> to vector<64x32xbf16>
    %132 = vector.extract_strided_slice %6 {offsets = [0, 96], sizes = [64, 32], strides = [1, 1]} : vector<64x128xbf16> to vector<64x32xbf16>
    %cst_78 = arith.constant dense<0.000000e+00> : vector<64x64xf32>
    %133 = tpu.matmul %131, %132, %cst_78 {dimension_numbers = #tpu.dot_dimension_numbers<[1], [1], [0], [0], [0, 0, 1, 0], [], []>} : vector<64x32xbf16>, vector<64x32xbf16>, vector<64x64xf32> -> vector<64x64xf32>
    %cst_79 = arith.constant 0.176776692 : f32
    %134 = vector.broadcast %cst_79 : f32 to vector<64x64xf32>
    %135 = arith.mulf %133, %134 : vector<64x64xf32>
    %136 = vector.broadcast %10 : vector<1x64xf32> to vector<64x64xf32>
    %137 = arith.addf %135, %136 : vector<64x64xf32>
    %c3 = arith.constant 3 : index
    %c0_80 = arith.constant 0 : index
    %c0_81 = arith.constant 0 : index
    %138 = vector.load %arg8[%c3, %c0_80, %c0_81] : memref<4x64x1xf32, #tpu.memory_space<vmem>>, vector<1x64x1xf32>
    %139 = vector.shape_cast %138 : vector<1x64x1xf32> to vector<64x1xf32>
    %cst_82 = arith.constant dense<0xFF800000> : vector<64xf32>
    %140 = vector.multi_reduction <maximumf>, %137, %cst_82 [1] : vector<64x64xf32> to vector<64xf32>
    %141 = vector.shape_cast %140 : vector<64xf32> to vector<64x1xf32>
    %142 = arith.maximumf %139, %141 : vector<64x1xf32>
    %143 = arith.subf %139, %142 : vector<64x1xf32>
    %144 = math.exp %143 : vector<64x1xf32>
    %145 = vector.broadcast %142 : vector<64x1xf32> to vector<64x64xf32>
    %146 = arith.subf %137, %145 : vector<64x64xf32>
    %147 = math.exp %146 : vector<64x64xf32>
    %c3_83 = arith.constant 3 : index
    %c0_84 = arith.constant 0 : index
    %c0_85 = arith.constant 0 : index
    %148 = vector.load %arg9[%c3_83, %c0_84, %c0_85] : memref<4x64x1xf32, #tpu.memory_space<vmem>>, vector<1x64x1xf32>
    %149 = vector.shape_cast %148 : vector<1x64x1xf32> to vector<64x1xf32>
    %150 = arith.mulf %144, %149 : vector<64x1xf32>
    %cst_86 = arith.constant dense<0.000000e+00> : vector<64xf32>
    %151 = vector.multi_reduction <add>, %147, %cst_86 [1] : vector<64x64xf32> to vector<64xf32>
    %152 = vector.shape_cast %151 : vector<64xf32> to vector<64x1xf32>
    %153 = arith.addf %150, %152 : vector<64x1xf32>
    %c3_87 = arith.constant 3 : index
    %c0_88 = arith.constant 0 : index
    %c0_89 = arith.constant 0 : index
    %154 = vector.load %arg9[%c3_87, %c0_88, %c0_89] : memref<4x64x1xf32, #tpu.memory_space<vmem>>, vector<1x64x1xf32>
    %155 = vector.shape_cast %154 : vector<1x64x1xf32> to vector<64x1xf32>
    %156 = vector.shape_cast %153 : vector<64x1xf32> to vector<1x64x1xf32>
    tpu.vector_store %arg9[%c3_87, %c0_88, %c0_89], %156 {strides = array<i32>} : memref<4x64x1xf32, #tpu.memory_space<vmem>>, vector<1x64x1xf32>,
    %c3_90 = arith.constant 3 : index
    %c0_91 = arith.constant 0 : index
    %c0_92 = arith.constant 0 : index
    %157 = vector.load %arg10[%c3_90, %c0_91, %c0_92] : memref<4x64x32xf32, #tpu.memory_space<vmem>>, vector<1x64x32xf32>
    %158 = vector.shape_cast %157 : vector<1x64x32xf32> to vector<64x32xf32>
    %159 = vector.broadcast %144 : vector<64x1xf32> to vector<64x32xf32>
    %160 = arith.mulf %159, %158 : vector<64x32xf32>
    %161 = arith.truncf %147 : vector<64x64xf32> to vector<64x64xbf16>
    %162 = vector.extract_strided_slice %8 {offsets = [0, 96], sizes = [64, 32], strides = [1, 1]} : vector<64x128xbf16> to vector<64x32xbf16>
    %cst_93 = arith.constant dense<0.000000e+00> : vector<64x32xf32>
    %163 = tpu.matmul %161, %162, %cst_93 {dimension_numbers = #tpu.dot_dimension_numbers<[1], [0], [0], [1], [0, 0, 1, 1], [], []>} : vector<64x64xbf16>, vector<64x32xbf16>, vector<64x32xf32> -> vector<64x32xf32>
    %164 = arith.addf %160, %163 : vector<64x32xf32>
    %c3_94 = arith.constant 3 : index
    %c0_95 = arith.constant 0 : index
    %c0_96 = arith.constant 0 : index
    %165 = vector.load %arg10[%c3_94, %c0_95, %c0_96] : memref<4x64x32xf32, #tpu.memory_space<vmem>>, vector<1x64x32xf32>
    %166 = vector.shape_cast %165 : vector<1x64x32xf32> to vector<64x32xf32>
    %167 = vector.shape_cast %164 : vector<64x32xf32> to vector<1x64x32xf32>
    tpu.vector_store %arg10[%c3_94, %c0_95, %c0_96], %167 {strides = array<i32>} : memref<4x64x32xf32, #tpu.memory_space<vmem>>, vector<1x64x32xf32>,
    %c3_97 = arith.constant 3 : index
    %c0_98 = arith.constant 0 : index
    %c0_99 = arith.constant 0 : index
    %168 = vector.load %arg8[%c3_97, %c0_98, %c0_99] : memref<4x64x1xf32, #tpu.memory_space<vmem>>, vector<1x64x1xf32>
    %169 = vector.shape_cast %168 : vector<1x64x1xf32> to vector<64x1xf32>
    %170 = vector.shape_cast %142 : vector<64x1xf32> to vector<1x64x1xf32>
    tpu.vector_store %arg8[%c3_97, %c0_98, %c0_99], %170 {strides = array<i32>} : memref<4x64x1xf32, #tpu.memory_space<vmem>>, vector<1x64x1xf32>,
    %c0_i32_100 = arith.constant 0 : i32
    %171 = arith.cmpi eq, %arg2, %c0_i32_100 : i32
    %172 = arith.extui %171 : i1 to i32
    %c0_i32_101 = arith.constant 0 : i32
    %173 = arith.cmpi ne, %172, %c0_i32_101 : i32
    scf.if %173 {
      %c0_102 = arith.constant 0 : index
      %c0_103 = arith.constant 0 : index
      %c0_104 = arith.constant 0 : index
      %174 = vector.load %arg10[%c0_102, %c0_103, %c0_104] : memref<4x64x32xf32, #tpu.memory_space<vmem>>, vector<1x64x32xf32>
      %175 = vector.shape_cast %174 : vector<1x64x32xf32> to vector<64x32xf32>
      %c0_105 = arith.constant 0 : index
      %c0_106 = arith.constant 0 : index
      %c0_107 = arith.constant 0 : index
      %176 = vector.load %arg9[%c0_105, %c0_106, %c0_107] : memref<4x64x1xf32, #tpu.memory_space<vmem>>, vector<1x64x1xf32>
      %177 = vector.shape_cast %176 : vector<1x64x1xf32> to vector<64x1xf32>
      %178 = tpu.reciprocal %177 {approx = true} : vector<64x1xf32> -> vector<64x1xf32>
      %179 = vector.broadcast %178 : vector<64x1xf32> to vector<64x32xf32>
      %180 = arith.mulf %175, %179 : vector<64x32xf32>
      %c1_108 = arith.constant 1 : index
      %c0_109 = arith.constant 0 : index
      %c0_110 = arith.constant 0 : index
      %181 = vector.load %arg10[%c1_108, %c0_109, %c0_110] : memref<4x64x32xf32, #tpu.memory_space<vmem>>, vector<1x64x32xf32>
      %182 = vector.shape_cast %181 : vector<1x64x32xf32> to vector<64x32xf32>
      %c1_111 = arith.constant 1 : index
      %c0_112 = arith.constant 0 : index
      %c0_113 = arith.constant 0 : index
      %183 = vector.load %arg9[%c1_111, %c0_112, %c0_113] : memref<4x64x1xf32, #tpu.memory_space<vmem>>, vector<1x64x1xf32>
      %184 = vector.shape_cast %183 : vector<1x64x1xf32> to vector<64x1xf32>
      %185 = tpu.reciprocal %184 {approx = true} : vector<64x1xf32> -> vector<64x1xf32>
      %186 = vector.broadcast %185 : vector<64x1xf32> to vector<64x32xf32>
      %187 = arith.mulf %182, %186 : vector<64x32xf32>
      %c2_114 = arith.constant 2 : index
      %c0_115 = arith.constant 0 : index
      %c0_116 = arith.constant 0 : index
      %188 = vector.load %arg10[%c2_114, %c0_115, %c0_116] : memref<4x64x32xf32, #tpu.memory_space<vmem>>, vector<1x64x32xf32>
      %189 = vector.shape_cast %188 : vector<1x64x32xf32> to vector<64x32xf32>
      %c2_117 = arith.constant 2 : index
      %c0_118 = arith.constant 0 : index
      %c0_119 = arith.constant 0 : index
      %190 = vector.load %arg9[%c2_117, %c0_118, %c0_119] : memref<4x64x1xf32, #tpu.memory_space<vmem>>, vector<1x64x1xf32>
      %191 = vector.shape_cast %190 : vector<1x64x1xf32> to vector<64x1xf32>
      %192 = tpu.reciprocal %191 {approx = true} : vector<64x1xf32> -> vector<64x1xf32>
      %193 = vector.broadcast %192 : vector<64x1xf32> to vector<64x32xf32>
      %194 = arith.mulf %189, %193 : vector<64x32xf32>
      %c3_120 = arith.constant 3 : index
      %c0_121 = arith.constant 0 : index
      %c0_122 = arith.constant 0 : index
      %195 = vector.load %arg10[%c3_120, %c0_121, %c0_122] : memref<4x64x32xf32, #tpu.memory_space<vmem>>, vector<1x64x32xf32>
      %196 = vector.shape_cast %195 : vector<1x64x32xf32> to vector<64x32xf32>
      %c3_123 = arith.constant 3 : index
      %c0_124 = arith.constant 0 : index
      %c0_125 = arith.constant 0 : index
      %197 = vector.load %arg9[%c3_123, %c0_124, %c0_125] : memref<4x64x1xf32, #tpu.memory_space<vmem>>, vector<1x64x1xf32>
      %198 = vector.shape_cast %197 : vector<1x64x1xf32> to vector<64x1xf32>
      %199 = tpu.reciprocal %198 {approx = true} : vector<64x1xf32> -> vector<64x1xf32>
      %200 = vector.broadcast %199 : vector<64x1xf32> to vector<64x32xf32>
      %201 = arith.mulf %196, %200 : vector<64x32xf32>
      %202 = tpu.concatenate %180, %187, %194, %201 in 1 : vector<64x32xf32>, vector<64x32xf32>, vector<64x32xf32>, vector<64x32xf32> -> vector<64x128xf32>
      %203 = arith.truncf %202 : vector<64x128xf32> to vector<64x128xbf16>
      %c0_126 = arith.constant 0 : index
      %c0_127 = arith.constant 0 : index
      %c0_128 = arith.constant 0 : index
      %204 = vector.load %arg7[%c0_126, %c0_127, %c0_128] : memref<1x64x128xbf16, #tpu.memory_space<vmem>>, vector<1x64x128xbf16>
      %205 = vector.shape_cast %204 : vector<1x64x128xbf16> to vector<64x128xbf16>
      %206 = vector.shape_cast %203 : vector<64x128xbf16> to vector<1x64x128xbf16>
      tpu.vector_store %arg7[%c0_126, %c0_127, %c0_128], %206 {strides = array<i32>} : memref<1x64x128xbf16, #tpu.memory_space<vmem>>, vector<1x64x128xbf16>,
    } else {
    }
    return
  }
  func.func @transform_0(%arg0: i32, %arg1: i32, %arg2: i32) -> (i32, i32, i32) {
    %c0_i32 = arith.constant 0 : i32
    %c0_i32_0 = arith.constant 0 : i32
    return %arg0, %arg1, %c0_i32 : i32, i32, i32
  }
  func.func @transform_1(%arg0: i32, %arg1: i32, %arg2: i32) -> (i32, i32, i32) {
    %c1_i32 = arith.constant 1 : i32
    %c0_i32 = arith.constant 0 : i32
    return %arg0, %arg2, %c1_i32 : i32, i32, i32
  }
  func.func @transform_2(%arg0: i32, %arg1: i32, %arg2: i32) -> (i32, i32, i32) {
    %c2_i32 = arith.constant 2 : i32
    %c0_i32 = arith.constant 0 : i32
    return %arg0, %arg2, %c2_i32 : i32, i32, i32
  }
  func.func @transform_3(%arg0: i32, %arg1: i32, %arg2: i32) -> (i32, i32, i32) {
    %c0_i32 = arith.constant 0 : i32
    %c0_i32_0 = arith.constant 0 : i32
    return %arg0, %c0_i32, %arg2 : i32, i32, i32
  }
  func.func @transform_4(%arg0: i32, %arg1: i32, %arg2: i32) -> (i32, i32, i32) {
    %c0_i32 = arith.constant 0 : i32
    %c0_i32_0 = arith.constant 0 : i32
    return %arg0, %arg1, %c0_i32 : i32, i32, i32
  }
}

module attributes {stable_mosaic.version = 11 : i64} {
  func.func @_norm_swiglu_kernel(%arg0: i32, %arg1: i32, %arg2: memref<64x128xf32, #tpu.memory_space<vmem>>, %arg3: memref<1x128xf32, #tpu.memory_space<vmem>>, %arg4: memref<128x256xbf16, #tpu.memory_space<vmem>>, %arg5: memref<1x256xf32, #tpu.memory_space<vmem>>, %arg6: memref<128x256xbf16, #tpu.memory_space<vmem>>, %arg7: memref<1x256xf32, #tpu.memory_space<vmem>>, %arg8: memref<64x256xbf16, #tpu.memory_space<vmem>>, %arg9: memref<64x128xbf16, #tpu.memory_space<vmem>>) attributes {dimension_semantics = [#tpu.dimension_semantics<parallel>, #tpu.dimension_semantics<arbitrary>], iteration_bounds = array<i64: 2, 1>, scalar_prefetch = 0 : i64, scratch_operands = 1 : i64, tpu.core_type = #tpu.core_type<tc>, window_params = [{transform_indices = @transform_0, window_bounds = array<i64: 64, 128>}, {pipeline_mode = #tpu.pipeline_mode<synchronous>, transform_indices = @transform_1, window_bounds = array<i64: 1, 128>}, {transform_indices = @transform_2, window_bounds = array<i64: 128, 256>}, {transform_indices = @transform_3, window_bounds = array<i64: 1, 256>}, {transform_indices = @transform_4, window_bounds = array<i64: 128, 256>}, {transform_indices = @transform_5, window_bounds = array<i64: 1, 256>}, {transform_indices = @transform_6, window_bounds = array<i64: 64, 256>}]} {
    %c0_i32 = arith.constant 0 : i32
    %0 = arith.cmpi eq, %arg1, %c0_i32 : i32
    %1 = arith.extui %0 : i1 to i32
    %c0_i32_0 = arith.constant 0 : i32
    %2 = arith.cmpi ne, %1, %c0_i32_0 : i32
    scf.if %2 {
      %c0_14 = arith.constant 0 : index
      %c0_15 = arith.constant 0 : index
      %23 = vector.load %arg2[%c0_14, %c0_15] : memref<64x128xf32, #tpu.memory_space<vmem>>, vector<64x128xf32>
      %24 = arith.mulf %23, %23 : vector<64x128xf32>
      %cst_16 = arith.constant dense<0.000000e+00> : vector<64xf32>
      %25 = vector.multi_reduction <add>, %24, %cst_16 [1] : vector<64x128xf32> to vector<64xf32>
      %26 = vector.shape_cast %25 : vector<64xf32> to vector<64x1xf32>
      %cst_17 = arith.constant 1.280000e+02 : f32
      %27 = vector.broadcast %cst_17 : f32 to vector<64x1xf32>
      %28 = arith.divf %26, %27 : vector<64x1xf32>
      %cst_18 = arith.constant 9.99999997E-7 : f32
      %29 = vector.broadcast %cst_18 : f32 to vector<64x1xf32>
      %30 = arith.addf %28, %29 : vector<64x1xf32>
      %31 = math.rsqrt %30 : vector<64x1xf32>
      %32 = vector.broadcast %31 : vector<64x1xf32> to vector<64x128xf32>
      %33 = arith.mulf %23, %32 : vector<64x128xf32>
      %c0_19 = arith.constant 0 : index
      %c0_20 = arith.constant 0 : index
      %34 = vector.load %arg3[%c0_19, %c0_20] : memref<1x128xf32, #tpu.memory_space<vmem>>, vector<1x128xf32>
      %35 = vector.broadcast %34 : vector<1x128xf32> to vector<64x128xf32>
      %36 = arith.mulf %33, %35 : vector<64x128xf32>
      %37 = arith.truncf %36 : vector<64x128xf32> to vector<64x128xbf16>
      %c0_21 = arith.constant 0 : index
      %c0_22 = arith.constant 0 : index
      %38 = vector.load %arg9[%c0_21, %c0_22] : memref<64x128xbf16, #tpu.memory_space<vmem>>, vector<64x128xbf16>
      tpu.vector_store %arg9[%c0_21, %c0_22], %37 {strides = array<i32>} : memref<64x128xbf16, #tpu.memory_space<vmem>>, vector<64x128xbf16>,
    } else {
    }
    %c0 = arith.constant 0 : index
    %c0_1 = arith.constant 0 : index
    %3 = vector.load %arg9[%c0, %c0_1] : memref<64x128xbf16, #tpu.memory_space<vmem>>, vector<64x128xbf16>
    %c0_2 = arith.constant 0 : index
    %c0_3 = arith.constant 0 : index
    %4 = vector.load %arg4[%c0_2, %c0_3] : memref<128x256xbf16, #tpu.memory_space<vmem>>, vector<128x256xbf16>
    %cst = arith.constant dense<0.000000e+00> : vector<64x256xf32>
    %5 = tpu.matmul %3, %4, %cst {dimension_numbers = #tpu.dot_dimension_numbers<[1], [0], [0], [1], [0, 0, 1, 1], [], []>} : vector<64x128xbf16>, vector<128x256xbf16>, vector<64x256xf32> -> vector<64x256xf32>
    %c0_4 = arith.constant 0 : index
    %c0_5 = arith.constant 0 : index
    %6 = vector.load %arg5[%c0_4, %c0_5] : memref<1x256xf32, #tpu.memory_space<vmem>>, vector<1x256xf32>
    %7 = vector.broadcast %6 : vector<1x256xf32> to vector<64x256xf32>
    %8 = arith.addf %5, %7 : vector<64x256xf32>
    %c0_6 = arith.constant 0 : index
    %c0_7 = arith.constant 0 : index
    %9 = vector.load %arg6[%c0_6, %c0_7] : memref<128x256xbf16, #tpu.memory_space<vmem>>, vector<128x256xbf16>
    %cst_8 = arith.constant dense<0.000000e+00> : vector<64x256xf32>
    %10 = tpu.matmul %3, %9, %cst_8 {dimension_numbers = #tpu.dot_dimension_numbers<[1], [0], [0], [1], [0, 0, 1, 1], [], []>} : vector<64x128xbf16>, vector<128x256xbf16>, vector<64x256xf32> -> vector<64x256xf32>
    %c0_9 = arith.constant 0 : index
    %c0_10 = arith.constant 0 : index
    %11 = vector.load %arg7[%c0_9, %c0_10] : memref<1x256xf32, #tpu.memory_space<vmem>>, vector<1x256xf32>
    %12 = vector.broadcast %11 : vector<1x256xf32> to vector<64x256xf32>
    %13 = arith.addf %10, %12 : vector<64x256xf32>
    %14 = arith.negf %8 : vector<64x256xf32>
    %15 = math.exp %14 : vector<64x256xf32>
    %cst_11 = arith.constant 1.000000e+00 : f32
    %16 = vector.broadcast %cst_11 : f32 to vector<64x256xf32>
    %17 = arith.addf %16, %15 : vector<64x256xf32>
    %18 = arith.divf %16, %17 : vector<64x256xf32>
    %19 = arith.mulf %8, %18 : vector<64x256xf32>
    %20 = arith.mulf %19, %13 : vector<64x256xf32>
    %21 = arith.truncf %20 : vector<64x256xf32> to vector<64x256xbf16>
    %c0_12 = arith.constant 0 : index
    %c0_13 = arith.constant 0 : index
    %22 = vector.load %arg8[%c0_12, %c0_13] : memref<64x256xbf16, #tpu.memory_space<vmem>>, vector<64x256xbf16>
    tpu.vector_store %arg8[%c0_12, %c0_13], %21 {strides = array<i32>} : memref<64x256xbf16, #tpu.memory_space<vmem>>, vector<64x256xbf16>,
    return
  }
  func.func @transform_0(%arg0: i32, %arg1: i32) -> (i32, i32) {
    %c0_i32 = arith.constant 0 : i32
    %c0_i32_0 = arith.constant 0 : i32
    return %arg0, %c0_i32 : i32, i32
  }
  func.func @transform_1(%arg0: i32, %arg1: i32) -> (i32, i32) {
    %c0_i32 = arith.constant 0 : i32
    %c0_i32_0 = arith.constant 0 : i32
    %c0_i32_1 = arith.constant 0 : i32
    return %c0_i32, %c0_i32_0 : i32, i32
  }
  func.func @transform_2(%arg0: i32, %arg1: i32) -> (i32, i32) {
    %c0_i32 = arith.constant 0 : i32
    %c0_i32_0 = arith.constant 0 : i32
    return %c0_i32, %arg1 : i32, i32
  }
  func.func @transform_3(%arg0: i32, %arg1: i32) -> (i32, i32) {
    %c0_i32 = arith.constant 0 : i32
    %c0_i32_0 = arith.constant 0 : i32
    return %c0_i32, %arg1 : i32, i32
  }
  func.func @transform_4(%arg0: i32, %arg1: i32) -> (i32, i32) {
    %c0_i32 = arith.constant 0 : i32
    %c0_i32_0 = arith.constant 0 : i32
    return %c0_i32, %arg1 : i32, i32
  }
  func.func @transform_5(%arg0: i32, %arg1: i32) -> (i32, i32) {
    %c0_i32 = arith.constant 0 : i32
    %c0_i32_0 = arith.constant 0 : i32
    return %c0_i32, %arg1 : i32, i32
  }
  func.func @transform_6(%arg0: i32, %arg1: i32) -> (i32, i32) {
    %c0_i32 = arith.constant 0 : i32
    return %arg0, %arg1 : i32, i32
  }
}

module attributes {stable_mosaic.version = 11 : i64} {
  func.func @_linear_residual_kernel(%arg0: i32, %arg1: i32, %arg2: i32, %arg3: memref<64x256xbf16, #tpu.memory_space<vmem>>, %arg4: memref<256x128xbf16, #tpu.memory_space<vmem>>, %arg5: memref<1x128xf32, #tpu.memory_space<vmem>>, %arg6: memref<64x128xf32, #tpu.memory_space<vmem>>, %arg7: memref<64x128xf32, #tpu.memory_space<vmem>>, %arg8: memref<64x128xf32, #tpu.memory_space<vmem>>) attributes {dimension_semantics = [#tpu.dimension_semantics<parallel>, #tpu.dimension_semantics<parallel>, #tpu.dimension_semantics<arbitrary>], iteration_bounds = array<i64: 2, 1, 1>, scalar_prefetch = 0 : i64, scratch_operands = 1 : i64, tpu.core_type = #tpu.core_type<tc>, window_params = [{transform_indices = @transform_0, window_bounds = array<i64: 64, 256>}, {transform_indices = @transform_1, window_bounds = array<i64: 256, 128>}, {transform_indices = @transform_2, window_bounds = array<i64: 1, 128>}, {transform_indices = @transform_3, window_bounds = array<i64: 64, 128>}, {transform_indices = @transform_4, window_bounds = array<i64: 64, 128>}]} {
    %c0_i32 = arith.constant 0 : i32
    %0 = arith.cmpi eq, %arg2, %c0_i32 : i32
    %1 = arith.extui %0 : i1 to i32
    %c0_i32_0 = arith.constant 0 : i32
    %2 = arith.cmpi ne, %1, %c0_i32_0 : i32
    scf.if %2 {
      %cst_10 = arith.constant 0.000000e+00 : f32
      %12 = vector.broadcast %cst_10 : f32 to vector<64x128xf32>
      %c0_11 = arith.constant 0 : index
      %c0_12 = arith.constant 0 : index
      %13 = vector.load %arg8[%c0_11, %c0_12] : memref<64x128xf32, #tpu.memory_space<vmem>>, vector<64x128xf32>
      tpu.vector_store %arg8[%c0_11, %c0_12], %12 {strides = array<i32>} : memref<64x128xf32, #tpu.memory_space<vmem>>, vector<64x128xf32>,
    } else {
    }
    %c0 = arith.constant 0 : index
    %c0_1 = arith.constant 0 : index
    %3 = vector.load %arg8[%c0, %c0_1] : memref<64x128xf32, #tpu.memory_space<vmem>>, vector<64x128xf32>
    %c0_2 = arith.constant 0 : index
    %c0_3 = arith.constant 0 : index
    %4 = vector.load %arg3[%c0_2, %c0_3] : memref<64x256xbf16, #tpu.memory_space<vmem>>, vector<64x256xbf16>
    %c0_4 = arith.constant 0 : index
    %c0_5 = arith.constant 0 : index
    %5 = vector.load %arg4[%c0_4, %c0_5] : memref<256x128xbf16, #tpu.memory_space<vmem>>, vector<256x128xbf16>
    %cst = arith.constant dense<0.000000e+00> : vector<64x128xf32>
    %6 = tpu.matmul %4, %5, %cst {dimension_numbers = #tpu.dot_dimension_numbers<[1], [0], [0], [1], [0, 0, 1, 1], [], []>} : vector<64x256xbf16>, vector<256x128xbf16>, vector<64x128xf32> -> vector<64x128xf32>
    %7 = arith.addf %3, %6 : vector<64x128xf32>
    %c0_6 = arith.constant 0 : index
    %c0_7 = arith.constant 0 : index
    %8 = vector.load %arg8[%c0_6, %c0_7] : memref<64x128xf32, #tpu.memory_space<vmem>>, vector<64x128xf32>
    tpu.vector_store %arg8[%c0_6, %c0_7], %7 {strides = array<i32>} : memref<64x128xf32, #tpu.memory_space<vmem>>, vector<64x128xf32>,
    %c0_i32_8 = arith.constant 0 : i32
    %9 = arith.cmpi eq, %arg2, %c0_i32_8 : i32
    %10 = arith.extui %9 : i1 to i32
    %c0_i32_9 = arith.constant 0 : i32
    %11 = arith.cmpi ne, %10, %c0_i32_9 : i32
    scf.if %11 {
      %c0_10 = arith.constant 0 : index
      %c0_11 = arith.constant 0 : index
      %12 = vector.load %arg8[%c0_10, %c0_11] : memref<64x128xf32, #tpu.memory_space<vmem>>, vector<64x128xf32>
      %c0_12 = arith.constant 0 : index
      %c0_13 = arith.constant 0 : index
      %13 = vector.load %arg5[%c0_12, %c0_13] : memref<1x128xf32, #tpu.memory_space<vmem>>, vector<1x128xf32>
      %14 = vector.broadcast %13 : vector<1x128xf32> to vector<64x128xf32>
      %15 = arith.addf %12, %14 : vector<64x128xf32>
      %c0_14 = arith.constant 0 : index
      %c0_15 = arith.constant 0 : index
      %16 = vector.load %arg6[%c0_14, %c0_15] : memref<64x128xf32, #tpu.memory_space<vmem>>, vector<64x128xf32>
      %17 = arith.addf %15, %16 : vector<64x128xf32>
      %c0_16 = arith.constant 0 : index
      %c0_17 = arith.constant 0 : index
      %18 = vector.load %arg7[%c0_16, %c0_17] : memref<64x128xf32, #tpu.memory_space<vmem>>, vector<64x128xf32>
      tpu.vector_store %arg7[%c0_16, %c0_17], %17 {strides = array<i32>} : memref<64x128xf32, #tpu.memory_space<vmem>>, vector<64x128xf32>,
    } else {
    }
    return
  }
  func.func @transform_0(%arg0: i32, %arg1: i32, %arg2: i32) -> (i32, i32) {
    %c0_i32 = arith.constant 0 : i32
    return %arg0, %arg2 : i32, i32
  }
  func.func @transform_1(%arg0: i32, %arg1: i32, %arg2: i32) -> (i32, i32) {
    %c0_i32 = arith.constant 0 : i32
    return %arg2, %arg1 : i32, i32
  }
  func.func @transform_2(%arg0: i32, %arg1: i32, %arg2: i32) -> (i32, i32) {
    %c0_i32 = arith.constant 0 : i32
    %c0_i32_0 = arith.constant 0 : i32
    return %c0_i32, %arg1 : i32, i32
  }
  func.func @transform_3(%arg0: i32, %arg1: i32, %arg2: i32) -> (i32, i32) {
    %c0_i32 = arith.constant 0 : i32
    return %arg0, %arg1 : i32, i32
  }
  func.func @transform_4(%arg0: i32, %arg1: i32, %arg2: i32) -> (i32, i32) {
    %c0_i32 = arith.constant 0 : i32
    return %arg0, %arg1 : i32, i32
  }
}

</mosaic_0001>

<bundles_post_ra>
// kernel: transformer_layer_forward.7
= control target key start
LH: loop header
LB: loop body
LE: loop exit
PB: predicated region body
PF: predicated region fallthrough
CT: control target
= control target key end

     0   :  { %s858_s15 = smov 0   ;;  %s860_s16 = smov 0   ;;  %s931_s0 = inlined_call_operand.vmem [shape: bf16[128,128], index: 0, kind: input, shape index: {}]   ;;  %s932_s1 = inlined_call_operand.vmem [shape: bf16[128,128], index: 1, kind: input, shape index: {}]   ;;  %s933_s2 = inlined_call_operand.vmem [shape: f32[1,128], index: 2, kind: input, shape index: {}]   ;;  %s934_s3 = inlined_call_operand.vmem [shape: f32[128,128], index: 3, kind: input, shape index: {}]   ;;  %s935_s4 = inlined_call_operand.vmem [shape: f32[128,128], index: 4, kind: output, shape index: {}]  }
   0x1   :  { %s862_s17 = smov 0  }
   0x2 LB: > { %s33_s18 = sadd.s32 1, %s827_s16  ;;  %p699_p0 = scmp.ge.s32.totalorder %s831_s17, 1  ;;  %s831_s17 = sphi %s862_s17, %s14_s17   ;;  %s827_s16 = sphi %s860_s16, %s937_s16   ;;  %s823_s15 = sphi %s858_s15, %s936_s15  }
   0x3   : > { %p35_p1 = scmp.ge.s32.totalorder %s33_s18, 2  ;;  %p229_p2 = scmp.lt.s32.totalorder %s831_s17, 3 }
   0x5   : > { %s939_s18 = smov (%p35_p1, %s33_s18), 0  ;;  %p230_p3 = pnand %p699_p0, %p229_p2 }
   0x6   : > { %v797_v0 = vld [vmem:[%s932_s1] sm:$0xff] (!%p230_p3)   ;;  %s700_s21 = sshll.u32 (!%p230_p3), %s823_s15, 3  ;;  %v798_v1 = vld [vmem:[%s932_s1 + $0x8] sm:$0xff] (!%p230_p3)   ;;  %v799_v2 = vld [vmem:[%s932_s1 + $0x10] sm:$0xff] (!%p230_p3)  }
   0x7   : > { %233 = sbr.rel (%p230_p3) target bundleno = 259 (0x103), region = 36  ;;  %p281_p4 = scmp.lt.s32.totalorder (!%p230_p3), %s700_s21, 15  ;;  %733 = vmatprep.subr.bf16.mxu0 (!%p230_p3), %v797_v0  ;;  %757 = vmatprep.subr.bf16.mxu1 (!%p230_p3), %v797_v0  ;;  %v800_v3 = vld [vmem:[%s932_s1 + $0x18] sm:$0xff] (!%p230_p3)   ;;  %v801_v6 = vld [vmem:[%s932_s1 + $0x20] sm:$0xff] (!%p230_p3)   ;;  %v802_v7 = vld [vmem:[%s932_s1 + $0x28] sm:$0xff] (!%p230_p3)  }
   0x8   : > { %734 = vmatpush3.bf16.msra.mxu0 (!%p230_p3), %v797_v0  ;;  %765 = vmatpush3.bf16.msra.mxu1 (!%p230_p3), %v797_v0  ;;  %v803_v8 = vld [vmem:[%s932_s1 + $0x30] sm:$0xff] (!%p230_p3)   ;;  %v804_v9 = vld [vmem:[%s932_s1 + $0x38] sm:$0xff] (!%p230_p3)   ;;  %v718_v12 = vld [vmem:[%s933_s2] ss:$0 sm:$0xff] (!%p230_p3) }
   0x9   : > { %735 = vmatprep.subr.bf16.mxu0 (!%p230_p3), %v798_v1  ;;  %758 = vmatprep.subr.bf16.mxu1 (!%p230_p3), %v798_v1 }
   0xc   : > { %736 = vmatpush3.bf16.msra.mxu0 (!%p230_p3), %v798_v1  ;;  %766 = vmatpush3.bf16.msra.mxu1 (!%p230_p3), %v798_v1 }
   0xd   : > { %737 = vmatprep.subr.bf16.mxu0 (!%p230_p3), %v799_v2  ;;  %759 = vmatprep.subr.bf16.mxu1 (!%p230_p3), %v799_v2 }
   0xe   : > { %s941_s21 = smov (!%p281_p4, %s700_s21), 15 }
   0xf   : > { %s701_s26 = sshll.u32 %s941_s21, 2  ;;  %s703_s14 = sshll.u32 %s941_s21, 3 }
  0x10   : > { %s891_s29 = scalar_lea.vmem %s931_s0, %s701_s26  ;;  %738 = vmatpush3.bf16.msra.mxu0 %v799_v2  ;;  %767 = vmatpush3.bf16.msra.mxu1 %v799_v2  ;;  %s308_s20 = scalar_lea.vmem %s934_s3, %s703_s14 }
  0x11   : > { %v805_v4 = vld [vmem:[%s891_s29] sm:$0xff]   ;;  %v806_v5 = vld [vmem:[%s891_s29 + $0x10] sm:$0xff]   ;;  %739 = vmatprep.subr.bf16.mxu0 %v800_v3  ;;  %760 = vmatprep.subr.bf16.mxu1 %v800_v3  ;;  %v807_v10 = vld [vmem:[%s891_s29 + $0x8] sm:$0xff]   ;;  %s317_s25 = scalar_lea.vmem %s935_s4, %s703_s14 }
  0x12   : > { %749 = vmatprep.mubr.bf16.mxu0 %v805_v4  ;;  %753 = vmatprep.mubr.bf16.mxu1 %v806_v5  ;;  %v808_v11 = vld [vmem:[%s891_s29 + $0x18] sm:$0xff]   ;;  %v545_v14 = vld [vmem:[%s308_s20 + $0x10] sm:$0xff]  ;;  %v543_v20 = vld [vmem:[%s308_s20] sm:$0xff] }
  0x13   : > { %v549_v16 = vld [vmem:[%s308_s20 + $0x30] sm:$0xff]  ;;  %v547_v22 = vld [vmem:[%s308_s20 + $0x20] sm:$0xff]  ;;  %v546_v26 = vld [vmem:[%s308_s20 + $0x18] sm:$0xff] }
  0x14   : > { %740 = vmatpush3.bf16.msra.mxu0 %v800_v3  ;;  %768 = vmatpush3.bf16.msra.mxu1 %v800_v3  ;;  %v550_v28 = vld [vmem:[%s308_s20 + $0x38] sm:$0xff]  ;;  %v544_v34 = vld [vmem:[%s308_s20 + $0x8] sm:$0xff] }
  0x15   : > { %741 = vmatprep.subr.bf16.mxu0 %v801_v6  ;;  %761 = vmatprep.subr.bf16.mxu1 %v801_v6  ;;  %v548_v36 = vld [vmem:[%s308_s20 + $0x28] sm:$0xff] }
  0x18   : > { %742 = vmatpush3.bf16.msra.mxu0 %v801_v6  ;;  %769 = vmatpush3.bf16.msra.mxu1 %v801_v6 }
  0x19   : > { %743 = vmatprep.subr.bf16.mxu0 %v802_v7  ;;  %762 = vmatprep.subr.bf16.mxu1 %v802_v7 }
  0x1c   : > { %744 = vmatpush3.bf16.msra.mxu0 %v802_v7  ;;  %770 = vmatpush3.bf16.msra.mxu1 %v802_v7 }
  0x1d   : > { %745 = vmatprep.subr.bf16.mxu0 %v803_v8  ;;  %763 = vmatprep.subr.bf16.mxu1 %v803_v8 }
  0x20   : > { %746 = vmatpush3.bf16.msra.mxu0 %v803_v8  ;;  %771 = vmatpush3.bf16.msra.mxu1 %v803_v8 }
  0x21   : > { %747 = vmatprep.subr.bf16.mxu0 %v804_v9  ;;  %764 = vmatprep.subr.bf16.mxu1 %v804_v9 }
  0x24   : > { %748 = vmatpush3.bf16.msra.mxu0 %v804_v9  ;;  %772 = vmatpush3.bf16.msra.mxu1 %v804_v9 }
  0x27   : > { %750 = vmatmul.mubr.bf16.vlgmr.msra.gmra.mrb[0].mxu0 %v807_v10  ;;  %754 = vmatmul.mubr.bf16.vlgmr.msra.gmra.mrb[0].mxu1 %v808_v11 }
  0xfa   : > { %v751_v13 = vpop.f32.mrb[0].mxu0  ;;  %v755_v15 = vpop.f32.mrb[0].mxu1 }
  0xfb   : > { %v537_v17 = vadd.f32 %v751_v13, %v718_v12  ;;  %v541_v18 = vadd.f32 %v755_v15, %v718_v12  ;;  %v470_v19 = vpop.f32.mrb[1].mxu0  ;;  %v486_v21 = vpop.f32.mrb[1].mxu1 }
  0xfc   : > { %v535_v23 = vadd.f32 %v718_v12, %v470_v19  ;;  %v539_v24 = vadd.f32 %v718_v12, %v486_v21  ;;  %v752_v25 = vpop.f32.mrb[2].mxu0  ;;  %v756_v27 = vpop.f32.mrb[2].mxu1 }
  0xfd   : > { %v553_v29 = vadd.f32 %v545_v14, %v537_v17  ;;  %v557_v30 = vadd.f32 %v549_v16, %v541_v18  ;;  %v538_v31 = vadd.f32 %v752_v25, %v718_v12  ;;  %v542_v32 = vadd.f32 %v756_v27, %v718_v12  ;;  %v473_v33 = vpop.f32.mrb[3].mxu0  ;;  %v489_v35 = vpop.f32.mrb[3].mxu1 }
  0xfe   : > { %v551_v37 = vadd.f32 %v543_v20, %v535_v23  ;;  %v555_v38 = vadd.f32 %v547_v22, %v539_v24  ;;  %v536_v39 = vadd.f32 %v718_v12, %v473_v33  ;;  %v540_v40 = vadd.f32 %v718_v12, %v489_v35 }
  0xff   : > { %561 = vst [vmem:[%s317_s25 + $0x10] sm:$0xff] %v553_v29  ;;  %565 = vst [vmem:[%s317_s25 + $0x30] sm:$0xff] %v557_v30  ;;  %v554_v41 = vadd.f32 %v546_v26, %v538_v31  ;;  %v558_v42 = vadd.f32 %v550_v28, %v542_v32 }
 0x100   : > { %559 = vst [vmem:[%s317_s25] sm:$0xff] %v551_v37  ;;  %563 = vst [vmem:[%s317_s25 + $0x20] sm:$0xff] %v555_v38  ;;  %v552_v43 = vadd.f32 %v544_v34, %v536_v39  ;;  %v556_v44 = vadd.f32 %v548_v36, %v540_v40 }
 0x101   : > { %562 = vst [vmem:[%s317_s25 + $0x18] sm:$0xff] %v554_v41  ;;  %566 = vst [vmem:[%s317_s25 + $0x38] sm:$0xff] %v558_v42 }
 0x102   : > { %560 = vst [vmem:[%s317_s25 + $0x8] sm:$0xff] %v552_v43  ;;  %564 = vst [vmem:[%s317_s25 + $0x28] sm:$0xff] %v556_v44 }
 0x103 PF: > { %s14_s17 = sadd.s32 1, %s831_s17   ;;  %s936_s15 = smov %s827_s16 }
 0x104   : > { %p11_p5 = scmp.ge.s32.totalorder %s14_s17, 4   ;;  %s937_s16 = smov %s939_s18 }
 0x106   :  { %13 = sbr.rel (!%p11_p5) target bundleno = 2 (0x2), region = 83 }

// kernel: transformer_layer_forward.5
= control target key start
LH: loop header
LB: loop body
LE: loop exit
PB: predicated region body
PF: predicated region fallthrough
CT: control target
= control target key end

     0   :  { %s1573_s0 = inlined_call_operand.hbm [shape: f32[128,128], index: 0, kind: input, shape index: {}]   ;;  %s1574_s1 = inlined_call_operand.vmem [shape: f32[1,128], index: 1, kind: input, shape index: {}]   ;;  %s1575_s2 = inlined_call_operand.hbm [shape: bf16[128,384], index: 2, kind: input, shape index: {}]   ;;  %s1576_s3 = inlined_call_operand.vmem [shape: f32[1,384], index: 3, kind: input, shape index: {}]   ;;  %s1577_s4 = inlined_call_operand.vmem [shape: bf16[128,384], index: 4, kind: output, shape index: {}]  }
   0x1   :  { %1584 = sst [smem:[#allocation14_spill]] %s1573_s0 }
   0x2   :  { %1585 = sst [smem:[#allocation15_spill]] %s1574_s1 }
   0x3   :  { %1586 = sst [smem:[#allocation16_spill]] %s1577_s4 }
   0x4   :  { %9 = vsyncpa [#allocation4], 0 }
   0x5   :  { %11 = vsyncpa [#allocation4 + $0x1], 0 }
   0x6   :  { %12 = vsyncpa [#allocation6], 0 }
   0x7   :  { %14 = vsyncpa [#allocation6 + $0x1], 0  ;;  %s1212_s15 = smov 0   ;;  %s1214_s16 = smov 0  }
   0x8   :  { %s1216_s17 = smov 0   ;;  %s1218_s18 = smov 0  }
   0x9   :  { %s1220_s19 = smov 0   ;;  %s1222_s20 = smov 0  }
   0xa   :  { %s1224_s21 = smov 0   ;;  %s1226_s22 = smov 0  }
   0xb   :  { %s1228_s23 = smov 0   ;;  %s1230_s24 = smov 0  }
   0xc   :  { %s1232_s25 = smov 0   ;;  %s1234_s26 = smov 0  }
   0xd   :  { %s1236_s27 = smov 0  }
   0xe LB: > { %1587 = sst [smem:[#allocation10_spill]] %s1166_s24  ;;  %s740_s28 = sadd.s32 4294967295, %s1178_s27   ;;  %s1178_s27 = sphi %s1236_s27, %s20_s27   ;;  %s1174_s26 = sphi %s1234_s26, %s1628_s26   ;;  %s1170_s25 = sphi %s1232_s25, %s1627_s25   ;;  %s1166_s24 = sphi %s1230_s24, %s1626_s24   ;;  %s1162_s23 = sphi %s1228_s23, %s1625_s23   ;;  %s1158_s22 = sphi %s1226_s22, %s1624_s22   ;;  %s1154_s21 = sphi %s1224_s21, %s1623_s21   ;;  %s1150_s20 = sphi %s1222_s20, %s1622_s20   ;;  %s1146_s19 = sphi %s1220_s19, %s1621_s19   ;;  %s1142_s18 = sphi %s1218_s18, %s1620_s18   ;;  %s1138_s17 = sphi %s1216_s17, %s1619_s17   ;;  %s1134_s16 = sphi %s1214_s16, %s1618_s16   ;;  %s1130_s15 = sphi %s1212_s15, %s1617_s15  }
   0xf   : > { %p46_p0 = scmp.ne.s32.totalorder %s1158_s22, %s1154_s21  ;;  %p1579_p1 = scmp.eq.s32.totalorder %s1178_s27, 0 }
  0x10   : > { %p52_p2 = scmp.ne.s32.totalorder %s1154_s21, %s1150_s20  ;;  %p1282_p3 = scmp.eq.s32.totalorder %s740_s28, 0 }
  0x11   : > { %p1286_p4 = scmp.eq.s32.totalorder %s740_s28, 5  ;;  %p48_p5 = por %p1579_p1, %p46_p0 }
  0x12   : > { %p1294_p6 = por %p1282_p3, %p52_p2  ;;  %p1578_p7 = scmp.lt.s32.totalorder %s1178_s27, 6 }
  0x13   : > { %s1589_s6 = scalar_select %p1286_p4, 1, 0 }
  0x14   : > { %s1590_s7 = scalar_select %p1294_p6, 1, 0 }
  0x15   : > { %s180_s8 = sand.u32 1, %s1158_s22   ;;  %s778_s9 = sshll.u32 %s1174_s26, 10 }
  0x16   : > { %s744_s10 = sshll.u32 %s180_s8, 6  ;;  %s1591_s0 = sld [smem:[#allocation14_spill]] }
  0x17   : > { %s184_s14 = scalar_lea.vmem [#allocation3], %s744_s10  ;;  %p1308_p8 = pnand %p1578_p7, %p48_p5 }
  0x18   : > { %s191_s20 = sshll.u32 %s184_s14, 4  ;;  %s1314_s30 = scalar_lea.sflag [#allocation4], %s180_s8  ;;  %s1312_s20 = int_to_ptr.vmem [resolvable:$true] %s191_s20 }
  0x19   : > { %p1010_p10 = pneg %p1308_p8 }
  0x1c   : > { %s1304_s13 = scalar_lea.hbm %s1591_s0, %s778_s9  ;;  %s1013_s12 = scalar_lea.hbm %s1591_s0, 2048 }
  0x1d   : > { %s1008_s11 = scalar_lea.hbm %s1304_s13, 1024  ;;  %p1014_p13 = scmp.lt.u32.totalorder %s1304_s13, %s1591_s0 }
  0x1e   : > { %p1009_p9 = scmp.ne.s32.totalorder %s1304_s13, %s1008_s11  ;;  %p1015_p0 = scmp.lt.u32.totalorder %s1013_s12, %s1008_s11 }
  0x1f   : > { %p1017_p5 = scmp.lt.u32.totalorder %s1008_s11, %s1304_s13 }
  0x20   : > { %p1011_p11 = pnand %p1010_p10, %p1009_p9  ;;  %p1016_p2 = por %p1015_p0, %p1014_p13 }
  0x22   : > { %p1012_p12 = pneg %p1011_p11  ;;  %p1018_p7 = por %p1017_p5, %p1016_p2 }
  0x24   : > { %p1019_p1 = pnand %p1018_p7, %p1012_p12 }
  0x26   : > { %1022 = shalt.err (!%p1019_p1)
}
  0x27   : > { %s1023_s8 = scalar_lea.vmem %s1312_s20, 1024  ;;  %s1180_s9 = smov [#allocation3]  }
  0x28   : > { %p1024_p9 = scmp.ne.s32.totalorder %s1312_s20, %s1023_s8  ;;  %s1028_s10 = sshll.u32 %s1180_s9, 4  ;;  %s1029_s10 = int_to_ptr.vmem [resolvable:$false] %s1028_s10 }
  0x29   : > { %s1030_s29 = scalar_lea.vmem %s1029_s10, 2048  ;;  %p1031_p4 = scmp.lt.s32.totalorder %s1312_s20, %s1029_s10 }
  0x2a   : > { %p1026_p11 = pnand %p1024_p9, %p1010_p10  ;;  %p1032_p13 = scmp.lt.s32.totalorder %s1030_s29, %s1023_s8 }
  0x2c   : > { %p1027_p6 = pneg %p1026_p11  ;;  %p1033_p0 = por %p1032_p13, %p1031_p4 }
  0x2e   : > { %p1034_p2 = pnand %p1033_p0, %p1027_p6 }
  0x30   : > { %1037 = shalt.err (!%p1034_p2)
}
  0x31   : > { %s1181_s11 = smov 128   ;;  %s1182_s12 = smov 8  }
  0x32   : > { %870 = dma.hbm_to_vmem [thread:$0]  (!%p1308_p8), %s1304_s13, 1024, %s1312_s20, %s1314_s30, %s1181_s11, %s1181_s11, %s1182_s12  }
  0x33   : > { %p749_p1 = scmp.ge.s32.totalorder %s1178_s27, 1  ;;  %p225_p4 = scmp.lt.s32.totalorder %s1178_s27, 7 }
  0x34   : > { %s29_s8 = sadd.s32 1, %s1170_s25  ;;  %s86_s9 = sadd.s32 1, %s1146_s19 }
  0x35   : > { %p1344_p6 = pnand %p749_p1, %p225_p4  ;;  %p30_p7 = scmp.ge.s32.totalorder %s29_s8, 3 }
  0x36   : > { %p93_p10 = scmp.ne.s32.totalorder %s1146_s19, %s1142_s18  ;;  %p99_p12 = scmp.ne.s32.totalorder %s1142_s18, %s1138_s17 }
  0x37   : > { %s1630_s8 = smov (%p30_p7, %s29_s8), 0  ;;  %s1595_s30 = sadd.s32 1, %s1174_s26 }
  0x38   : > { %1594 = sst [smem:[#allocation11_spill]] %s1630_s8  ;;  %s1632_s30 = smov (!%p30_p7, %s1595_s30), %s1174_s26 }
  0x39   : > { %s83_s13 = ssub.s32 %s1170_s25, %s1630_s8  ;;  %p1596_p8 = scmp.eq.s32.totalorder %s1178_s27, 0 }
  0x3a   : > { %p34_p9 = scmp.ge.s32.totalorder %s1632_s30, 2  ;;  %p84_p11 = scmp.eq.s32.totalorder %s83_s13, 0 }
  0x3b   : > { %p1363_p5 = por %p93_p10, %p1596_p8  ;;  %p1369_p13 = por %p99_p12, %p1282_p3 }
  0x3c   : > { %s140_s28 = sadd.s32 1, %s1134_s16  ;;  %s1634_s30 = smov (%p34_p9, %s1632_s30), 0 }
  0x3d   : > { %s1598_s17 = scalar_select %p1369_p13, 1, 0 }
  0x3e   : > { %1599 = sst [smem:[#allocation12_spill]] %s1634_s30  ;;  %s36_s29 = ssub.s32 %s1174_s26, %s1634_s30 }
  0x3f   : > { %s1377_s10 = scalar_select %p84_p11, %s1146_s19, %s86_s9  }
  0x40   : > { %p150_p0 = scmp.ne.s32.totalorder %s1134_s16, %s1130_s15  ;;  %p37_p2 = scmp.eq.s32.totalorder %s36_s29, 0 }
  0x41   : > { %1600 = sst [smem:[#allocation13_spill]] %s1377_s10  ;;  %s137_s11 = sor.u32 %s83_s13, %s36_s29 }
  0x42   : > { %p138_p1 = scmp.eq.s32.totalorder %s137_s11, 0  ;;  %p1601_p4 = scmp.ne.s32.totalorder %s1589_s6, 0 }
  0x43   : > { %s1603_s12 = sadd.s32 1, %s1158_s22  ;;  %s201_s4 = sand.u32 1, %s1146_s19  }
  0x44   : > { %p1385_p7 = por %p1601_p4, %p150_p0  ;;  %s748_s24 = sshll.u32 %s1170_s25, 6 }
  0x45   : > { %s1392_s0 = scalar_select %p37_p2, %s1158_s22, %s1603_s12  }
  0x46   : > { %s1602_s5 = scalar_select %p1385_p7, 1, 0 }
  0x47   : > { %s1395_s8 = scalar_select %p138_p1, %s1134_s16, %s140_s28  }
  0x48   : > { %s747_s1 = sshll.u32 %s201_s4, 6  ;;  %s1402_s30 = scalar_lea.hbm %s1575_s2, %s748_s24 }
  0x49   : > { %s205_s6 = scalar_lea.vmem [#allocation5], %s747_s1  ;;  %p1604_p3 = scmp.lt.s32.totalorder %s1178_s27, 6 }
  0x4a   : > { %s211_s13 = sshll.u32 %s205_s6, 4  ;;  %s1414_s28 = scalar_lea.sflag [#allocation6], %s201_s4  ;;  %s1412_s13 = int_to_ptr.vmem [resolvable:$true] %s211_s13 }
  0x4b   : > { %p1408_p10 = pnand %p1604_p3, %p1363_p5  ;;  %s1038_s24 = scalar_lea.hbm %s1402_s30, 1024 }
  0x4c   : > { %p1039_p12 = scmp.ne.s32.totalorder %s1402_s30, %s1038_s24  ;;  %s1043_s10 = scalar_lea.hbm %s1575_s2, 3072 }
  0x4d   : > { %p1040_p8 = pneg %p1408_p10  ;;  %p1044_p5 = scmp.lt.u32.totalorder %s1402_s30, %s1575_s2 }
  0x4e   : > { %p1045_p0 = scmp.lt.u32.totalorder %s1043_s10, %s1038_s24  ;;  %p1047_p1 = scmp.lt.u32.totalorder %s1038_s24, %s1402_s30 }
  0x4f   : > { %p1041_p9 = pnand %p1040_p8, %p1039_p12 }
  0x50   : > { %p1046_p2 = por %p1045_p0, %p1044_p5 }
  0x51   : > { %p1042_p11 = pneg %p1041_p9 }
  0x52   : > { %p1048_p4 = por %p1047_p1, %p1046_p2 }
  0x54   : > { %p1049_p3 = pnand %p1048_p4, %p1042_p11 }
  0x56   : > { %1052 = shalt.err (!%p1049_p3)
}
  0x57   : > { %s1053_s4 = scalar_lea.vmem %s1412_s13, 1024  ;;  %s1183_s9 = smov [#allocation5]  }
  0x58   : > { %p1054_p12 = scmp.ne.s32.totalorder %s1412_s13, %s1053_s4  ;;  %s1058_s6 = sshll.u32 %s1183_s9, 4  ;;  %s1059_s6 = int_to_ptr.vmem [resolvable:$false] %s1058_s6 }
  0x59   : > { %s1060_s1 = scalar_lea.vmem %s1059_s6, 2048  ;;  %p1061_p13 = scmp.lt.s32.totalorder %s1412_s13, %s1059_s6 }
  0x5a   : > { %p1056_p9 = pnand %p1054_p12, %p1040_p8  ;;  %p1062_p5 = scmp.lt.s32.totalorder %s1060_s1, %s1053_s4 }
  0x5c   : > { %p1057_p7 = pneg %p1056_p9  ;;  %p1063_p0 = por %p1062_p5, %p1061_p13 }
  0x5e   : > { %p1064_p2 = pnand %p1063_p0, %p1057_p7 }
  0x60   : > { %1067 = shalt.err (!%p1064_p2)
}
  0x61   : > { %s1184_s24 = smov 192   ;;  %s1185_s20 = smov 64  }
  0x62   : > { %s1186_s10 = smov 4   ;;  %229 = sbr.rel (%p1344_p6) target bundleno = 558 (0x22e), region = 36 }
  0x63   : > { %873 = dma.hbm_to_vmem [thread:$0]  (!%p1408_p10), %s1402_s30, 1024, %s1412_s13, %s1414_s28, %s1184_s24, %s1185_s20, %s1186_s10  }
  0x64   : > { %s231_s11 = sand.u32 (!%p1344_p6), 1, %s1154_s21   ;;  %p1606_p13 = scmp.ne.s32.totalorder (!%p1344_p6), %s1590_s7, 0 }
  0x65   : > { %s750_s12 = sshll.u32 (!%p1344_p6), %s231_s11, 6  ;;  %s232_s4 = scalar_lea.sflag (!%p1344_p6), [#allocation4], %s231_s11 }
  0x66   : > { %s1445_s9 = scalar_lea.vmem (!%p1344_p6), [#allocation3], %s750_s12 }
  0x69   : > { %1121 = dma.done.wait (%p1606_p13), %s232_s4, 1024  }
  0x6a   : > { %1123 = vsyncadd (%p1606_p13), %s232_s4, 4294966272  ;;  %s240_s6 = sand.u32 1, %s1142_s18   ;;  %p1607_p6 = scmp.ne.s32.totalorder %s1598_s17, 0 }
  0x6b   : > { %s751_s29 = sshll.u32 %s240_s6, 6  ;;  %s241_s30 = scalar_lea.sflag [#allocation6], %s240_s6 }
  0x6c   : > { %s1452_s13 = scalar_lea.vmem [#allocation5], %s751_s29 }
  0x6d   : > { %1125 = dma.done.wait (%p1607_p6), %s241_s30, 1024  }
  0x6e   : > { %1127 = vsyncadd (%p1607_p6), %s241_s30, 4294966272  ;;  %s273_s14 = sand.u32 1, %s1130_s15   ;;  %p277_p7 = scmp.lt.s32.totalorder %s1162_s23, 2 }
  0x6f   : > { %s752_s28 = sshll.u32 %s273_s14, 5  ;;  %p753_p10 = scmp.ne.s32.totalorder %s1162_s23, 0 }
  0x70   : > { %s1461_s7 = scalar_select %p277_p7, %s1162_s23, 2 }
  0x71   : > { %s1467_s10 = scalar_lea.vmem [#allocation7], %s752_s28  ;;  %285 = sbr.rel (%p753_p10) target bundleno = 293 (0x125), region = 48  ;;  %v288_v0 = vld [vmem:[%s1445_s9 + $0x10] sm:$0xff] (!%p753_p10)  ;;  %v286_v1 = vld [vmem:[%s1445_s9] sm:$0xff] (!%p753_p10)  ;;  %v289_v2 = vld [vmem:[%s1445_s9 + $0x18] sm:$0xff] (!%p753_p10) }
  0x72   : > { %s279_s20 = scalar_lea.vmem %s1576_s3, %s1461_s7  ;;  %v296_v3 = vmul.f32 (!%p753_p10), %v288_v0, %v288_v0  ;;  %v294_v4 = vmul.f32 (!%p753_p10), %v286_v1, %v286_v1  ;;  %v287_v5 = vld [vmem:[%s1445_s9 + $0x8] sm:$0xff] (!%p753_p10)  ;;  %v297_v6 = vmul.f32 (!%p753_p10), %v289_v2, %v289_v2  ;;  %v1476_v9 = vld [vmem:[%s1445_s9 + $0x20] sm:$0xff] (!%p753_p10)  ;;  %v1481_v12 = vld [vmem:[%s1445_s9 + $0x38] sm:$0xff] (!%p753_p10)  ;;  %s1608_s11 = sld [smem:[#allocation15_spill]] (!%p753_p10) }
  0x73   : > { %v295_v7 = vmul.f32 (!%p753_p10), %v287_v5, %v287_v5  ;;  %v291_v8 = vld [vmem:[%s1445_s9 + $0x28] sm:$0xff] (!%p753_p10)  ;;  %v298_v11 = vmul.f32 (!%p753_p10), %v1476_v9, %v1476_v9  ;;  %v1484_v13 = vld [vmem:[%s1445_s9 + $0x30] sm:$0xff] (!%p753_p10)  ;;  %v301_v14 = vmul.f32 (!%p753_p10), %v1481_v12, %v1481_v12 }
  0x74   : > { %306 = vadd.xlane.f32.xlu1 (!%p753_p10), %v296_v3  ;;  %302 = vadd.xlane.f32.xlu0 (!%p753_p10), %v294_v4  ;;  %v299_v10 = vmul.f32 (!%p753_p10), %v291_v8, %v291_v8  ;;  %v300_v15 = vmul.f32 (!%p753_p10), %v1484_v13, %v1484_v13 }
  0x78   : > { %308 = vadd.xlane.f32.xlu1 %v297_v6  ;;  %304 = vadd.xlane.f32.xlu0 %v295_v7  ;;  %v754_v44 = vld [vmem:[%s1608_s11] ss:$0 sm:$0xff] }
  0x7c   : > { %312 = vadd.xlane.f32.xlu1 %v299_v10  ;;  %310 = vadd.xlane.f32.xlu0 %v298_v11 }
  0x80   : > { %316 = vadd.xlane.f32.xlu1 %v301_v14  ;;  %314 = vadd.xlane.f32.xlu0 %v300_v15 }
 0x101   : > { %v307_v16 = vpop.xlane.xlu1 %306  ;;  %v303_v17 = vpop.xlane.xlu0 %302 }
 0x102   : > { %v321_v18 = vmul.f32 0.0078125, %v307_v16  ;;  %v319_v19 = vmul.f32 0.0078125, %v303_v17 }
 0x104   : > { %v329_v20 = vadd.f32 1e-06, %v321_v18  ;;  %v327_v21 = vadd.f32 1e-06, %v319_v19 }
 0x105   : > { %v309_v22 = vpop.xlane.xlu1 %308  ;;  %v305_v23 = vpop.xlane.xlu0 %304 }
 0x106   : > { %984 = vrsqrt.f32 %v329_v20  ;;  %v322_v24 = vmul.f32 0.0078125, %v309_v22  ;;  %v320_v25 = vmul.f32 0.0078125, %v305_v23 }
 0x107   : > { %986 = vrsqrt.f32 %v327_v21 }
 0x108   : > { %v330_v26 = vadd.f32 1e-06, %v322_v24  ;;  %v328_v27 = vadd.f32 1e-06, %v320_v25 }
 0x109   : > { %v313_v28 = vpop.xlane.xlu1 %312  ;;  %v311_v29 = vpop.xlane.xlu0 %310 }
 0x10a   : > { %988 = vrsqrt.f32 %v330_v26  ;;  %v324_v30 = vmul.f32 0.0078125, %v313_v28  ;;  %v323_v31 = vmul.f32 0.0078125, %v311_v29 }
 0x10b   : > { %990 = vrsqrt.f32 %v328_v27 }
 0x10c   : > { %v332_v32 = vadd.f32 1e-06, %v324_v30  ;;  %v331_v33 = vadd.f32 1e-06, %v323_v31 }
 0x10d   : > { %v317_v34 = vpop.xlane.xlu1 %316  ;;  %v315_v35 = vpop.xlane.xlu0 %314 }
 0x10e   : > { %992 = vrsqrt.f32 %v332_v32  ;;  %v326_v36 = vmul.f32 0.0078125, %v317_v34  ;;  %v325_v37 = vmul.f32 0.0078125, %v315_v35 }
 0x10f   : > { %994 = vrsqrt.f32 %v331_v33 }
 0x110   : > { %v985_v38 = vpop.eup %984  ;;  %v334_v39 = vadd.f32 1e-06, %v326_v36  ;;  %v333_v40 = vadd.f32 1e-06, %v325_v37 }
 0x111   : > { %v987_v41 = vpop.eup %986  ;;  %v345_v42 = vmul.f32 %v985_v38, %v288_v0 }
 0x112   : > { %996 = vrsqrt.f32 %v334_v39  ;;  %v343_v45 = vmul.f32 %v987_v41, %v286_v1 }
 0x113   : > { %998 = vrsqrt.f32 %v333_v40  ;;  %v360_v49 = vmul.f32 %v754_v44, %v345_v42 }
 0x114   : > { %v989_v43 = vpop.eup %988  ;;  %v358_v52 = vmul.f32 %v754_v44, %v343_v45 }
 0x115   : > { %v991_v46 = vpop.eup %990  ;;  %v346_v47 = vmul.f32 %v989_v43, %v289_v2 }
 0x116   : > { %v344_v48 = vmul.f32 %v991_v46, %v287_v5 }
 0x117   : > { %v361_v50 = vmul.f32 %v754_v44, %v346_v47 }
 0x118   : > { %v993_v51 = vpop.eup %992  ;;  %v359_v53 = vmul.f32 %v754_v44, %v344_v48 }
 0x119   : > { %v995_v54 = vpop.eup %994  ;;  %v367_v55 = vpack.c.bf16 %v361_v50, %v360_v49  ;;  %v348_v56 = vmul.f32 %v993_v51, %v291_v8 }
 0x11a   : > { %v366_v57 = vpack.c.bf16 %v359_v53, %v358_v52  ;;  %v347_v58 = vmul.f32 %v995_v54, %v1476_v9 }
 0x11b   : > { %371 = vst [vmem:[#allocation2 + $0x8] sm:$0xff] %v367_v55  ;;  %v363_v59 = vmul.f32 %v754_v44, %v348_v56 }
 0x11c   : > { %v997_v60 = vpop.eup %996  ;;  %370 = vst [vmem:[#allocation2] sm:$0xff] %v366_v57  ;;  %v362_v61 = vmul.f32 %v754_v44, %v347_v58 }
 0x11d   : > { %v999_v62 = vpop.eup %998  ;;  %v350_v63 = vmul.f32 %v997_v60, %v1481_v12 }
 0x11e   : > { %v368_v0 = vpack.c.bf16 %v363_v59, %v362_v61  ;;  %v349_v1 = vmul.f32 %v999_v62, %v1484_v13 }
 0x11f   : > { %v365_v2 = vmul.f32 %v754_v44, %v350_v63 }
 0x120   : > { %372 = vst [vmem:[#allocation2 + $0x10] sm:$0xff] %v368_v0  ;;  %v364_v3 = vmul.f32 %v754_v44, %v349_v1 }
 0x122   : > { %v369_v4 = vpack.c.bf16 %v365_v2, %v364_v3 }
 0x124   : > { %373 = vst [vmem:[#allocation2 + $0x18] sm:$0xff] %v369_v4 }
 0x125 PF: > { %v1000_v5 = vld [vmem:[%s1452_s13] sm:$0xff]   ;;  %v1001_v6 = vld [vmem:[%s1452_s13 + $0x8] sm:$0xff]   ;;  %v1002_v7 = vld [vmem:[%s1452_s13 + $0x10] sm:$0xff]   ;;  %p1609_p8 = scmp.ne.s32.totalorder %s1602_s5, 0 }
 0x126   : > { %822 = vmatprep.subr.bf16.mxu0 %v1000_v5  ;;  %846 = vmatprep.subr.bf16.mxu1 %v1000_v5  ;;  %v1003_v8 = vld [vmem:[%s1452_s13 + $0x18] sm:$0xff]   ;;  %v374_v9 = vld [vmem:[#allocation2] sm:$0xff]  ;;  %v1005_v12 = vld [vmem:[%s1452_s13 + $0x28] sm:$0xff]   ;;  %s1610_s9 = sld [smem:[#allocation10_spill]] (%p1609_p8)  ;;  %s1611_s14 = sld [smem:[#allocation16_spill]] (%p1609_p8) }
 0x127   : > { %823 = vmatpush3.bf16.msra.mxu0 %v1000_v5  ;;  %854 = vmatpush3.bf16.msra.mxu1 %v1000_v5  ;;  %v376_v10 = vld [vmem:[#allocation2 + $0x10] sm:$0xff]  ;;  %v1004_v11 = vld [vmem:[%s1452_s13 + $0x20] sm:$0xff]   ;;  %v1007_v14 = vld [vmem:[%s1452_s13 + $0x38] sm:$0xff]  }
 0x128   : > { %824 = vmatprep.subr.bf16.mxu0 %v1001_v6  ;;  %847 = vmatprep.subr.bf16.mxu1 %v1001_v6  ;;  %v1006_v13 = vld [vmem:[%s1452_s13 + $0x30] sm:$0xff]   ;;  %v375_v15 = vld [vmem:[#allocation2 + $0x8] sm:$0xff]  ;;  %v755_v18 = vld [vmem:[%s279_s20] ss:$0 sm:$0xff] }
 0x129   : > { %838 = vmatprep.mubr.bf16.mxu0 %v374_v9  ;;  %842 = vmatprep.mubr.bf16.mxu1 %v376_v10 }
 0x12b   : > { %825 = vmatpush3.bf16.msra.mxu0 %v1001_v6  ;;  %855 = vmatpush3.bf16.msra.mxu1 %v1001_v6  ;;  %v377_v16 = vld [vmem:[#allocation2 + $0x18] sm:$0xff] }
 0x12c   : > { %826 = vmatprep.subr.bf16.mxu0 %v1002_v7  ;;  %848 = vmatprep.subr.bf16.mxu1 %v1002_v7  ;;  %s862_s6 = smul.u32 (%p1609_p8), 24, %s1610_s9 }
 0x12e   : > { %s563_s29 = sadd.s32 (%p1609_p8), %s1162_s23, %s862_s6 }
 0x12f   : > { %827 = vmatpush3.bf16.msra.mxu0 %v1002_v7  ;;  %856 = vmatpush3.bf16.msra.mxu1 %v1002_v7  ;;  %s775_s5 = sshll.u32 (%p1609_p8), %s563_s29, 2 }
 0x130   : > { %828 = vmatprep.subr.bf16.mxu0 %v1003_v8  ;;  %849 = vmatprep.subr.bf16.mxu1 %v1003_v8  ;;  %s565_s28 = scalar_lea.vmem (%p1609_p8), %s1611_s14, %s775_s5 }
 0x133   : > { %829 = vmatpush3.bf16.msra.mxu0 %v1003_v8  ;;  %857 = vmatpush3.bf16.msra.mxu1 %v1003_v8 }
 0x134   : > { %830 = vmatprep.subr.bf16.mxu0 %v1004_v11  ;;  %850 = vmatprep.subr.bf16.mxu1 %v1004_v11 }
 0x137   : > { %831 = vmatpush3.bf16.msra.mxu0 %v1004_v11  ;;  %858 = vmatpush3.bf16.msra.mxu1 %v1004_v11 }
 0x138   : > { %832 = vmatprep.subr.bf16.mxu0 %v1005_v12  ;;  %851 = vmatprep.subr.bf16.mxu1 %v1005_v12 }
 0x13b   : > { %833 = vmatpush3.bf16.msra.mxu0 %v1005_v12  ;;  %859 = vmatpush3.bf16.msra.mxu1 %v1005_v12 }
 0x13c   : > { %834 = vmatprep.subr.bf16.mxu0 %v1006_v13  ;;  %852 = vmatprep.subr.bf16.mxu1 %v1006_v13 }
 0x13f   : > { %835 = vmatpush3.bf16.msra.mxu0 %v1006_v13  ;;  %860 = vmatpush3.bf16.msra.mxu1 %v1006_v13 }
 0x140   : > { %836 = vmatprep.subr.bf16.mxu0 %v1007_v14  ;;  %853 = vmatprep.subr.bf16.mxu1 %v1007_v14 }
 0x143   : > { %837 = vmatpush3.bf16.msra.mxu0 %v1007_v14  ;;  %861 = vmatpush3.bf16.msra.mxu1 %v1007_v14 }
 0x146   : > { %839 = vmatmul.mubr.bf16.vlgmr.msra.gmra.mrb[0].mxu0 %v375_v15  ;;  %843 = vmatmul.mubr.bf16.vlgmr.msra.gmra.mrb[0].mxu1 %v377_v16 }
 0x219   : > { %v840_v17 = vpop.f32.mrb[0].mxu0  ;;  %v844_v19 = vpop.f32.mrb[0].mxu1 }
 0x21a   : > { %v483_v20 = vpop.f32.mrb[1].mxu0  ;;  %v499_v21 = vpop.f32.mrb[1].mxu1  ;;  %v492_v24 = vadd.f32 %v840_v17, %v755_v18  ;;  %v508_v25 = vadd.f32 %v844_v19, %v755_v18 }
 0x21b   : > { %v841_v22 = vpop.f32.mrb[2].mxu0  ;;  %v845_v23 = vpop.f32.mrb[2].mxu1  ;;  %v484_v30 = vadd.f32 %v755_v18, %v483_v20  ;;  %v500_v31 = vadd.f32 %v755_v18, %v499_v21  ;;  %560 = sbr.rel (!%p1609_p8) target bundleno = 558 (0x22e), region = 52 }
 0x21c   : > { %v495_v26 = vadd.f32 %v841_v22, %v755_v18  ;;  %v511_v27 = vadd.f32 %v845_v23, %v755_v18  ;;  %v486_v28 = vpop.f32.mrb[3].mxu0  ;;  %v502_v29 = vpop.f32.mrb[3].mxu1 }
 0x21d   : > { %v487_v32 = vadd.f32 %v755_v18, %v486_v28  ;;  %v503_v33 = vadd.f32 %v755_v18, %v502_v29 }
 0x21e   : > { %v795_v34 = vpack.c.bf16 %v495_v26, %v492_v24  ;;  %v805_v35 = vpack.c.bf16 %v511_v27, %v508_v25 }
 0x21f   : > { %v790_v36 = vpack.c.bf16 %v487_v32, %v484_v30  ;;  %v800_v37 = vpack.c.bf16 %v503_v33, %v500_v31 }
 0x220   : > { %807 = vst [vmem:[%s1467_s10 + $0x8] sm:$0xff] %v795_v34   ;;  %809 = vst [vmem:[%s1467_s10 + $0x18] sm:$0xff] %v805_v35  }
 0x221   : > { %791 = vst [vmem:[%s1467_s10] sm:$0xff] %v790_v36   ;;  %808 = vst [vmem:[%s1467_s10 + $0x10] sm:$0xff] %v800_v37  }
 0x227   : > { %v585_v40 = vld [vmem:[%s1467_s10 + $0x8] sm:$0xf]  ;;  %v587_v41 = vld [vmem:[%s1467_s10 + $0xc] sm:$0xf]  ;;  %v593_v44 = vld [vmem:[%s1467_s10 + $0x18] sm:$0xf] }
 0x228   : > { %v581_v38 = vld [vmem:[%s1467_s10] sm:$0xf]  ;;  %v583_v39 = vld [vmem:[%s1467_s10 + $0x4] sm:$0xf]  ;;  %v589_v42 = vld [vmem:[%s1467_s10 + $0x10] sm:$0xf] }
 0x229   : > { %v591_v43 = vld [vmem:[%s1467_s10 + $0x14] sm:$0xf]  ;;  %v595_v45 = vld [vmem:[%s1467_s10 + $0x1c] sm:$0xf]  ;;  %582 = vst [vmem:[%s565_s28] sm:$0xf] %v581_v38 }
 0x22a   : > { %584 = vst [vmem:[%s565_s28 + $0xc] sm:$0xf] %v583_v39  ;;  %586 = vst [vmem:[%s565_s28 + $0x18] sm:$0xf] %v585_v40 }
 0x22b   : > { %588 = vst [vmem:[%s565_s28 + $0x24] sm:$0xf] %v587_v41  ;;  %590 = vst [vmem:[%s565_s28 + $0x30] sm:$0xf] %v589_v42 }
 0x22c   : > { %592 = vst [vmem:[%s565_s28 + $0x3c] sm:$0xf] %v591_v43  ;;  %594 = vst [vmem:[%s565_s28 + $0x48] sm:$0xf] %v593_v44 }
 0x22d   : > { %596 = vst [vmem:[%s565_s28 + $0x54] sm:$0xf] %v595_v45 }
 0x22e PF: > { %s20_s27 = sadd.s32 1, %s1178_s27   ;;  %s1613_s7 = sld [smem:[#allocation13_spill]] }
 0x22f   : > { %p1529_p11 = scmp.ge.s32.totalorder %s20_s27, 8   ;;  %s1614_s1 = sld [smem:[#allocation11_spill]] }
 0x230   : > { %s1615_s10 = sld [smem:[#allocation12_spill]]  ;;  %s1617_s15 = smov %s1134_s16 }
 0x231   : > { %s1618_s16 = smov %s1395_s8  ;;  %s1619_s17 = smov %s1142_s18 }
 0x232   : > { %s1620_s18 = smov %s1146_s19  ;;  %s1622_s20 = smov %s1154_s21 }
 0x233   : > { %s1623_s21 = smov %s1158_s22  ;;  %s1624_s22 = smov %s1392_s0 }
 0x234   : > { %s1621_s19 = smov %s1613_s7  ;;  %s1625_s23 = smov %s1170_s25 }
 0x235   : > { %s1626_s24 = smov %s1174_s26  ;;  %s1627_s25 = smov %s1614_s1 }
 0x236   : > { %s1628_s26 = smov %s1615_s10  ;;  %19 = sbr.rel (!%p1529_p11) target bundleno = 14 (0xe), region = 137 }
 0x23d   :  { %645 = vsyncpa [#allocation4], 1 }
 0x23e   :  { %647 = vsyncpa [#allocation4 + $0x1], 1 }
 0x23f   :  { %648 = vsyncpa [#allocation6], 1 }
 0x240   :  { %650 = vsyncpa [#allocation6 + $0x1], 1 }

// kernel: transformer_layer_forward.8
= control target key start
LH: loop header
LB: loop body
LE: loop exit
PB: predicated region body
PF: predicated region fallthrough
CT: control target
= control target key end

     0   :  { %s1438_s21 = smov 0   ;;  %s1440_s22 = smov 0   ;;  %s1805_s0 = inlined_call_operand.vmem [shape: f32[128,128], index: 0, kind: input, shape index: {}]   ;;  %s1806_s1 = inlined_call_operand.vmem [shape: f32[1,128], index: 1, kind: input, shape index: {}]   ;;  %s1807_s2 = inlined_call_operand.vmem [shape: bf16[128,256], index: 2, kind: input, shape index: {}]   ;;  %s1808_s3 = inlined_call_operand.vmem [shape: f32[1,256], index: 3, kind: input, shape index: {}]   ;;  %s1809_s4 = inlined_call_operand.vmem [shape: bf16[128,256], index: 4, kind: input, shape index: {}]   ;;  %s1810_s5 = inlined_call_operand.vmem [shape: f32[1,256], index: 5, kind: input, shape index: {}]   ;;  %s1811_s6 = inlined_call_operand.vmem [shape: bf16[128,256], index: 6, kind: output, shape index: {}]  }
   0x1   :  { %s1442_s23 = smov 0  }
   0x2 LB: > { %s28_s24 = sadd.s32 1, %s1396_s22  ;;  %p1151_p0 = scmp.ge.s32.totalorder %s1400_s23, 1  ;;  %s1400_s23 = sphi %s1442_s23, %s16_s23   ;;  %s1396_s22 = sphi %s1440_s22, %s1813_s22   ;;  %s1392_s21 = sphi %s1438_s21, %s1812_s21  }
   0x3   : > { %p30_p1 = scmp.ge.s32.totalorder %s28_s24, 2  ;;  %p269_p2 = scmp.lt.s32.totalorder %s1400_s23, 3 }
   0x5   : > { %s1815_s24 = smov (%p30_p1, %s28_s24), 0  ;;  %p270_p3 = pnand %p1151_p0, %p269_p2 }
   0x6   : > { %s1152_s25 = sshll.u32 (!%p270_p3), %s1392_s21, 3  ;;  %v1250_v0 = vld [vmem:[%s1807_s2 + $0x4] ss:$8 sps:$4 sm:$0xff] (!%p270_p3)   ;;  %v1254_v2 = vld [vmem:[%s1807_s2] ss:$8 sps:$4 sm:$0xff] (!%p270_p3)   ;;  %v1402_v46 = vmov (!%p270_p3), 0  }
   0x7   : > { %273 = sbr.rel (%p270_p3) target bundleno = 463 (0x1cf), region = 44  ;;  %p323_p4 = scmp.lt.s32.totalorder (!%p270_p3), %s1152_s25, 15  ;;  %v1252_v1 = vld [vmem:[%s1809_s4 + $0x4] ss:$8 sps:$4 sm:$0xff] (!%p270_p3)   ;;  %567 = vmatprep.subr.bf16.mxu0 (!%p270_p3), %v1250_v0  ;;  %v1255_v3 = vld [vmem:[%s1809_s4] ss:$8 sps:$4 sm:$0xff] (!%p270_p3)   ;;  %599 = vmatprep.mubr.bf16.mxu0 (!%p270_p3), %v1402_v46 }
   0x8   : > { %748 = vmatprep.subr.bf16.mxu1 (!%p270_p3), %v1252_v1  ;;  %v1256_v4 = vld [vmem:[%s1807_s2 + $0x14] ss:$8 sps:$4 sm:$0xff] (!%p270_p3)   ;;  %568 = vmatpush1.bf16.msra.mxu0 (!%p270_p3), %v1254_v2  ;;  %v1260_v6 = vld [vmem:[%s1807_s2 + $0x10] ss:$8 sps:$4 sm:$0xff] (!%p270_p3)   ;;  %v1262_v24 = vld [vmem:[%s1807_s2 + $0x24] ss:$8 sps:$4 sm:$0xff] (!%p270_p3)  }
   0x9   : > { %749 = vmatpush1.bf16.msra.mxu1 (!%p270_p3), %v1255_v3  ;;  %v1258_v5 = vld [vmem:[%s1809_s4 + $0x14] ss:$8 sps:$4 sm:$0xff] (!%p270_p3)   ;;  %569 = vmatprep.subr.bf16.mxu0 (!%p270_p3), %v1256_v4  ;;  %v1261_v7 = vld [vmem:[%s1809_s4 + $0x10] ss:$8 sps:$4 sm:$0xff] (!%p270_p3)   ;;  %v1264_v25 = vld [vmem:[%s1809_s4 + $0x24] ss:$8 sps:$4 sm:$0xff] (!%p270_p3)  }
   0xa   : > { %750 = vmatprep.subr.bf16.mxu1 (!%p270_p3), %v1258_v5  ;;  %v1266_v26 = vld [vmem:[%s1807_s2 + $0x20] ss:$8 sps:$4 sm:$0xff] (!%p270_p3)   ;;  %v1268_v28 = vld [vmem:[%s1807_s2 + $0x34] ss:$8 sps:$4 sm:$0xff] (!%p270_p3)   ;;  %v1272_v30 = vld [vmem:[%s1807_s2 + $0x30] ss:$8 sps:$4 sm:$0xff] (!%p270_p3)   ;;  %780 = vmatprep.mubr.bf16.mxu1 (!%p270_p3), %v1402_v46 }
   0xb   : > { %v1267_v27 = vld [vmem:[%s1809_s4 + $0x20] ss:$8 sps:$4 sm:$0xff] (!%p270_p3)   ;;  %v1270_v29 = vld [vmem:[%s1809_s4 + $0x34] ss:$8 sps:$4 sm:$0xff] (!%p270_p3)   ;;  %v1273_v31 = vld [vmem:[%s1809_s4 + $0x30] ss:$8 sps:$4 sm:$0xff] (!%p270_p3)  }
   0xc   : > { %570 = vmatpush1.bf16.msra.mxu0 (!%p270_p3), %v1260_v6  ;;  %v1274_v32 = vld [vmem:[%s1807_s2 + $0x44] ss:$8 sps:$4 sm:$0xff] (!%p270_p3)   ;;  %v1278_v34 = vld [vmem:[%s1807_s2 + $0x40] ss:$8 sps:$4 sm:$0xff] (!%p270_p3)   ;;  %v1280_v36 = vld [vmem:[%s1807_s2 + $0x54] ss:$8 sps:$4 sm:$0xff] (!%p270_p3)  }
   0xd   : > { %751 = vmatpush1.bf16.msra.mxu1 (!%p270_p3), %v1261_v7  ;;  %571 = vmatprep.subr.bf16.mxu0 (!%p270_p3), %v1262_v24  ;;  %v1276_v33 = vld [vmem:[%s1809_s4 + $0x44] ss:$8 sps:$4 sm:$0xff] (!%p270_p3)   ;;  %v1279_v35 = vld [vmem:[%s1809_s4 + $0x40] ss:$8 sps:$4 sm:$0xff] (!%p270_p3)   ;;  %v1282_v37 = vld [vmem:[%s1809_s4 + $0x54] ss:$8 sps:$4 sm:$0xff] (!%p270_p3)  }
   0xe   : > { %s1817_s25 = smov (!%p323_p4, %s1152_s25), 15  ;;  %752 = vmatprep.subr.bf16.mxu1 %v1264_v25  ;;  %v1284_v38 = vld [vmem:[%s1807_s2 + $0x50] ss:$8 sps:$4 sm:$0xff]   ;;  %v1286_v40 = vld [vmem:[%s1807_s2 + $0x64] ss:$8 sps:$4 sm:$0xff]  }
   0xf   : > { %s1153_s16 = sshll.u32 %s1817_s25, 3  ;;  %v1285_v39 = vld [vmem:[%s1809_s4 + $0x50] ss:$8 sps:$4 sm:$0xff]   ;;  %v1288_v41 = vld [vmem:[%s1809_s4 + $0x64] ss:$8 sps:$4 sm:$0xff]  }
  0x10   : > { %s326_s21 = scalar_lea.vmem %s1805_s0, %s1153_s16  ;;  %572 = vmatpush1.bf16.msra.mxu0 %v1266_v26  ;;  %v1290_v42 = vld [vmem:[%s1807_s2 + $0x60] ss:$8 sps:$4 sm:$0xff]   ;;  %v1292_v44 = vld [vmem:[%s1807_s2 + $0x74] ss:$8 sps:$4 sm:$0xff]   ;;  %v1296_v47 = vld [vmem:[%s1807_s2 + $0x70] ss:$8 sps:$4 sm:$0xff]  }
  0x11   : > { %v1488_v8 = vld [vmem:[%s326_s21] sm:$0xff]  ;;  %v1490_v9 = vld [vmem:[%s326_s21 + $0x10] sm:$0xff]  ;;  %v1492_v10 = vld [vmem:[%s326_s21 + $0x8] sm:$0xff]  ;;  %753 = vmatpush1.bf16.msra.mxu1 %v1267_v27  ;;  %573 = vmatprep.subr.bf16.mxu0 %v1268_v28 }
  0x12   : > { %v375_v11 = vmul.f32 %v1488_v8, %v1488_v8  ;;  %v377_v12 = vmul.f32 %v1490_v9, %v1490_v9  ;;  %v1498_v13 = vld [vmem:[%s326_s21 + $0x18] sm:$0xff]  ;;  %v1500_v14 = vld [vmem:[%s326_s21 + $0x28] sm:$0xff]  ;;  %v1502_v15 = vld [vmem:[%s326_s21 + $0x20] sm:$0xff]  ;;  %v376_v16 = vmul.f32 %v1492_v10, %v1492_v10  ;;  %754 = vmatprep.subr.bf16.mxu1 %v1270_v29 }
  0x13   : > { %v378_v17 = vmul.f32 %v1498_v13, %v1498_v13  ;;  %v1508_v18 = vld [vmem:[%s326_s21 + $0x38] sm:$0xff]  ;;  %v1510_v19 = vld [vmem:[%s326_s21 + $0x30] sm:$0xff]  ;;  %v380_v20 = vmul.f32 %v1500_v14, %v1500_v14  ;;  %v379_v21 = vmul.f32 %v1502_v15, %v1502_v15  ;;  %v1291_v43 = vld [vmem:[%s1809_s4 + $0x60] ss:$8 sps:$4 sm:$0xff]   ;;  %s1750_s21 = scalar_lea.vmem %s1811_s6, %s1153_s16 }
  0x14   : > { %383 = vadd.xlane.f32.xlu0 %v375_v11  ;;  %387 = vadd.xlane.f32.xlu1 %v377_v12  ;;  %v382_v22 = vmul.f32 %v1508_v18, %v1508_v18  ;;  %v381_v23 = vmul.f32 %v1510_v19, %v1510_v19  ;;  %v1294_v45 = vld [vmem:[%s1809_s4 + $0x74] ss:$8 sps:$4 sm:$0xff]   ;;  %v1297_v48 = vld [vmem:[%s1809_s4 + $0x70] ss:$8 sps:$4 sm:$0xff]  }
  0x15   : > { %574 = vmatpush1.bf16.msra.mxu0 %v1272_v30  ;;  %755 = vmatpush1.bf16.msra.mxu1 %v1273_v31 }
  0x16   : > { %575 = vmatprep.subr.bf16.mxu0 %v1274_v32  ;;  %756 = vmatprep.subr.bf16.mxu1 %v1276_v33 }
  0x18   : > { %385 = vadd.xlane.f32.xlu0 %v376_v16  ;;  %389 = vadd.xlane.f32.xlu1 %v378_v17  ;;  %v1157_v16 = vld [vmem:[%s1806_s1] ss:$0 sm:$0xff] }
  0x19   : > { %576 = vmatpush1.bf16.msra.mxu0 %v1278_v34  ;;  %757 = vmatpush1.bf16.msra.mxu1 %v1279_v35 }
  0x1a   : > { %577 = vmatprep.subr.bf16.mxu0 %v1280_v36  ;;  %758 = vmatprep.subr.bf16.mxu1 %v1282_v37 }
  0x1c   : > { %393 = vadd.xlane.f32.xlu1 %v380_v20  ;;  %391 = vadd.xlane.f32.xlu0 %v379_v21 }
  0x1d   : > { %578 = vmatpush1.bf16.msra.mxu0 %v1284_v38  ;;  %759 = vmatpush1.bf16.msra.mxu1 %v1285_v39 }
  0x1e   : > { %579 = vmatprep.subr.bf16.mxu0 %v1286_v40  ;;  %760 = vmatprep.subr.bf16.mxu1 %v1288_v41  ;;  %v477_v40 = vlaneseq }
  0x20   : > { %397 = vadd.xlane.f32.xlu1 %v382_v22  ;;  %395 = vadd.xlane.f32.xlu0 %v381_v23  ;;  %v1611_v41 = vshrl.u32 %v477_v40, 7 }
  0x21   : > { %580 = vmatpush1.bf16.msra.mxu0 %v1290_v42  ;;  %761 = vmatpush1.bf16.msra.mxu1 %v1291_v43 }
  0x22   : > { %581 = vmatprep.subr.bf16.mxu0 %v1292_v44  ;;  %762 = vmatprep.subr.bf16.mxu1 %v1294_v45  ;;  %v479_v42 = vsub.s32 0, %v1611_v41 }
  0x25   : > { %582 = vmatpush1.bf16.msra.mxu0 %v1296_v47  ;;  %763 = vmatpush1.bf16.msra.mxu1 %v1297_v48 }
  0xa1   : > { %v384_v49 = vpop.xlane.xlu0 %383  ;;  %v388_v50 = vpop.xlane.xlu1 %387 }
  0xa2   : > { %v400_v51 = vmul.f32 0.0078125, %v384_v49  ;;  %v402_v52 = vmul.f32 0.0078125, %v388_v50 }
  0xa4   : > { %v408_v53 = vadd.f32 1e-06, %v400_v51  ;;  %v410_v58 = vadd.f32 1e-06, %v402_v52 }
  0xa5   : > { %v386_v54 = vpop.xlane.xlu0 %385  ;;  %v390_v55 = vpop.xlane.xlu1 %389 }
  0xa6   : > { %1298 = vrsqrt.f32 %v408_v53  ;;  %v401_v56 = vmul.f32 0.0078125, %v386_v54  ;;  %v403_v57 = vmul.f32 0.0078125, %v390_v55 }
  0xa8   : > { %v409_v59 = vadd.f32 1e-06, %v401_v56  ;;  %v411_v60 = vadd.f32 1e-06, %v403_v57 }
  0xa9   : > { %v394_v61 = vpop.xlane.xlu1 %393  ;;  %v392_v62 = vpop.xlane.xlu0 %391 }
  0xaa   : > { %1300 = vrsqrt.f32 %v409_v59  ;;  %v405_v63 = vmul.f32 0.0078125, %v394_v61  ;;  %v404_v0 = vmul.f32 0.0078125, %v392_v62 }
  0xab   : > { %1302 = vrsqrt.f32 %v410_v58 }
  0xac   : > { %1304 = vrsqrt.f32 %v411_v60  ;;  %v413_v1 = vadd.f32 1e-06, %v405_v63  ;;  %v412_v2 = vadd.f32 1e-06, %v404_v0 }
  0xad   : > { %v398_v3 = vpop.xlane.xlu1 %397  ;;  %v396_v4 = vpop.xlane.xlu0 %395 }
  0xae   : > { %1306 = vrsqrt.f32 %v413_v1  ;;  %v407_v6 = vmul.f32 0.0078125, %v398_v3  ;;  %v406_v7 = vmul.f32 0.0078125, %v396_v4 }
  0xaf   : > { %1308 = vrsqrt.f32 %v412_v2 }
  0xb0   : > { %v1299_v5 = vpop.eup %1298  ;;  %v415_v21 = vadd.f32 1e-06, %v407_v6  ;;  %v414_v23 = vadd.f32 1e-06, %v406_v7 }
  0xb1   : > { %v424_v11 = vmul.f32 %v1299_v5, %v1488_v8 }
  0xb2   : > { %1310 = vrsqrt.f32 %v415_v21 }
  0xb3   : > { %v439_v24 = vmul.f32 %v1157_v16, %v424_v11  ;;  %1312 = vrsqrt.f32 %v414_v23 }
  0xb4   : > { %v1301_v12 = vpop.eup %1300 }
  0xb5   : > { %v1303_v17 = vpop.eup %1302  ;;  %v425_v20 = vmul.f32 %v1301_v12, %v1492_v10 }
  0xb6   : > { %v1305_v22 = vpop.eup %1304  ;;  %v426_v27 = vmul.f32 %v1303_v17, %v1490_v9 }
  0xb7   : > { %v440_v25 = vmul.f32 %v1157_v16, %v425_v20  ;;  %v427_v28 = vmul.f32 %v1305_v22, %v1498_v13 }
  0xb8   : > { %v1307_v8 = vpop.eup %1306  ;;  %v441_v10 = vmul.f32 %v1157_v16, %v426_v27 }
  0xb9   : > { %v447_v26 = vpack.c.bf16 %v440_v25, %v439_v24  ;;  %v1309_v29 = vpop.eup %1308  ;;  %v442_v30 = vmul.f32 %v1157_v16, %v427_v28  ;;  %v429_v32 = vmul.f32 %v1307_v8, %v1500_v14 }
  0xba   : > { %v428_v31 = vmul.f32 %v1309_v29, %v1502_v15 }
  0xbb   : > { %600 = vmatmul.mubr.bf16.vlgmr.msra.gmra.mrb[0].mxu0 %v447_v26  ;;  %781 = vmatmul.mubr.bf16.vlgmr.msra.gmra.mrb[0].mxu1 %v447_v26  ;;  %v448_v33 = vpack.c.bf16 %v442_v30, %v441_v10  ;;  %v444_v13 = vmul.f32 %v1157_v16, %v429_v32 }
  0xbc   : > { %609 = vmatprep.mubr.bf16.mxu0 %v1402_v46  ;;  %790 = vmatprep.mubr.bf16.mxu1 %v1402_v46  ;;  %v1311_v34 = vpop.eup %1310  ;;  %v443_v9 = vmul.f32 %v1157_v16, %v428_v31 }
  0xbd   : > { %v1313_v35 = vpop.eup %1312  ;;  %v431_v38 = vmul.f32 %v1311_v34, %v1508_v18  ;;  %v475_v18 = vld [vmem:[%s1808_s3] sm:$0x3] }
  0xbe   : > { %v449_v36 = vpack.c.bf16 %v444_v13, %v443_v9  ;;  %v430_v37 = vmul.f32 %v1313_v35, %v1510_v19  ;;  %v483_v19 = vsub.s32 1, %v1611_v41  ;;  %v1620_v43 = vrot.slane %v475_v18, %v479_v42 }
  0xbf   : > { %v446_v14 = vmul.f32 %v1157_v16, %v431_v38 }
  0xc0   : > { %v445_v15 = vmul.f32 %v1157_v16, %v430_v37  ;;  %v1624_v44 = vrot.slane %v475_v18, %v483_v19 }
  0xc2   : > { %v450_v39 = vpack.c.bf16 %v446_v14, %v445_v15  ;;  %v656_v14 = vld [vmem:[%s1810_s5] sm:$0x3] }
  0xc3   : > { %610 = vmatmul.mubr.bf16.gmra.mrb[4].mxu0 %v448_v33  ;;  %791 = vmatmul.mubr.bf16.gmra.mrb[4].mxu1 %v448_v33 }
  0xc4   : > { %619 = vmatprep.mubr.bf16.mxu0 %v1402_v46  ;;  %800 = vmatprep.mubr.bf16.mxu1 %v1402_v46 }
  0xcb   : > { %620 = vmatmul.mubr.bf16.gmra.mrb[8].mxu0 %v449_v36  ;;  %801 = vmatmul.mubr.bf16.gmra.mrb[8].mxu1 %v449_v36 }
  0xcc   : > { %629 = vmatprep.mubr.bf16.mxu0 %v1402_v46  ;;  %810 = vmatprep.mubr.bf16.mxu1 %v1402_v46 }
  0xd3   : > { %630 = vmatmul.mubr.bf16.gmra.mrb[12].mxu0 %v450_v39  ;;  %811 = vmatmul.mubr.bf16.gmra.mrb[12].mxu1 %v450_v39 }
 0x18e   : > { %v601_v45 = vpop.f32.mrb[0].mxu0  ;;  %v1626_v46 = vpop.f32.mrb[0].mxu1 }
 0x18f   : > { %v1629_v47 = vadd.f32 %v601_v45, %v1620_v43  ;;  %v603_v48 = vpop.f32.mrb[1].mxu0  ;;  %v1631_v49 = vpop.f32.mrb[1].mxu1 }
 0x190   : > { %v1634_v50 = vadd.f32 %v603_v48, %v1624_v44  ;;  %v605_v51 = vpop.f32.mrb[2].mxu0  ;;  %v1636_v52 = vpop.f32.mrb[2].mxu1 }
 0x191   : > { %v1190_v53 = vmul.f32 -1.442695, %v1629_v47  ;;  %v1640_v54 = vadd.f32 %v605_v51, %v1620_v43  ;;  %v607_v55 = vpop.f32.mrb[3].mxu0  ;;  %v1642_v56 = vpop.f32.mrb[3].mxu1 }
 0x192   : > { %v1191_v57 = vmul.f32 -1.442695, %v1634_v50  ;;  %v1646_v58 = vadd.f32 %v607_v55, %v1624_v44  ;;  %v1705_v55 = vrot.slane %v656_v14, %v479_v42 }
 0x193   : > { %1314 = vpow2.f32 %v1190_v53  ;;  %v1192_v59 = vmul.f32 -1.442695, %v1640_v54 }
 0x194   : > { %1316 = vpow2.f32 %v1191_v57  ;;  %v1193_v60 = vmul.f32 -1.442695, %v1646_v58 }
 0x195   : > { %1318 = vpow2.f32 %v1192_v59 }
 0x196   : > { %1320 = vpow2.f32 %v1193_v60  ;;  %v611_v61 = vpop.f32.mrb[4].mxu0  ;;  %v1650_v62 = vpop.f32.mrb[4].mxu1 }
 0x197   : > { %v1653_v63 = vadd.f32 %v611_v61, %v1620_v43  ;;  %v613_v0 = vpop.f32.mrb[5].mxu0  ;;  %v1655_v1 = vpop.f32.mrb[5].mxu1 }
 0x198   : > { %v1658_v2 = vadd.f32 %v613_v0, %v1624_v44  ;;  %v615_v3 = vpop.f32.mrb[6].mxu0  ;;  %v1660_v4 = vpop.f32.mrb[6].mxu1 }
 0x199   : > { %v1194_v5 = vmul.f32 -1.442695, %v1653_v63  ;;  %v1664_v6 = vadd.f32 %v615_v3, %v1620_v43  ;;  %v617_v7 = vpop.f32.mrb[7].mxu0  ;;  %v1666_v11 = vpop.f32.mrb[7].mxu1  ;;  %v1714_v3 = vrot.slane %v656_v14, %v483_v19 }
 0x19a   : > { %v1195_v12 = vmul.f32 -1.442695, %v1658_v2  ;;  %v1670_v16 = vadd.f32 %v617_v7, %v1624_v44 }
 0x19b   : > { %1322 = vpow2.f32 %v1194_v5  ;;  %v1196_v17 = vmul.f32 -1.442695, %v1664_v6 }
 0x19c   : > { %1324 = vpow2.f32 %v1195_v12  ;;  %v1197_v20 = vmul.f32 -1.442695, %v1670_v16 }
 0x19d   : > { %v1315_v21 = vpop.eup %1314  ;;  %1326 = vpow2.f32 %v1196_v17 }
 0x19e   : > { %v1317_v22 = vpop.eup %1316  ;;  %v869_v23 = vadd.f32 1.0, %v1315_v21  ;;  %1328 = vpow2.f32 %v1197_v20  ;;  %v621_v24 = vpop.f32.mrb[8].mxu0 }
 0x19f   : > { %v1674_v25 = vpop.f32.mrb[8].mxu1  ;;  %v1319_v26 = vpop.eup %1318  ;;  %v870_v27 = vadd.f32 1.0, %v1317_v22  ;;  %v1677_v28 = vadd.f32 %v621_v24, %v1620_v43 }
 0x1a0   : > { %v623_v8 = vpop.f32.mrb[9].mxu0  ;;  %v1679_v29 = vpop.f32.mrb[9].mxu1  ;;  %1330 = vrcp.f32 %v869_v23  ;;  %v871_v30 = vadd.f32 1.0, %v1319_v26 }
 0x1a1   : > { %v1321_v10 = vpop.eup %1320  ;;  %v1682_v31 = vadd.f32 %v623_v8, %v1624_v44  ;;  %v625_v32 = vpop.f32.mrb[10].mxu0  ;;  %1332 = vrcp.f32 %v870_v27  ;;  %v1198_v9 = vmul.f32 -1.442695, %v1677_v28  ;;  %v783_v8 = vadd.f32 %v1626_v46, %v1705_v55 }
 0x1a2   : > { %v1684_v33 = vpop.f32.mrb[10].mxu1  ;;  %v872_v34 = vadd.f32 1.0, %v1321_v10  ;;  %v1688_v13 = vadd.f32 %v625_v32, %v1620_v43  ;;  %v627_v35 = vpop.f32.mrb[11].mxu0  ;;  %1334 = vrcp.f32 %v871_v30  ;;  %v785_v32 = vadd.f32 %v1631_v49, %v1714_v3 }
 0x1a3   : > { %v1690_v36 = vpop.f32.mrb[11].mxu1  ;;  %v1199_v37 = vmul.f32 -1.442695, %v1682_v31  ;;  %v1694_v38 = vadd.f32 %v627_v35, %v1624_v44  ;;  %v787_v46 = vadd.f32 %v1636_v52, %v1705_v55 }
 0x1a4   : > { %1336 = vrcp.f32 %v872_v34  ;;  %v1200_v15 = vmul.f32 -1.442695, %v1688_v13 }
 0x1a5   : > { %1338 = vpow2.f32 %v1198_v9  ;;  %v1201_v39 = vmul.f32 -1.442695, %v1694_v38  ;;  %v1323_v40 = vpop.eup %1322 }
 0x1a6   : > { %1340 = vpow2.f32 %v1199_v37  ;;  %v1325_v18 = vpop.eup %1324  ;;  %v873_v45 = vadd.f32 1.0, %v1323_v40  ;;  %v631_v48 = vpop.f32.mrb[12].mxu0 }
 0x1a7   : > { %1342 = vpow2.f32 %v1200_v15  ;;  %v1701_v51 = vpop.f32.mrb[12].mxu1  ;;  %v1327_v53 = vpop.eup %1326  ;;  %v874_v57 = vadd.f32 1.0, %v1325_v18  ;;  %v1708_v59 = vadd.f32 %v631_v48, %v1620_v43 }
 0x1a8   : > { %1344 = vpow2.f32 %v1201_v39  ;;  %v633_v60 = vpop.f32.mrb[13].mxu0  ;;  %v1710_v61 = vpop.f32.mrb[13].mxu1  ;;  %v875_v5 = vadd.f32 1.0, %v1327_v53 }
 0x1a9   : > { %v1329_v0 = vpop.eup %1328  ;;  %1346 = vrcp.f32 %v873_v45  ;;  %v1717_v7 = vadd.f32 %v633_v60, %v1624_v44  ;;  %v635_v42 = vpop.f32.mrb[14].mxu0  ;;  %v1202_v20 = vmul.f32 -1.442695, %v1708_v59 }
 0x1aa   : > { %v1719_v12 = vpop.f32.mrb[14].mxu1  ;;  %1348 = vrcp.f32 %v874_v57  ;;  %v876_v17 = vadd.f32 1.0, %v1329_v0  ;;  %v1723_v21 = vadd.f32 %v635_v42, %v1620_v43  ;;  %v637_v22 = vpop.f32.mrb[15].mxu0  ;;  %v793_v0 = vadd.f32 %v1650_v62, %v1705_v55 }
 0x1ab   : > { %v1725_v23 = vpop.f32.mrb[15].mxu1  ;;  %v1331_v41 = vpop.eup %1330  ;;  %1350 = vrcp.f32 %v875_v5  ;;  %v1203_v19 = vmul.f32 -1.442695, %v1717_v7  ;;  %v1729_v24 = vadd.f32 %v637_v22, %v1624_v44 }
 0x1ac   : > { %v1333_v26 = vpop.eup %1332  ;;  %v917_v27 = vmul.f32 %v1331_v41, %v1629_v47  ;;  %1352 = vrcp.f32 %v876_v17  ;;  %v1204_v43 = vmul.f32 -1.442695, %v1723_v21  ;;  %v795_v17 = vadd.f32 %v1655_v1, %v1714_v3 }
 0x1ad   : > { %v1335_v10 = vpop.eup %1334  ;;  %v918_v30 = vmul.f32 %v1333_v26, %v1634_v50  ;;  %1354 = vpow2.f32 %v1202_v20  ;;  %v1205_v44 = vmul.f32 -1.442695, %v1729_v24  ;;  %v789_v50 = vadd.f32 %v1642_v56, %v1714_v3 }
 0x1ae   : > { %v1337_v34 = vpop.eup %1336  ;;  %v933_v9 = vmul.f32 %v917_v27, %v783_v8  ;;  %v919_v47 = vmul.f32 %v1335_v10, %v1640_v54  ;;  %1356 = vpow2.f32 %v1203_v19  ;;  %v799_v27 = vadd.f32 %v1666_v11, %v1714_v3 }
 0x1af   : > { %v1339_v35 = vpop.eup %1338  ;;  %v934_v37 = vmul.f32 %v918_v30, %v785_v32  ;;  %v920_v15 = vmul.f32 %v1337_v34, %v1646_v58  ;;  %1358 = vpow2.f32 %v1204_v43 }
 0x1b0   : > { %v1341_v49 = vpop.eup %1340  ;;  %v935_v54 = vmul.f32 %v919_v47, %v787_v46  ;;  %v877_v14 = vadd.f32 1.0, %v1339_v35  ;;  %1360 = vpow2.f32 %v1205_v44  ;;  %v803_v47 = vadd.f32 %v1674_v25, %v1705_v55 }
 0x1b1   : > { %v1343_v52 = vpop.eup %1342  ;;  %v1217_v39 = vpack.c.bf16 %v934_v37, %v933_v9  ;;  %v936_v40 = vmul.f32 %v920_v15, %v789_v50  ;;  %v878_v58 = vadd.f32 1.0, %v1341_v49  ;;  %v805_v37 = vadd.f32 %v1679_v29, %v1714_v3 }
 0x1b2   : > { %v1345_v18 = vpop.eup %1344  ;;  %1362 = vrcp.f32 %v877_v14  ;;  %v879_v56 = vadd.f32 1.0, %v1343_v52  ;;  %v809_v25 = vadd.f32 %v1690_v36, %v1714_v3  ;;  %v815_v36 = vadd.f32 %v1710_v61, %v1714_v3 }
 0x1b3   : > { %v1347_v45 = vpop.eup %1346  ;;  %997 = vst [vmem:[%s1750_s21] sm:$0xff] %v1217_v39  ;;  %v1218_v48 = vpack.c.bf16 %v936_v40, %v935_v54  ;;  %1364 = vrcp.f32 %v878_v58  ;;  %v880_v53 = vadd.f32 1.0, %v1345_v18  ;;  %v807_v54 = vadd.f32 %v1684_v33, %v1705_v55 }
 0x1b4   : > { %v1349_v57 = vpop.eup %1348  ;;  %v921_v60 = vmul.f32 %v1347_v45, %v1653_v63  ;;  %1366 = vrcp.f32 %v879_v56  ;;  %v797_v63 = vadd.f32 %v1660_v4, %v1705_v55 }
 0x1b5   : > { %v1351_v5 = vpop.eup %1350  ;;  %998 = vst [vmem:[%s1750_s21 + $0x8] sm:$0xff] %v1218_v48  ;;  %v922_v42 = vmul.f32 %v1349_v57, %v1658_v2  ;;  %1368 = vrcp.f32 %v880_v53  ;;  %v817_v53 = vadd.f32 %v1719_v12, %v1705_v55 }
 0x1b6   : > { %v1353_v20 = vpop.eup %1352  ;;  %v937_v22 = vmul.f32 %v921_v60, %v793_v0  ;;  %v923_v41 = vmul.f32 %v1351_v5, %v1664_v6 }
 0x1b7   : > { %v1355_v19 = vpop.eup %1354  ;;  %v938_v26 = vmul.f32 %v922_v42, %v795_v17  ;;  %v924_v62 = vmul.f32 %v1353_v20, %v1670_v16 }
 0x1b8   : > { %v1357_v2 = vpop.eup %1356  ;;  %v939_v8 = vmul.f32 %v923_v41, %v797_v63  ;;  %v881_v1 = vadd.f32 1.0, %v1355_v19 }
 0x1b9   : > { %v1359_v43 = vpop.eup %1358  ;;  %v1219_v10 = vpack.c.bf16 %v938_v26, %v937_v22  ;;  %v940_v30 = vmul.f32 %v924_v62, %v799_v27  ;;  %v882_v32 = vadd.f32 1.0, %v1357_v2 }
 0x1ba   : > { %v1361_v6 = vpop.eup %1360  ;;  %1370 = vrcp.f32 %v881_v1  ;;  %v883_v44 = vadd.f32 1.0, %v1359_v43 }
 0x1bb   : > { %999 = vst [vmem:[%s1750_s21 + $0x10] sm:$0xff] %v1219_v10  ;;  %v1220_v4 = vpack.c.bf16 %v940_v30, %v939_v8  ;;  %1372 = vrcp.f32 %v882_v32  ;;  %v884_v34 = vadd.f32 1.0, %v1361_v6 }
 0x1bc   : > { %v1363_v9 = vpop.eup %1362  ;;  %1374 = vrcp.f32 %v883_v44 }
 0x1bd   : > { %v1365_v16 = vpop.eup %1364  ;;  %1000 = vst [vmem:[%s1750_s21 + $0x18] sm:$0xff] %v1220_v4  ;;  %v925_v11 = vmul.f32 %v1363_v9, %v1677_v28  ;;  %1376 = vrcp.f32 %v884_v34 }
 0x1be   : > { %v1367_v46 = vpop.eup %1366  ;;  %v926_v35 = vmul.f32 %v1365_v16, %v1682_v31 }
 0x1bf   : > { %v1369_v15 = vpop.eup %1368  ;;  %v941_v50 = vmul.f32 %v925_v11, %v803_v47  ;;  %v927_v49 = vmul.f32 %v1367_v46, %v1688_v13  ;;  %v813_v13 = vadd.f32 %v1701_v51, %v1705_v55  ;;  %v819_v51 = vadd.f32 %v1725_v23, %v1714_v3 }
 0x1c0   : > { %v942_v28 = vmul.f32 %v926_v35, %v805_v37  ;;  %v928_v14 = vmul.f32 %v1369_v15, %v1694_v38 }
 0x1c1   : > { %v943_v52 = vmul.f32 %v927_v49, %v807_v54 }
 0x1c2   : > { %v1221_v39 = vpack.c.bf16 %v942_v28, %v941_v50  ;;  %v944_v31 = vmul.f32 %v928_v14, %v809_v25 }
 0x1c4   : > { %v1371_v40 = vpop.eup %1370  ;;  %1001 = vst [vmem:[%s1750_s21 + $0x20] sm:$0xff] %v1221_v39  ;;  %v1222_v29 = vpack.c.bf16 %v944_v31, %v943_v52 }
 0x1c5   : > { %v1373_v58 = vpop.eup %1372  ;;  %v929_v18 = vmul.f32 %v1371_v40, %v1708_v59 }
 0x1c6   : > { %v1375_v33 = vpop.eup %1374  ;;  %1002 = vst [vmem:[%s1750_s21 + $0x28] sm:$0xff] %v1222_v29  ;;  %v930_v38 = vmul.f32 %v1373_v58, %v1717_v7 }
 0x1c7   : > { %v1377_v56 = vpop.eup %1376  ;;  %v945_v45 = vmul.f32 %v929_v18, %v813_v13  ;;  %v931_v48 = vmul.f32 %v1375_v33, %v1723_v21 }
 0x1c8   : > { %v946_v59 = vmul.f32 %v930_v38, %v815_v36  ;;  %v932_v57 = vmul.f32 %v1377_v56, %v1729_v24 }
 0x1c9   : > { %v947_v60 = vmul.f32 %v931_v48, %v817_v53 }
 0x1ca   : > { %v1223_v0 = vpack.c.bf16 %v946_v59, %v945_v45  ;;  %v948_v5 = vmul.f32 %v932_v57, %v819_v51 }
 0x1cc   : > { %1003 = vst [vmem:[%s1750_s21 + $0x30] sm:$0xff] %v1223_v0  ;;  %v1224_v7 = vpack.c.bf16 %v948_v5, %v947_v60 }
 0x1ce   : > { %1004 = vst [vmem:[%s1750_s21 + $0x38] sm:$0xff] %v1224_v7 }
 0x1cf PF: > { %s16_s23 = sadd.s32 1, %s1400_s23   ;;  %s1812_s21 = smov %s1396_s22 }
 0x1d0   : > { %p13_p5 = scmp.ge.s32.totalorder %s16_s23, 4   ;;  %s1813_s22 = smov %s1815_s24 }
 0x1d2   :  { %15 = sbr.rel (!%p13_p5) target bundleno = 2 (0x2), region = 90 }

// kernel: transformer_layer_forward.9
= control target key start
LH: loop header
LB: loop body
LE: loop exit
PB: predicated region body
PF: predicated region fallthrough
CT: control target
= control target key end

     0   :  { %9 = vsyncpa [#allocation4], 0  ;;  %s1292_s0 = inlined_call_operand.vmem [shape: bf16[128,256], index: 0, kind: input, shape index: {}]   ;;  %s1293_s1 = inlined_call_operand.vmem [shape: bf16[256,128], index: 1, kind: input, shape index: {}]   ;;  %s1294_s2 = inlined_call_operand.vmem [shape: f32[1,128], index: 2, kind: input, shape index: {}]   ;;  %s1295_s3 = inlined_call_operand.vmem [shape: f32[128,128], index: 3, kind: input, shape index: {}]   ;;  %s1296_s4 = inlined_call_operand.hbm [shape: f32[128,128], index: 4, kind: output, shape index: {}]  }
   0x1   :  { %11 = vsyncpa [#allocation4 + $0x1], 0  ;;  %s1082_s15 = smov 0   ;;  %s1084_s16 = smov 0  }
   0x2   :  { %s1086_s17 = smov 0   ;;  %s1088_s18 = smov 0  }
   0x3   :  { %s1090_s19 = smov 0   ;;  %s1092_s20 = smov 0  }
   0x4 LB: > { %s788_s21 = sadd.s32 4294967295, %s1052_s20   ;;  %s789_s22 = sadd.s32 4294967294, %s1052_s20   ;;  %s1052_s20 = sphi %s1092_s20, %s17_s20   ;;  %s1048_s19 = sphi %s1090_s19, %s1303_s19   ;;  %s1044_s18 = sphi %s1088_s18, %s1302_s18   ;;  %s1040_s17 = sphi %s1086_s17, %s1301_s17   ;;  %s1036_s16 = sphi %s1084_s16, %s1300_s16   ;;  %s1032_s15 = sphi %s1082_s15, %s1299_s15  }
   0x5   : > { %s36_s23 = sadd.s32 1, %s1048_s19  ;;  %s155_s24 = sadd.s32 1, %s1040_s17 }
   0x6   : > { %p38_p0 = scmp.ge.s32.totalorder %s36_s23, 2  ;;  %p165_p1 = scmp.ne.s32.totalorder %s1040_s17, %s1036_s16 }
   0x7   : > { %p166_p2 = scmp.eq.s32.totalorder %s788_s21, 1  ;;  %p171_p3 = scmp.ne.s32.totalorder %s1036_s16, %s1032_s15 }
   0x8   : > { %s1305_s23 = smov (%p38_p0, %s36_s23), 0  ;;  %p172_p5 = scmp.eq.s32.totalorder %s789_s22, 1 }
   0x9   : > { %p1122_p4 = por %p166_p2, %p165_p1  ;;  %s150_s26 = ssub.s32 %s1048_s19, %s1305_s23 }
   0xa   : > { %p794_p6 = scmp.ge.s32.totalorder %s1052_s20, 1  ;;  %p153_p7 = scmp.eq.s32.totalorder %s150_s26, 0 }
   0xb   : > { %p1129_p8 = por %p172_p5, %p171_p3  ;;  %p235_p9 = scmp.lt.s32.totalorder %s1052_s20, 3 }
   0xc   : > { %s1135_s28 = scalar_select %p153_p7, %s1040_s17, %s155_s24  }
   0xd   : > { %p236_p10 = pnand %p794_p6, %p235_p9 }
   0xe   : > { %v946_v0 = vld [vmem:[%s1293_s1 + $0x40] sm:$0xff] (!%p236_p10)   ;;  %s796_s5 = sshll.u32 (!%p236_p10), %s1044_s18, 3  ;;  %v948_v2 = vld [vmem:[%s1293_s1 + $0x48] sm:$0xff] (!%p236_p10)   ;;  %v950_v4 = vld [vmem:[%s1293_s1 + $0x50] sm:$0xff] (!%p236_p10)   ;;  %s282_s12 = sand.u32 (!%p236_p10), 1, %s1036_s16  }
   0xf   : > { %239 = sbr.rel (%p236_p10) target bundleno = 291 (0x123), region = 36  ;;  %v947_v1 = vld [vmem:[%s1293_s1] sm:$0xff] (!%p236_p10)   ;;  %833 = vmatprep.subr.bf16.mxu0 (!%p236_p10), %v946_v0  ;;  %873 = vmatprep.subr.bf16.mxu1 (!%p236_p10), %v946_v0  ;;  %v949_v3 = vld [vmem:[%s1293_s1 + $0x8] sm:$0xff] (!%p236_p10)   ;;  %p287_p11 = scmp.lt.s32.totalorder (!%p236_p10), %s796_s5, 15  ;;  %v951_v5 = vld [vmem:[%s1293_s1 + $0x10] sm:$0xff] (!%p236_p10)  }
  0x10   : > { %834 = vmatpush3.bf16.msra.mxu0 (!%p236_p10), %v947_v1  ;;  %881 = vmatpush3.bf16.msra.mxu1 (!%p236_p10), %v947_v1  ;;  %v952_v6 = vld [vmem:[%s1293_s1 + $0x58] sm:$0xff] (!%p236_p10)   ;;  %v954_v8 = vld [vmem:[%s1293_s1 + $0x60] sm:$0xff] (!%p236_p10)   ;;  %v956_v10 = vld [vmem:[%s1293_s1 + $0x68] sm:$0xff] (!%p236_p10)   ;;  %s1054_s9 = smov (!%p236_p10), [#allocation3]  }
  0x11   : > { %835 = vmatprep.subr.bf16.mxu0 (!%p236_p10), %v948_v2  ;;  %874 = vmatprep.subr.bf16.mxu1 (!%p236_p10), %v948_v2  ;;  %v953_v7 = vld [vmem:[%s1293_s1 + $0x18] sm:$0xff] (!%p236_p10)   ;;  %v955_v9 = vld [vmem:[%s1293_s1 + $0x20] sm:$0xff] (!%p236_p10)   ;;  %v957_v13 = vld [vmem:[%s1293_s1 + $0x28] sm:$0xff] (!%p236_p10)   ;;  %s978_s11 = sshll.u32 (!%p236_p10), %s1054_s9, 4  ;;  %s979_s11 = int_to_ptr.vmem [resolvable:$false] %s978_s11 }
  0x12   : > { %v958_v14 = vld [vmem:[%s1293_s1 + $0x70] sm:$0xff] (!%p236_p10)   ;;  %v960_v16 = vld [vmem:[%s1293_s1 + $0x78] sm:$0xff] (!%p236_p10)   ;;  %v825_v27 = vld [vmem:[%s1294_s2] ss:$0 sm:$0xff] (!%p236_p10)  ;;  %s980_s13 = scalar_lea.vmem (!%p236_p10), %s979_s11, 2048 }
  0x13   : > { %v959_v15 = vld [vmem:[%s1293_s1 + $0x30] sm:$0xff] (!%p236_p10)   ;;  %v961_v17 = vld [vmem:[%s1293_s1 + $0x38] sm:$0xff] (!%p236_p10)  }
  0x14   : > { %836 = vmatpush3.bf16.msra.mxu0 (!%p236_p10), %v949_v3  ;;  %882 = vmatpush3.bf16.msra.mxu1 (!%p236_p10), %v949_v3 }
  0x15   : > { %837 = vmatprep.subr.bf16.mxu0 (!%p236_p10), %v950_v4  ;;  %875 = vmatprep.subr.bf16.mxu1 (!%p236_p10), %v950_v4 }
  0x16   : > { %s1307_s5 = smov (!%p287_p11, %s796_s5), 15 }
  0x17   : > { %s831_s30 = sshll.u32 %s1307_s5, 3 }
  0x18   : > { %838 = vmatpush3.bf16.msra.mxu0 %v951_v5  ;;  %883 = vmatpush3.bf16.msra.mxu1 %v951_v5  ;;  %s1173_s10 = scalar_lea.vmem %s1292_s0, %s831_s30  ;;  %s1210_s21 = scalar_lea.vmem %s1295_s3, %s831_s30 }
  0x19   : > { %839 = vmatprep.subr.bf16.mxu0 %v952_v6  ;;  %876 = vmatprep.subr.bf16.mxu1 %v952_v6  ;;  %v964_v11 = vld [vmem:[%s1173_s10 + $0x4] ss:$8 sps:$4 sm:$0xff]   ;;  %v962_v18 = vld [vmem:[%s1173_s10] ss:$8 sps:$4 sm:$0xff]   ;;  %v968_v20 = vld [vmem:[%s1173_s10 + $0x14] ss:$8 sps:$4 sm:$0xff]  }
  0x1a   : > { %v967_v12 = vld [vmem:[%s1173_s10 + $0x24] ss:$8 sps:$4 sm:$0xff]   ;;  %548 = vmatprep.mubr.bf16.mxu0 %v964_v11  ;;  %v965_v19 = vld [vmem:[%s1173_s10 + $0x20] ss:$8 sps:$4 sm:$0xff]   ;;  %v970_v21 = vld [vmem:[%s1173_s10 + $0x34] ss:$8 sps:$4 sm:$0xff]  }
  0x1b   : > { %564 = vmatprep.mubr.bf16.mxu1 %v967_v12  ;;  %v972_v22 = vld [vmem:[%s1173_s10 + $0x10] ss:$8 sps:$4 sm:$0xff]   ;;  %v623_v33 = vld [vmem:[%s1210_s21] sm:$0xff]  ;;  %v624_v41 = vld [vmem:[%s1210_s21 + $0x8] sm:$0xff]  ;;  %s832_s30 = sshll.u32 %s1044_s18, 10  ;;  %s1246_s18 = scalar_lea.sflag [#allocation4], %s282_s12 }
  0x1c   : > { %840 = vmatpush3.bf16.msra.mxu0 %v953_v7  ;;  %884 = vmatpush3.bf16.msra.mxu1 %v953_v7  ;;  %v973_v23 = vld [vmem:[%s1173_s10 + $0x30] ss:$8 sps:$4 sm:$0xff]   ;;  %s795_s10 = sshll.u32 %s282_s12, 6  ;;  %v627_v34 = vld [vmem:[%s1210_s21 + $0x20] sm:$0xff]  ;;  %v628_v42 = vld [vmem:[%s1210_s21 + $0x28] sm:$0xff]  ;;  %s1236_s7 = scalar_lea.hbm %s1296_s4, %s832_s30 }
  0x1d   : > { %841 = vmatprep.subr.bf16.mxu0 %v954_v8  ;;  %877 = vmatprep.subr.bf16.mxu1 %v954_v8  ;;  %s1221_s5 = scalar_lea.vmem [#allocation3], %s795_s10  ;;  %v625_v57 = vld [vmem:[%s1210_s21 + $0x10] sm:$0xff]  ;;  %v626_v1 = vld [vmem:[%s1210_s21 + $0x18] sm:$0xff] }
  0x1e   : > { %v629_v58 = vld [vmem:[%s1210_s21 + $0x30] sm:$0xff]  ;;  %s662_s26 = sshll.u32 %s1221_s5, 4  ;;  %v630_v2 = vld [vmem:[%s1210_s21 + $0x38] sm:$0xff]  ;;  %s1238_s26 = int_to_ptr.vmem [resolvable:$true] %s662_s26 }
  0x1f   : > { %s974_s8 = scalar_lea.vmem %s1238_s26, 1024  ;;  %p981_p1 = scmp.lt.s32.totalorder %s1238_s26, %s979_s11 }
  0x20   : > { %842 = vmatpush3.bf16.msra.mxu0 %v955_v9  ;;  %885 = vmatpush3.bf16.msra.mxu1 %v955_v9  ;;  %p975_p12 = scmp.ne.s32.totalorder %s1238_s26, %s974_s8  ;;  %p982_p2 = scmp.lt.s32.totalorder %s980_s13, %s974_s8 }
  0x21   : > { %843 = vmatprep.subr.bf16.mxu0 %v956_v10  ;;  %878 = vmatprep.subr.bf16.mxu1 %v956_v10 }
  0x22   : > { %p976_p13 = pnand %p975_p12, %p1122_p4  ;;  %p983_p3 = por %p982_p2, %p981_p1 }
  0x24   : > { %844 = vmatpush3.bf16.msra.mxu0 %v957_v13  ;;  %886 = vmatpush3.bf16.msra.mxu1 %v957_v13  ;;  %p977_p0 = pneg %p976_p13 }
  0x25   : > { %845 = vmatprep.subr.bf16.mxu0 %v958_v14  ;;  %879 = vmatprep.subr.bf16.mxu1 %v958_v14 }
  0x26   : > { %p984_p5 = pnand %p983_p3, %p977_p0 }
  0x28   : > { %846 = vmatpush3.bf16.msra.mxu0 %v959_v15  ;;  %887 = vmatpush3.bf16.msra.mxu1 %v959_v15 }
  0x29   : > { %847 = vmatprep.subr.bf16.mxu0 %v960_v16  ;;  %880 = vmatprep.subr.bf16.mxu1 %v960_v16 }
  0x2c   : > { %848 = vmatpush3.bf16.msra.mxu0 %v961_v17  ;;  %888 = vmatpush3.bf16.msra.mxu1 %v961_v17 }
  0x2f   : > { %549 = vmatmul.mubr.bf16.vlgmr.msra.gmra.mrb[0].mxu0 %v962_v18  ;;  %565 = vmatmul.mubr.bf16.vlgmr.msra.gmra.mrb[0].mxu1 %v965_v19 }
  0x30   : > { %556 = vmatprep.mubr.bf16.mxu0 %v968_v20  ;;  %572 = vmatprep.mubr.bf16.mxu1 %v970_v21 }
  0x37   : > { %557 = vmatmul.mubr.bf16.gmra.mrb[4].mxu0 %v972_v22  ;;  %573 = vmatmul.mubr.bf16.gmra.mrb[4].mxu1 %v973_v23 }
 0x102   : > { %v849_v24 = vpop.f32.mrb[0].mxu0  ;;  %v861_v25 = vpop.f32.mrb[0].mxu1 }
 0x103   : > { %v850_v26 = vpop.f32.mrb[1].mxu0  ;;  %v862_v28 = vpop.f32.mrb[1].mxu1 }
 0x104   : > { %v851_v29 = vadd.f32 %v850_v26, %v849_v24  ;;  %v863_v30 = vadd.f32 %v862_v28, %v861_v25  ;;  %v852_v31 = vpop.f32.mrb[2].mxu0  ;;  %v864_v32 = vpop.f32.mrb[2].mxu1 }
 0x105   : > { %v853_v35 = vpop.f32.mrb[3].mxu0  ;;  %v865_v36 = vpop.f32.mrb[3].mxu1 }
 0x106   : > { %v615_v37 = vadd.f32 %v851_v29, %v825_v27  ;;  %v619_v38 = vadd.f32 %v863_v30, %v825_v27  ;;  %v854_v39 = vadd.f32 %v853_v35, %v852_v31  ;;  %v866_v40 = vadd.f32 %v865_v36, %v864_v32 }
 0x108   : > { %v631_v43 = vadd.f32 %v623_v33, %v615_v37  ;;  %v635_v44 = vadd.f32 %v627_v34, %v619_v38  ;;  %v616_v45 = vadd.f32 %v854_v39, %v825_v27  ;;  %v620_v46 = vadd.f32 %v866_v40, %v825_v27 }
 0x10a   : > { %639 = vst [vmem:[%s1221_s5] sm:$0xff] %v631_v43  ;;  %643 = vst [vmem:[%s1221_s5 + $0x20] sm:$0xff] %v635_v44  ;;  %v632_v47 = vadd.f32 %v624_v41, %v616_v45  ;;  %v636_v48 = vadd.f32 %v628_v42, %v620_v46  ;;  %v855_v49 = vpop.f32.mrb[4].mxu0  ;;  %v867_v50 = vpop.f32.mrb[4].mxu1 }
 0x10b   : > { %v856_v51 = vpop.f32.mrb[5].mxu0  ;;  %v868_v52 = vpop.f32.mrb[5].mxu1 }
 0x10c   : > { %640 = vst [vmem:[%s1221_s5 + $0x8] sm:$0xff] %v632_v47  ;;  %644 = vst [vmem:[%s1221_s5 + $0x28] sm:$0xff] %v636_v48  ;;  %v857_v53 = vadd.f32 %v856_v51, %v855_v49  ;;  %v869_v54 = vadd.f32 %v868_v52, %v867_v50  ;;  %v858_v55 = vpop.f32.mrb[6].mxu0  ;;  %v870_v56 = vpop.f32.mrb[6].mxu1 }
 0x10d   : > { %v859_v59 = vpop.f32.mrb[7].mxu0  ;;  %v871_v60 = vpop.f32.mrb[7].mxu1 }
 0x10e   : > { %v617_v61 = vadd.f32 %v857_v53, %v825_v27  ;;  %v621_v62 = vadd.f32 %v869_v54, %v825_v27  ;;  %v860_v63 = vadd.f32 %v859_v59, %v858_v55  ;;  %v872_v0 = vadd.f32 %v871_v60, %v870_v56 }
 0x110   : > { %v633_v3 = vadd.f32 %v625_v57, %v617_v61  ;;  %v637_v4 = vadd.f32 %v629_v58, %v621_v62  ;;  %v618_v5 = vadd.f32 %v860_v63, %v825_v27  ;;  %v622_v6 = vadd.f32 %v872_v0, %v825_v27 }
 0x112   : > { %641 = vst [vmem:[%s1221_s5 + $0x10] sm:$0xff] %v633_v3  ;;  %645 = vst [vmem:[%s1221_s5 + $0x30] sm:$0xff] %v637_v4  ;;  %v634_v7 = vadd.f32 %v626_v1, %v618_v5  ;;  %v638_v8 = vadd.f32 %v630_v2, %v622_v6 }
 0x114   : > { %642 = vst [vmem:[%s1221_s5 + $0x18] sm:$0xff] %v634_v7  ;;  %646 = vst [vmem:[%s1221_s5 + $0x38] sm:$0xff] %v638_v8 }
 0x115   : > { %987 = shalt.err (!%p984_p5)
}
 0x116   : > { %s988_s12 = scalar_lea.hbm %s1236_s7, 1024  ;;  %s992_s22 = scalar_lea.hbm %s1296_s4, 2048 }
 0x117   : > { %p989_p6 = scmp.ne.s32.totalorder %s1236_s7, %s988_s12  ;;  %p993_p10 = scmp.lt.u32.totalorder %s1236_s7, %s1296_s4 }
 0x118   : > { %p994_p11 = scmp.lt.u32.totalorder %s992_s22, %s988_s12  ;;  %p996_p13 = scmp.lt.u32.totalorder %s988_s12, %s1236_s7 }
 0x119   : > { %p990_p7 = pnand %p989_p6, %p1122_p4 }
 0x11a   : > { %p995_p12 = por %p994_p11, %p993_p10 }
 0x11b   : > { %p991_p9 = pneg %p990_p7 }
 0x11c   : > { %p997_p0 = por %p996_p13, %p995_p12 }
 0x11e   : > { %p998_p1 = pnand %p997_p0, %p991_p9 }
 0x120   : > { %1001 = shalt.err (!%p998_p1)
}
 0x121   : > { %s1055_s5 = smov 128   ;;  %s1056_s30 = smov 8  }
 0x122   : > { %889 = dma.vmem_to_hbm [thread:$0]  (%p1122_p4), %s1238_s26, 1024, %s1236_s7, %s1246_s18, %s1055_s5, %s1055_s5, %s1056_s30  }
 0x123 PF: > { %p895_p2 = scmp.ge.s32.totalorder %s1052_s20, 2  ;;  %s677_s29 = sand.u32 1, %s1032_s15  }
 0x124   : > { %s678_s6 = scalar_lea.sflag [#allocation4], %s677_s29 }
 0x125   : > { %p892_p3 = pnand %p895_p2, %p1129_p8 }
 0x127   : > { %1027 = dma.done.wait (!%p892_p3), %s678_s6, 1024  }
 0x128   : > { %1029 = vsyncadd (!%p892_p3), %s678_s6, 4294966272  ;;  %s17_s20 = sadd.s32 1, %s1052_s20   ;;  %s1299_s15 = smov %s1036_s16 }
 0x129   : > { %p14_p5 = scmp.ge.s32.totalorder %s17_s20, 4   ;;  %s1300_s16 = smov %s1040_s17 }
 0x12a   : > { %s1301_s17 = smov %s1135_s28  ;;  %s1302_s18 = smov %s1048_s19 }
 0x12b   : > { %s1303_s19 = smov %s1305_s23  ;;  %16 = sbr.rel (!%p14_p5) target bundleno = 4 (0x4), region = 88 }
 0x132   :  { %683 = vsyncpa [#allocation4], 1 }
 0x133   :  { %685 = vsyncpa [#allocation4 + $0x1], 1 }

// kernel: transformer_layer_forward.6
= control target key start
LH: loop header
LB: loop body
LE: loop exit
PB: predicated region body
PF: predicated region fallthrough
CT: control target
= control target key end

     0   :  { %s3942_s15 = smov 0   ;;  %s3944_s16 = smov 0   ;;  %s5494_s0 = inlined_call_operand.vmem [shape: bf16[2,64,384], index: 0, kind: input, shape index: {}, may-alias: {0,1,2}]   ;;  %s5495_s1 = inlined_call_operand.vmem [shape: bf16[2,64,384], index: 1, kind: input, shape index: {}, may-alias: {0,1,2}]   ;;  %s5496_s2 = inlined_call_operand.vmem [shape: bf16[2,64,384], index: 2, kind: input, shape index: {}, may-alias: {0,1,2}]   ;;  %s5497_s3 = inlined_call_operand.vmem [shape: f32[2,1,64], index: 3, kind: input, shape index: {}]   ;;  %s5498_s4 = inlined_call_operand.vmem [shape: bf16[2,64,128], index: 4, kind: output, shape index: {}]  }
   0x1   :  { %s3946_s17 = smov 0   ;;  %s3948_s18 = smov 0  }
   0x2   :  { %s3950_s19 = smov 0  }
   0x3 LB: > { %s33_s20 = sadd.s32 1, %s3905_s18  ;;  %p49_p1 = scmp.ne.s32.totalorder %s3897_s16, %s3893_s15  ;;  %s3909_s19 = sphi %s3950_s19, %s14_s19   ;;  %s3905_s18 = sphi %s3948_s18, %s5620_s18   ;;  %s3901_s17 = sphi %s3946_s17, %s5619_s17   ;;  %s3897_s16 = sphi %s3944_s16, %s5618_s16   ;;  %s3893_s15 = sphi %s3942_s15, %s5617_s15  }
   0x4   : > { %p35_p0 = scmp.ge.s32.totalorder %s33_s20, 2  ;;  %p50_p2 = scmp.eq.s32.totalorder %s3909_s19, 0 }
   0x5   : > { %s42_s23 = sadd.s32 1, %s3897_s16  ;;  %p3221_p5 = scmp.ge.s32.totalorder %s3909_s19, 2 }
   0x6   : > { %s5622_s20 = smov (%p35_p0, %s33_s20), 0  ;;  %p3973_p3 = por %p50_p2, %p49_p1 }
   0x7   : > { %s37_s22 = ssub.s32 %s3905_s18, %s5622_s20  ;;  %187 = sbr.rel (%p3221_p5) target bundleno = 44 (0x2c), region = 16 }
   0x8   : > { %p40_p4 = scmp.eq.s32.totalorder %s37_s22, 0 }
   0xa   : > { %s3981_s24 = scalar_select %p40_p4, %s3897_s16, %s42_s23  }
   0xe   : > { %190 = sbr.rel (!%p3973_p3) target bundleno = 24 (0x18), region = 20  ;;  %s192_s25 = sand.u32 (%p3973_p3), 1, %s3897_s16  }
   0xf   : > { %s3545_s26 = smul.u32 (%p3973_p3), 96, %s3905_s18  ;;  %s3222_s27 = sshll.u32 (%p3973_p3), %s192_s25, 5 }
  0x10   : > { %s194_s5 = scalar_lea.vmem (%p3973_p3), [#allocation5], %s3222_s27 }
  0x11   : > { %s200_s30 = scalar_lea.vmem (%p3973_p3), %s5494_s0, %s3545_s26 }
  0x12   : > { %v216_v0 = vld [vmem:[%s200_s30] sm:$0xf] (%p3973_p3)  ;;  %v218_v1 = vld [vmem:[%s200_s30 + $0xc] sm:$0xf] (%p3973_p3)  ;;  %v220_v2 = vld [vmem:[%s200_s30 + $0x18] sm:$0xf] (%p3973_p3) }
  0x13   : > { %217 = vst [vmem:[%s194_s5] sm:$0xf] (%p3973_p3), %v216_v0  ;;  %219 = vst [vmem:[%s194_s5 + $0x4] sm:$0xf] (%p3973_p3), %v218_v1  ;;  %v222_v3 = vld [vmem:[%s200_s30 + $0x24] sm:$0xf] (%p3973_p3) }
  0x14   : > { %221 = vst [vmem:[%s194_s5 + $0x8] sm:$0xf] (%p3973_p3), %v220_v2  ;;  %v224_v4 = vld [vmem:[%s200_s30 + $0x30] sm:$0xf] (%p3973_p3)  ;;  %v226_v5 = vld [vmem:[%s200_s30 + $0x3c] sm:$0xf] (%p3973_p3) }
  0x15   : > { %223 = vst [vmem:[%s194_s5 + $0xc] sm:$0xf] %v222_v3  ;;  %225 = vst [vmem:[%s194_s5 + $0x10] sm:$0xf] %v224_v4  ;;  %v228_v6 = vld [vmem:[%s200_s30 + $0x48] sm:$0xf] }
  0x16   : > { %227 = vst [vmem:[%s194_s5 + $0x14] sm:$0xf] %v226_v5  ;;  %v230_v7 = vld [vmem:[%s200_s30 + $0x54] sm:$0xf]  ;;  %229 = vst [vmem:[%s194_s5 + $0x18] sm:$0xf] %v228_v6 }
  0x17   : > { %231 = vst [vmem:[%s194_s5 + $0x1c] sm:$0xf] %v230_v7 }
  0x18 PF: > { %270 = sbr.rel (!%p3973_p3) target bundleno = 34 (0x22), region = 61  ;;  %s272_s6 = sand.u32 (%p3973_p3), 1, %s3897_s16  }
  0x19   : > { %s3225_s7 = smul.u32 (%p3973_p3), 96, %s3905_s18  ;;  %s3224_s8 = sshll.u32 (%p3973_p3), %s272_s6, 5 }
  0x1a   : > { %s274_s12 = scalar_lea.vmem (%p3973_p3), [#allocation6], %s3224_s8 }
  0x1b   : > { %s3112_s11 = scalar_lea.vmem (%p3973_p3), %s5495_s1, %s3225_s7 }
  0x1c   : > { %v3226_v8 = vld [vmem:[%s3112_s11 + $0x4] sm:$0xf] (%p3973_p3)  ;;  %v3227_v9 = vld [vmem:[%s3112_s11 + $0x10] sm:$0xf] (%p3973_p3)  ;;  %v3228_v10 = vld [vmem:[%s3112_s11 + $0x1c] sm:$0xf] (%p3973_p3) }
  0x1d   : > { %298 = vst [vmem:[%s274_s12] sm:$0xf] (%p3973_p3), %v3226_v8  ;;  %300 = vst [vmem:[%s274_s12 + $0x4] sm:$0xf] (%p3973_p3), %v3227_v9  ;;  %v3229_v11 = vld [vmem:[%s3112_s11 + $0x28] sm:$0xf] (%p3973_p3) }
  0x1e   : > { %302 = vst [vmem:[%s274_s12 + $0x8] sm:$0xf] (%p3973_p3), %v3228_v10  ;;  %v3230_v12 = vld [vmem:[%s3112_s11 + $0x34] sm:$0xf] (%p3973_p3)  ;;  %v3231_v13 = vld [vmem:[%s3112_s11 + $0x40] sm:$0xf] (%p3973_p3) }
  0x1f   : > { %304 = vst [vmem:[%s274_s12 + $0xc] sm:$0xf] %v3229_v11  ;;  %306 = vst [vmem:[%s274_s12 + $0x10] sm:$0xf] %v3230_v12  ;;  %v3232_v14 = vld [vmem:[%s3112_s11 + $0x4c] sm:$0xf] }
  0x20   : > { %308 = vst [vmem:[%s274_s12 + $0x14] sm:$0xf] %v3231_v13  ;;  %v3233_v15 = vld [vmem:[%s3112_s11 + $0x58] sm:$0xf]  ;;  %310 = vst [vmem:[%s274_s12 + $0x18] sm:$0xf] %v3232_v14 }
  0x21   : > { %312 = vst [vmem:[%s274_s12 + $0x1c] sm:$0xf] %v3233_v15 }
  0x22 PF: > { %351 = sbr.rel (!%p3973_p3) target bundleno = 44 (0x2c), region = 102  ;;  %s353_s13 = sand.u32 (%p3973_p3), 1, %s3897_s16  }
  0x23   : > { %s3235_s14 = smul.u32 (%p3973_p3), 96, %s3905_s18  ;;  %s3234_s22 = sshll.u32 (%p3973_p3), %s353_s13, 5 }
  0x24   : > { %s355_s27 = scalar_lea.vmem (%p3973_p3), [#allocation7], %s3234_s22 }
  0x25   : > { %s3120_s26 = scalar_lea.vmem (%p3973_p3), %s5496_s2, %s3235_s14 }
  0x26   : > { %v3236_v16 = vld [vmem:[%s3120_s26 + $0x8] sm:$0xf] (%p3973_p3)  ;;  %v3237_v17 = vld [vmem:[%s3120_s26 + $0x14] sm:$0xf] (%p3973_p3)  ;;  %v3238_v18 = vld [vmem:[%s3120_s26 + $0x20] sm:$0xf] (%p3973_p3) }
  0x27   : > { %379 = vst [vmem:[%s355_s27] sm:$0xf] (%p3973_p3), %v3236_v16  ;;  %381 = vst [vmem:[%s355_s27 + $0x4] sm:$0xf] (%p3973_p3), %v3237_v17  ;;  %v3239_v19 = vld [vmem:[%s3120_s26 + $0x2c] sm:$0xf] (%p3973_p3) }
  0x28   : > { %383 = vst [vmem:[%s355_s27 + $0x8] sm:$0xf] (%p3973_p3), %v3238_v18  ;;  %v3240_v20 = vld [vmem:[%s3120_s26 + $0x38] sm:$0xf] (%p3973_p3)  ;;  %v3241_v21 = vld [vmem:[%s3120_s26 + $0x44] sm:$0xf] (%p3973_p3) }
  0x29   : > { %385 = vst [vmem:[%s355_s27 + $0xc] sm:$0xf] %v3239_v19  ;;  %387 = vst [vmem:[%s355_s27 + $0x10] sm:$0xf] %v3240_v20  ;;  %v3242_v22 = vld [vmem:[%s3120_s26 + $0x50] sm:$0xf] }
  0x2a   : > { %389 = vst [vmem:[%s355_s27 + $0x14] sm:$0xf] %v3241_v21  ;;  %v3243_v23 = vld [vmem:[%s3120_s26 + $0x5c] sm:$0xf]  ;;  %391 = vst [vmem:[%s355_s27 + $0x18] sm:$0xf] %v3242_v22 }
  0x2b   : > { %393 = vst [vmem:[%s355_s27 + $0x1c] sm:$0xf] %v3243_v23 }
  0x2c PF: > { %p3244_p6 = scmp.ge.s32.totalorder %s3909_s19, 1  ;;  %p440_p7 = scmp.lt.s32.totalorder %s3909_s19, 3 }
  0x2e   : > { %p441_p8 = pnand %p3244_p6, %p440_p7 }
  0x30   : > { %444 = sbr.rel (%p441_p8) target bundleno = 2711 (0xa97), region = 147 }
  0x37   : > { %s447_s21 = sand.u32 1, %s3893_s15   ;;  %vm593_vm0 = vcmask 261120   ;;  %vm528_vm1 = vcmask 7168   ;;  %v3911_v36 = vmov -inf   ;;  %p507_p9 = scmp.lt.s32.totalorder %s3901_s17, 1  ;;  %vm811_vm2 = vcmask 523264  }
  0x38   : > { %s4008_s28 = sshll.u32 %s447_s21, 5  ;;  %531 = vst.msk [vmem:[#allocation2 + $0x10] sm:$0xff] %vm528_vm1, %v3911_v36  ;;  %529 = vst.msk [vmem:[#allocation2] sm:$0xff] %vm528_vm1, %v3911_v36  ;;  %v3912_v6 = vmov 0   ;;  %v3913_v7 = vmov 0.0   ;;  %s3914_s7 = smov 96  }
  0x39   : > { %s4011_s29 = scalar_lea.vmem [#allocation6], %s4008_s28  ;;  %s4026_s15 = scalar_lea.vmem [#allocation5], %s4008_s28  ;;  %530 = vst.msk [vmem:[#allocation2 + $0x8] sm:$0xff] %vm528_vm1, %v3911_v36  ;;  %532 = vst.msk [vmem:[#allocation2 + $0x18] sm:$0xff] %vm528_vm1, %v3911_v36  ;;  %3592 = vset.pattern.permute.xlu0 %v3912_v6  ;;  %3593 = vset.pattern.permute.xlu1 %v3912_v6  ;;  %vm3020_vm3 = vcmask 785408  }
  0x3a   : > { %v4014_v24 = vld [vmem:[%s4011_s29] sm:$0xff]   ;;  %v4017_v25 = vld [vmem:[%s4011_s29 + $0x8] sm:$0xff]   ;;  %v4036_v29 = vld [vmem:[%s4011_s29 + $0x10] sm:$0xff]   ;;  %533 = vst.msk [vmem:[#allocation2 + $0x20] sm:$0xff] %vm528_vm1, %v3911_v36  ;;  %s5624_s17 = smov (!%p507_p9, %s3901_s17), 1  ;;  %s4323_s8 = scalar_lea.vmem [#allocation7], %s4008_s28 }
  0x3b   : > { %3529 = vmatprep.subr.msk.bf16.mxu0 %vm593_vm0, %v4014_v24  ;;  %v705_v26 = vsel %vm593_vm0, %v4014_v24, 0  ;;  %v4029_v27 = vld [vmem:[%s4026_s15] sm:$0xff]   ;;  %v708_v28 = vsel %vm593_vm0, %v4017_v25, 0  ;;  %v711_v30 = vsel %vm593_vm0, %v4036_v29, 0  ;;  %v4043_v31 = vld [vmem:[%s4011_s29 + $0x18] sm:$0xff]   ;;  %v4050_v33 = vld [vmem:[%s4026_s15 + $0x8] sm:$0xff]   ;;  %s4104_s6 = scalar_lea.vmem %s5497_s3, %s5624_s17 }
  0x3c   : > { %3402 = vmatpush3.bf16.xpose.msra.mxu0 %v705_v26  ;;  %3409 = vmatprep.mubr.msk.bf16.mxu0 %vm593_vm0, %v4029_v27  ;;  %v714_v32 = vsel %vm593_vm0, %v4043_v31, 0  ;;  %v4053_v34 = vld [vmem:[%s4026_s15 + $0x10] sm:$0xff]   ;;  %v4060_v35 = vld [vmem:[%s4026_s15 + $0x18] sm:$0xff]   ;;  %534 = vst.msk [vmem:[#allocation2 + $0x28] sm:$0xff] %vm528_vm1, %v3911_v36  ;;  %535 = vst.msk [vmem:[#allocation2 + $0x30] sm:$0xff] %vm528_vm1, %v3911_v36  ;;  %s3915_s9 = smov 64  }
  0x3d   : > { %3530 = vmatprep.subr.msk.bf16.mxu0 %vm593_vm0, %v4017_v25  ;;  %536 = vst.msk [vmem:[#allocation2 + $0x38] sm:$0xff] %vm528_vm1, %v3911_v36  ;;  %537 = vst.msk [vmem:[#allocation2 + $0x40] sm:$0xff] %vm528_vm1, %v3911_v36  ;;  %v4107_v38 = vld [vmem:[%s4104_s6] ss:$0 sm:$0xff]  ;;  %s3916_s10 = smov 32   ;;  %s3305_s11 = sshll.u32 %s5624_s17, 5 }
  0x3e   : > { %538 = vst.msk [vmem:[#allocation2 + $0x48] sm:$0xff] %vm528_vm1, %v3911_v36  ;;  %539 = vst.msk [vmem:[#allocation2 + $0x50] sm:$0xff] %vm528_vm1, %v3911_v36  ;;  %s5445_s13 = scalar_lea.vmem %s5498_s4, %s3305_s11 }
  0x3f   : > { %540 = vst.msk [vmem:[#allocation2 + $0x58] sm:$0xff] %vm528_vm1, %v3911_v36  ;;  %541 = vst.msk [vmem:[#allocation2 + $0x60] sm:$0xff] %vm528_vm1, %v3911_v36  ;;  %v4277_v8 = vld [vmem:[#allocation2 + $0x10] sm:$0xff]  ;;  %v4279_v9 = vld [vmem:[#allocation2] sm:$0xff] }
  0x40   : > { %542 = vst.msk [vmem:[#allocation2 + $0x68] sm:$0xff] %vm528_vm1, %v3911_v36  ;;  %543 = vst.msk [vmem:[#allocation2 + $0x70] sm:$0xff] %vm528_vm1, %v3911_v36  ;;  %v4287_v14 = vld [vmem:[#allocation2 + $0x18] sm:$0xff]  ;;  %v4294_v16 = vld [vmem:[#allocation2 + $0x8] sm:$0xff] }
  0x41   : > { %544 = vst.msk [vmem:[#allocation2 + $0x78] sm:$0xff] %vm528_vm1, %v3911_v36  ;;  %545 = vst.msk [vmem:[#allocation2 + $0x80] sm:$0xff] %vm528_vm1, %v3911_v36  ;;  %v4311_v23 = vld [vmem:[#allocation2 + $0x20] sm:$0xff] }
  0x42   : > { %546 = vst.msk [vmem:[#allocation2 + $0x88] sm:$0xff] %vm528_vm1, %v3911_v36  ;;  %547 = vst.msk [vmem:[#allocation2 + $0x90] sm:$0xff] %vm528_vm1, %v3911_v36 }
  0x43   : > { %548 = vst.msk [vmem:[#allocation2 + $0x98] sm:$0xff] %vm528_vm1, %v3911_v36  ;;  %549 = vst.msk [vmem:[#allocation2 + $0xa0] sm:$0xff] %vm528_vm1, %v3911_v36 }
  0x44   : > { %3404 = vmatpush3.bf16.xpose.msra.mxu0 %v708_v28  ;;  %550 = vst.msk [vmem:[#allocation2 + $0xa8] sm:$0xff] %vm528_vm1, %v3911_v36  ;;  %551 = vst.msk [vmem:[#allocation2 + $0xb0] sm:$0xff] %vm528_vm1, %v3911_v36 }
  0x45   : > { %3531 = vmatprep.subr.msk.bf16.mxu0 %vm593_vm0, %v4036_v29  ;;  %552 = vst.msk [vmem:[#allocation2 + $0xb8] sm:$0xff] %vm528_vm1, %v3911_v36  ;;  %553 = vst.msk [vmem:[#allocation2 + $0xc0] sm:$0xff] %vm528_vm1, %v3911_v36 }
  0x46   : > { %554 = vst.msk [vmem:[#allocation2 + $0xc8] sm:$0xff] %vm528_vm1, %v3911_v36  ;;  %555 = vst.msk [vmem:[#allocation2 + $0xd0] sm:$0xff] %vm528_vm1, %v3911_v36  ;;  %v4507_v15 = vld [vmem:[#allocation2 + $0x58] sm:$0xff] }
  0x47   : > { %556 = vst.msk [vmem:[#allocation2 + $0xd8] sm:$0xff] %vm528_vm1, %v3911_v36  ;;  %557 = vst.msk [vmem:[#allocation2 + $0xe0] sm:$0xff] %vm528_vm1, %v3911_v36 }
  0x48   : > { %558 = vst.msk [vmem:[#allocation2 + $0xe8] sm:$0xff] %vm528_vm1, %v3911_v36  ;;  %559 = vst.msk [vmem:[#allocation2 + $0xf0] sm:$0xff] %vm528_vm1, %v3911_v36 }
  0x49   : > { %560 = vst.msk [vmem:[#allocation2 + $0xf8] sm:$0xff] %vm528_vm1, %v3911_v36  ;;  %562 = vst.msk [vmem:[#allocation3 + $0x8] sm:$0xff] %vm528_vm1, %v3913_v7  ;;  %v4328_v36 = vld [vmem:[#allocation2 + $0x30] sm:$0xff] }
  0x4a   : > { %561 = vst.msk [vmem:[#allocation3] sm:$0xff] %vm528_vm1, %v3913_v7  ;;  %563 = vst.msk [vmem:[#allocation3 + $0x10] sm:$0xff] %vm528_vm1, %v3913_v7 }
  0x4b   : > { %564 = vst.msk [vmem:[#allocation3 + $0x18] sm:$0xff] %vm528_vm1, %v3913_v7  ;;  %565 = vst.msk [vmem:[#allocation3 + $0x20] sm:$0xff] %vm528_vm1, %v3913_v7 }
  0x4c   : > { %3406 = vmatpush3.bf16.xpose.msra.mxu0 %v711_v30  ;;  %566 = vst.msk [vmem:[#allocation3 + $0x28] sm:$0xff] %vm528_vm1, %v3913_v7  ;;  %567 = vst.msk [vmem:[#allocation3 + $0x30] sm:$0xff] %vm528_vm1, %v3913_v7  ;;  %v4320_v30 = vld [vmem:[#allocation2 + $0x28] sm:$0xff] }
  0x4d   : > { %3532 = vmatprep.subr.msk.bf16.mxu0 %vm593_vm0, %v4043_v31  ;;  %568 = vst.msk [vmem:[#allocation3 + $0x38] sm:$0xff] %vm528_vm1, %v3913_v7  ;;  %569 = vst.msk [vmem:[#allocation3 + $0x40] sm:$0xff] %vm528_vm1, %v3913_v7 }
  0x4e   : > { %570 = vst.msk [vmem:[#allocation3 + $0x48] sm:$0xff] %vm528_vm1, %v3913_v7  ;;  %571 = vst.msk [vmem:[#allocation3 + $0x50] sm:$0xff] %vm528_vm1, %v3913_v7 }
  0x4f   : > { %572 = vst.msk [vmem:[#allocation3 + $0x58] sm:$0xff] %vm528_vm1, %v3913_v7  ;;  %573 = vst.msk [vmem:[#allocation3 + $0x60] sm:$0xff] %vm528_vm1, %v3913_v7 }
  0x50   : > { %574 = vst.msk [vmem:[#allocation3 + $0x68] sm:$0xff] %vm528_vm1, %v3913_v7  ;;  %575 = vst.msk [vmem:[#allocation3 + $0x70] sm:$0xff] %vm528_vm1, %v3913_v7 }
  0x51   : > { %576 = vst.msk [vmem:[#allocation3 + $0x78] sm:$0xff] %vm528_vm1, %v3913_v7  ;;  %577 = vst.msk [vmem:[#allocation3 + $0x80] sm:$0xff] %vm528_vm1, %v3913_v7 }
  0x52   : > { %578 = vst.msk [vmem:[#allocation3 + $0x88] sm:$0xff] %vm528_vm1, %v3913_v7  ;;  %579 = vst.msk [vmem:[#allocation3 + $0x90] sm:$0xff] %vm528_vm1, %v3913_v7 }
  0x53   : > { %580 = vst.msk [vmem:[#allocation3 + $0x98] sm:$0xff] %vm528_vm1, %v3913_v7  ;;  %581 = vst.msk [vmem:[#allocation3 + $0xa0] sm:$0xff] %vm528_vm1, %v3913_v7 }
  0x54   : > { %3408 = vmatpush3.bf16.xpose.msra.mxu0 %v714_v32  ;;  %582 = vst.msk [vmem:[#allocation3 + $0xa8] sm:$0xff] %vm528_vm1, %v3913_v7  ;;  %583 = vst.msk [vmem:[#allocation3 + $0xb0] sm:$0xff] %vm528_vm1, %v3913_v7 }
  0x55   : > { %584 = vst.msk [vmem:[#allocation3 + $0xb8] sm:$0xff] %vm528_vm1, %v3913_v7  ;;  %585 = vst.msk [vmem:[#allocation3 + $0xc0] sm:$0xff] %vm528_vm1, %v3913_v7 }
  0x56   : > { %586 = vst.msk [vmem:[#allocation3 + $0xc8] sm:$0xff] %vm528_vm1, %v3913_v7  ;;  %587 = vst.msk [vmem:[#allocation3 + $0xd0] sm:$0xff] %vm528_vm1, %v3913_v7 }
  0x57   : > { %588 = vst.msk [vmem:[#allocation3 + $0xd8] sm:$0xff] %vm528_vm1, %v3913_v7  ;;  %589 = vst.msk [vmem:[#allocation3 + $0xe0] sm:$0xff] %vm528_vm1, %v3913_v7 }
  0x58   : > { %590 = vst.msk [vmem:[#allocation3 + $0xe8] sm:$0xff] %vm528_vm1, %v3913_v7  ;;  %591 = vst.msk [vmem:[#allocation3 + $0xf0] sm:$0xff] %vm528_vm1, %v3913_v7 }
  0x59   : > { %592 = vst.msk [vmem:[#allocation3 + $0xf8] sm:$0xff] %vm528_vm1, %v3913_v7  ;;  %5523 = vst [vmem:[#allocation16_spill] sm:$0xff] %v4507_v15 }
  0x5a   : > { %594 = vst.msk [vmem:[#allocation4] sm:$0xff] %vm593_vm0, %v3913_v7  ;;  %595 = vst.msk [vmem:[#allocation4 + $0x8] sm:$0xff] %vm593_vm0, %v3913_v7 }
  0x5b   : > { %3410 = vmatmul.mubr.msk.bf16.vlgmr.msra.gmra.mrb[0].mxu0 %vm593_vm0, %v4050_v33  ;;  %596 = vst.msk [vmem:[#allocation4 + $0x10] sm:$0xff] %vm593_vm0, %v3913_v7  ;;  %597 = vst.msk [vmem:[#allocation4 + $0x18] sm:$0xff] %vm593_vm0, %v3913_v7 }
  0x5c   : > { %3413 = vmatprep.mubr.msk.bf16.mxu0 %vm593_vm0, %v4053_v34  ;;  %598 = vst.msk [vmem:[#allocation4 + $0x20] sm:$0xff] %vm593_vm0, %v3913_v7  ;;  %599 = vst.msk [vmem:[#allocation4 + $0x28] sm:$0xff] %vm593_vm0, %v3913_v7 }
  0x5d   : > { %600 = vst.msk [vmem:[#allocation4 + $0x30] sm:$0xff] %vm593_vm0, %v3913_v7  ;;  %601 = vst.msk [vmem:[#allocation4 + $0x38] sm:$0xff] %vm593_vm0, %v3913_v7 }
  0x5e   : > { %602 = vst.msk [vmem:[#allocation4 + $0x40] sm:$0xff] %vm593_vm0, %v3913_v7  ;;  %603 = vst.msk [vmem:[#allocation4 + $0x48] sm:$0xff] %vm593_vm0, %v3913_v7 }
  0x5f   : > { %604 = vst.msk [vmem:[#allocation4 + $0x50] sm:$0xff] %vm593_vm0, %v3913_v7  ;;  %605 = vst.msk [vmem:[#allocation4 + $0x58] sm:$0xff] %vm593_vm0, %v3913_v7 }
  0x60   : > { %606 = vst.msk [vmem:[#allocation4 + $0x60] sm:$0xff] %vm593_vm0, %v3913_v7  ;;  %607 = vst.msk [vmem:[#allocation4 + $0x68] sm:$0xff] %vm593_vm0, %v3913_v7 }
  0x61   : > { %608 = vst.msk [vmem:[#allocation4 + $0x70] sm:$0xff] %vm593_vm0, %v3913_v7  ;;  %609 = vst.msk [vmem:[#allocation4 + $0x78] sm:$0xff] %vm593_vm0, %v3913_v7 }
  0x62   : > { %610 = vst.msk [vmem:[#allocation4 + $0x80] sm:$0xff] %vm593_vm0, %v3913_v7  ;;  %611 = vst.msk [vmem:[#allocation4 + $0x88] sm:$0xff] %vm593_vm0, %v3913_v7 }
  0x63   : > { %3414 = vmatmul.mubr.msk.bf16.gmra.mrb[4].mxu0 %vm593_vm0, %v4060_v35  ;;  %612 = vst.msk [vmem:[#allocation4 + $0x90] sm:$0xff] %vm593_vm0, %v3913_v7  ;;  %613 = vst.msk [vmem:[#allocation4 + $0x98] sm:$0xff] %vm593_vm0, %v3913_v7 }
  0x64   : > { %614 = vst.msk [vmem:[#allocation4 + $0xa0] sm:$0xff] %vm593_vm0, %v3913_v7  ;;  %615 = vst.msk [vmem:[#allocation4 + $0xa8] sm:$0xff] %vm593_vm0, %v3913_v7 }
  0x65   : > { %616 = vst.msk [vmem:[#allocation4 + $0xb0] sm:$0xff] %vm593_vm0, %v3913_v7  ;;  %617 = vst.msk [vmem:[#allocation4 + $0xb8] sm:$0xff] %vm593_vm0, %v3913_v7 }
  0x66   : > { %618 = vst.msk [vmem:[#allocation4 + $0xc0] sm:$0xff] %vm593_vm0, %v3913_v7  ;;  %619 = vst.msk [vmem:[#allocation4 + $0xc8] sm:$0xff] %vm593_vm0, %v3913_v7 }
  0x67   : > { %620 = vst.msk [vmem:[#allocation4 + $0xd0] sm:$0xff] %vm593_vm0, %v3913_v7  ;;  %621 = vst.msk [vmem:[#allocation4 + $0xd8] sm:$0xff] %vm593_vm0, %v3913_v7 }
  0x68   : > { %622 = vst.msk [vmem:[#allocation4 + $0xe0] sm:$0xff] %vm593_vm0, %v3913_v7  ;;  %623 = vst.msk [vmem:[#allocation4 + $0xe8] sm:$0xff] %vm593_vm0, %v3913_v7 }
  0x69   : > { %624 = vst.msk [vmem:[#allocation4 + $0xf0] sm:$0xff] %vm593_vm0, %v3913_v7  ;;  %625 = vst.msk [vmem:[#allocation4 + $0xf8] sm:$0xff] %vm593_vm0, %v3913_v7 }
 0x12e   : > { %v3411_v37 = vpop.f32.mrb[0].mxu0 }
 0x12f   : > { %v783_v39 = vmul.f32 0.17677669, %v3411_v37  ;;  %v750_v40 = vpop.f32.mrb[1].mxu0  ;;  %v4331_v37 = vld [vmem:[%s4323_s8] sm:$0xff]  }
 0x130   : > { %v781_v41 = vmul.f32 0.17677669, %v750_v40  ;;  %v3412_v42 = vpop.f32.mrb[2].mxu0  ;;  %3417 = vmatprep.subr.bf16.mxu1 %v4331_v37 }
 0x131   : > { %v784_v43 = vmul.f32 0.17677669, %v3412_v42  ;;  %v753_v44 = vpop.f32.mrb[3].mxu0  ;;  %v4110_v45 = vadd.f32 %v4107_v38, %v783_v39  ;;  %3418 = vmatpush3.bf16.msra.mxu1 %v4331_v37 }
 0x132   : > { %v782_v46 = vmul.f32 0.17677669, %v753_v44  ;;  %v4113_v47 = vadd.f32 %v4107_v38, %v781_v41  ;;  %v4347_v44 = vld [vmem:[%s4323_s8 + $0x8] sm:$0xff]  }
 0x133   : > { %v818_v48 = vsel %vm811_vm2, %v4110_v45, -inf  ;;  %v4118_v49 = vadd.f32 %v4107_v38, %v784_v43  ;;  %v4343_v43 = vld [vmem:[#allocation2 + $0x38] sm:$0xff]  ;;  %3419 = vmatprep.subr.bf16.mxu1 %v4347_v44 }
 0x134   : > { %819 = vmax.xlane.f32.xlu1 %v818_v48  ;;  %v812_v50 = vsel %vm811_vm2, %v4113_v47, -inf  ;;  %v4123_v51 = vadd.f32 %v4107_v38, %v782_v46 }
 0x135   : > { %813 = vmax.xlane.f32.xlu0 %v812_v50  ;;  %v821_v54 = vsel %vm811_vm2, %v4118_v49, -inf  ;;  %3420 = vmatpush3.bf16.msra.mxu1 %v4347_v44 }
 0x136   : > { %v3415_v52 = vpop.f32.mrb[4].mxu0  ;;  %v815_v58 = vsel %vm811_vm2, %v4123_v51, -inf }
 0x137   : > { %v766_v53 = vpop.f32.mrb[5].mxu0  ;;  %v787_v55 = vmul.f32 0.17677669, %v3415_v52 }
 0x138   : > { %v785_v56 = vmul.f32 0.17677669, %v766_v53  ;;  %822 = vmax.xlane.f32.xlu1 %v821_v54  ;;  %v3416_v57 = vpop.f32.mrb[6].mxu0  ;;  %v4369_v54 = vld [vmem:[%s4323_s8 + $0x10] sm:$0xff]  }
 0x139   : > { %816 = vmax.xlane.f32.xlu0 %v815_v58  ;;  %v769_v59 = vpop.f32.mrb[7].mxu0  ;;  %v788_v60 = vmul.f32 0.17677669, %v3416_v57  ;;  %v4138_v1 = vadd.f32 %v4107_v38, %v787_v55  ;;  %3421 = vmatprep.subr.bf16.mxu1 %v4369_v54 }
 0x13a   : > { %v786_v61 = vmul.f32 0.17677669, %v769_v59  ;;  %v4130_v62 = vadd.f32 %v4107_v38, %v785_v56  ;;  %v4381_v56 = vld [vmem:[%s4323_s8 + $0x18] sm:$0xff]   ;;  %3422 = vmatpush3.bf16.msra.mxu1 %v4369_v54 }
 0x13b   : > { %v4143_v3 = vadd.f32 %v4107_v38, %v788_v60  ;;  %v830_v4 = vsel %vm811_vm2, %v4138_v1, -inf  ;;  %3423 = vmatprep.subr.bf16.mxu1 %v4381_v56 }
 0x13c   : > { %v824_v63 = vsel %vm811_vm2, %v4130_v62, -inf  ;;  %v4135_v0 = vadd.f32 %v4107_v38, %v786_v61 }
 0x13d   : > { %825 = vmax.xlane.f32.xlu0 %v824_v63  ;;  %v833_v5 = vsel %vm811_vm2, %v4143_v3, -inf }
 0x13e   : > { %v827_v2 = vsel %vm811_vm2, %v4135_v0, -inf  ;;  %3424 = vmatpush3.bf16.msra.mxu1 %v4381_v56 }
 0x13f   : > { %828 = vmax.xlane.f32.xlu1 %v827_v2 }
 0x141   : > { %831 = vmax.xlane.f32.xlu0 %v830_v4 }
 0x143   : > { %834 = vmax.xlane.f32.xlu1 %v833_v5 }
 0x1c1   : > { %v820_v10 = vpop.xlane.xlu1 %819 }
 0x1c2   : > { %v4282_v11 = vmax.f32 %v4277_v8, %v820_v10  ;;  %v814_v12 = vpop.xlane.xlu0 %813 }
 0x1c3   : > { %v4285_v13 = vmax.f32 %v4279_v9, %v814_v12 }
 0x1c4   : > { %1168 = vst.msk [vmem:[#allocation2 + $0x10] sm:$0xff] %vm528_vm1, %v4282_v11  ;;  %880 = vperm.xlu1 %3593, %v4282_v11  }
 0x1c5   : > { %1166 = vst.msk [vmem:[#allocation2] sm:$0xff] %vm528_vm1, %v4285_v13  ;;  %v823_v18 = vpop.xlane.xlu1 %822  ;;  %870 = vperm.xlu0 %3592, %v4285_v13  }
 0x1c6   : > { %v4302_v19 = vmax.f32 %v4287_v14, %v823_v18  ;;  %v817_v20 = vpop.xlane.xlu0 %816 }
 0x1c7   : > { %v4305_v21 = vmax.f32 %v4294_v16, %v817_v20 }
 0x1c8   : > { %1169 = vst.msk [vmem:[#allocation2 + $0x18] sm:$0xff] %vm528_vm1, %v4302_v19 }
 0x1c9   : > { %1167 = vst.msk [vmem:[#allocation2 + $0x8] sm:$0xff] %vm528_vm1, %v4305_v21  ;;  %875 = vperm.xlu1 %3593, %v4305_v21   ;;  %1184 = vrot.lane.b32.xlu0 %v4017_v25, %s3914_s7 }
 0x1ca   : > { %v826_v28 = vpop.xlane.xlu0 %825 }
 0x1cb   : > { %v4326_v32 = vmax.f32 %v4311_v23, %v826_v28 }
 0x1cc   : > { %v829_v39 = vpop.xlane.xlu1 %828 }
 0x1cd   : > { %1170 = vst.msk [vmem:[#allocation2 + $0x20] sm:$0xff] %vm528_vm1, %v4326_v32  ;;  %v4338_v41 = vmax.f32 %v4320_v30, %v829_v39  ;;  %885 = vperm.xlu1 %3593, %v4302_v19   ;;  %1188 = vrot.lane.b32.xlu0 %v4043_v31, %s3914_s7 }
 0x1ce   : > { %v832_v42 = vpop.xlane.xlu0 %831 }
 0x1cf   : > { %1171 = vst.msk [vmem:[#allocation2 + $0x28] sm:$0xff] %vm528_vm1, %v4338_v41  ;;  %v4354_v48 = vmax.f32 %v4328_v36, %v832_v42 }
 0x1d0   : > { %v835_v50 = vpop.xlane.xlu1 %834 }
 0x1d1   : > { %1172 = vst.msk [vmem:[#allocation2 + $0x30] sm:$0xff] %vm528_vm1, %v4354_v48  ;;  %v4363_v53 = vmax.f32 %v4343_v43, %v835_v50  ;;  %900 = vperm.xlu1 %3593, %v4354_v48   ;;  %1176 = vrot.lane.b32.xlu0 %v4050_v33, %s3914_s7 }
 0x1d3   : > { %1173 = vst.msk [vmem:[#allocation2 + $0x38] sm:$0xff] %vm528_vm1, %v4363_v53 }
 0x1d5   : > { %890 = vperm.xlu1 %3593, %v4326_v32   ;;  %1180 = vrot.lane.b32.xlu0 %v4060_v35, %s3914_s7 }
 0x1d9   : > { %905 = vperm.xlu1 %3593, %v4363_v53  }
 0x1dd   : > { %895 = vperm.xlu1 %3593, %v4338_v41  }
 0x1e1   : > { %1182 = vrot.lane.b32.xlu1 %v4014_v24, %s3914_s7 }
 0x1e5   : > { %1186 = vrot.lane.b32.xlu1 %v4036_v29, %s3914_s7 }
 0x1e9   : > { %1174 = vrot.lane.b32.xlu1 %v4029_v27, %s3914_s7 }
 0x1ed   : > { %1178 = vrot.lane.b32.xlu1 %v4053_v34, %s3914_s7 }
 0x243   : > { %v881_v57 = vpop.permute.xlu1 %880 }
 0x244   : > { %v871_v58 = vpop.permute.xlu0 %870  ;;  %v910_v60 = vsub.f32 %v4110_v45, %v881_v57 }
 0x245   : > { %v908_v59 = vsub.f32 %v4113_v47, %v871_v58 }
 0x246   : > { %v920_v5 = vmul.f32 1.442695, %v910_v60 }
 0x247   : > { %v916_v61 = vmul.f32 1.442695, %v908_v59 }
 0x248   : > { %v876_v63 = vpop.permute.xlu1 %875 }
 0x249   : > { %v909_v2 = vsub.f32 %v4123_v51, %v876_v63  ;;  %3666 = vpow2.f32 %v916_v61 }
 0x24b   : > { %v918_v4 = vmul.f32 1.442695, %v909_v2 }
 0x24c   : > { %v886_v6 = vpop.permute.xlu1 %885 }
 0x24d   : > { %3668 = vpow2.f32 %v918_v4  ;;  %v911_v7 = vsub.f32 %v4118_v49, %v886_v6 }
 0x24e   : > { %3670 = vpow2.f32 %v920_v5 }
 0x24f   : > { %v922_v10 = vmul.f32 1.442695, %v911_v7 }
 0x250   : > { %v901_v12 = vpop.permute.xlu1 %900 }
 0x251   : > { %3672 = vpow2.f32 %v922_v10  ;;  %v914_v49 = vsub.f32 %v4138_v1, %v901_v12  ;;  %v1185_v1 = vpop.permute.xlu0 %1184 }
 0x252   : > { %v1206_v4 = vsel %vm593_vm0, %v1185_v1, 0 }
 0x253   : > { %v4400_v20 = vpop.eup %3666  ;;  %v928_v61 = vmul.f32 1.442695, %v914_v49 }
 0x254   : > { %v891_v18 = vpop.permute.xlu1 %890 }
 0x255   : > { %v912_v45 = vsub.f32 %v4130_v62, %v891_v18 }
 0x257   : > { %v4402_v47 = vpop.eup %3668  ;;  %v924_v57 = vmul.f32 1.442695, %v912_v45 }
 0x258   : > { %v906_v28 = vpop.permute.xlu1 %905  ;;  %v1045_v51 = vpack.c.bf16 %v4402_v47, %v4400_v20  ;;  %v4408_v42 = vpop.eup %3670 }
 0x259   : > { %v915_v39 = vsub.f32 %v4143_v3, %v906_v28  ;;  %3674 = vpow2.f32 %v924_v57 }
 0x25a   : > { %3425 = vmatprep.mubr.msk.bf16.mxu1 %vm811_vm2, %v1045_v51  ;;  %v1189_v51 = vpop.permute.xlu0 %1188 }
 0x25b   : > { %v4412_v50 = vpop.eup %3672  ;;  %v930_v58 = vmul.f32 1.442695, %v915_v39  ;;  %v1212_v39 = vsel %vm593_vm0, %v1189_v51, 0 }
 0x25c   : > { %v896_v59 = vpop.permute.xlu1 %895  ;;  %v1046_v62 = vpack.c.bf16 %v4412_v50, %v4408_v42 }
 0x25d   : > { %v913_v60 = vsub.f32 %v4135_v0, %v896_v59  ;;  %3676 = vpow2.f32 %v930_v58 }
 0x25e   : > { %3426 = vmatmul.mubr.msk.bf16.vlgmr.msra.gmra.mrb[0].mxu1 %vm811_vm2, %v1046_v62  ;;  %v1177_v49 = vpop.permute.xlu0 %1176 }
 0x25f   : > { %v926_v3 = vmul.f32 1.442695, %v913_v60 }
 0x260   : > { %v1183_v63 = vpop.permute.xlu1 %1182 }
 0x261   : > { %3678 = vpow2.f32 %v926_v3  ;;  %3533 = vmatprep.subr.msk.bf16.mxu1 %vm593_vm0, %v1183_v63  ;;  %v1203_v2 = vsel %vm593_vm0, %v1183_v63, 0 }
 0x262   : > { %3680 = vpow2.f32 %v928_v61  ;;  %3434 = vmatpush3.bf16.xpose.msra.mxu1 %v1203_v2  ;;  %v1181_v58 = vpop.permute.xlu0 %1180 }
 0x263   : > { %3534 = vmatprep.subr.msk.bf16.mxu1 %vm593_vm0, %v1185_v1  ;;  %v4422_v5 = vpop.eup %3674 }
 0x264   : > { %v1187_v0 = vpop.permute.xlu1 %1186 }
 0x265   : > { %v1209_v28 = vsel %vm593_vm0, %v1187_v0, 0 }
 0x267   : > { %v4424_v6 = vpop.eup %3676 }
 0x268   : > { %v1175_v45 = vpop.permute.xlu1 %1174 }
 0x26a   : > { %3436 = vmatpush3.bf16.xpose.msra.mxu1 %v1206_v4 }
 0x26b   : > { %v4426_v7 = vpop.eup %3678  ;;  %3535 = vmatprep.subr.msk.bf16.mxu1 %vm593_vm0, %v1187_v0 }
 0x26c   : > { %v4429_v10 = vpop.eup %3680  ;;  %v1047_v12 = vpack.c.bf16 %v4426_v7, %v4422_v5  ;;  %v1179_v57 = vpop.permute.xlu1 %1178 }
 0x26d   : > { %v1048_v18 = vpack.c.bf16 %v4424_v6, %v4429_v10 }
 0x26e   : > { %3429 = vmatprep.mubr.msk.bf16.mxu1 %vm811_vm2, %v1047_v12 }
 0x26f   : > { %3430 = vmatmul.mubr.msk.bf16.gmra.mrb[4].mxu1 %vm811_vm2, %v1048_v18 }
 0x270   : > { %3441 = vmatprep.mubr.msk.bf16.mxu1 %vm593_vm0, %v1175_v45 }
 0x272   : > { %3438 = vmatpush3.bf16.xpose.msra.mxu1 %v1209_v28 }
 0x273   : > { %3536 = vmatprep.subr.msk.bf16.mxu1 %vm593_vm0, %v1189_v51 }
 0x27a   : > { %3440 = vmatpush3.bf16.xpose.msra.mxu1 %v1212_v39 }
 0x281   : > { %3442 = vmatmul.mubr.msk.bf16.vlgmr.msra.gmra.mrb[8].mxu1 %vm593_vm0, %v1177_v49 }
 0x282   : > { %3445 = vmatprep.mubr.msk.bf16.mxu1 %vm593_vm0, %v1179_v57 }
 0x289   : > { %3446 = vmatmul.mubr.msk.bf16.gmra.mrb[12].mxu1 %vm593_vm0, %v1181_v58 }
 0x331   : > { %v4444_v59 = vpop.f32.mrb[0].mxu1 }
 0x332   : > { %5515 = vst [vmem:[#allocation8_spill] sm:$0xff] %v4444_v59  ;;  %v4446_v62 = vpop.f32.mrb[1].mxu1 }
 0x333   : > { %5516 = vst [vmem:[#allocation9_spill] sm:$0xff] %v4446_v62  ;;  %v4448_v60 = vpop.f32.mrb[2].mxu1 }
 0x334   : > { %5517 = vst [vmem:[#allocation10_spill] sm:$0xff] %v4448_v60  ;;  %v4450_v61 = vpop.f32.mrb[3].mxu1 }
 0x335   : > { %5518 = vst [vmem:[#allocation11_spill] sm:$0xff] %v4450_v61  ;;  %v4551_v61 = vld [vmem:[#allocation2 + $0x78] sm:$0xff] }
 0x336   : > { %5527 = vst [vmem:[#allocation20_spill] sm:$0xff] %v4551_v61 }
 0x342   : > { %v4452_v3 = vpop.f32.mrb[4].mxu1 }
 0x343   : > { %5519 = vst [vmem:[#allocation12_spill] sm:$0xff] %v4452_v3  ;;  %v4454_v63 = vpop.f32.mrb[5].mxu1 }
 0x344   : > { %5520 = vst [vmem:[#allocation13_spill] sm:$0xff] %v4454_v63  ;;  %v4456_v1 = vpop.f32.mrb[6].mxu1  ;;  %v4534_v63 = vld [vmem:[#allocation2 + $0x68] sm:$0xff] }
 0x345   : > { %5521 = vst [vmem:[#allocation14_spill] sm:$0xff] %v4456_v1  ;;  %v4458_v2 = vpop.f32.mrb[7].mxu1  ;;  %5525 = vst [vmem:[#allocation18_spill] sm:$0xff] %v4534_v63 }
 0x346   : > { %5522 = vst [vmem:[#allocation15_spill] sm:$0xff] %v4458_v2  ;;  %v4553_v2 = vld [vmem:[#allocation2 + $0x70] sm:$0xff] }
 0x347   : > { %5528 = vst [vmem:[#allocation21_spill] sm:$0xff] %v4553_v2 }
 0x354   : > { %v3443_v4 = vpop.f32.mrb[8].mxu1 }
 0x355   : > { %v1248_v0 = vpop.f32.mrb[9].mxu1  ;;  %v1281_v51 = vmul.f32 0.17677669, %v3443_v4 }
 0x356   : > { %v1279_v12 = vmul.f32 0.17677669, %v1248_v0  ;;  %v3444_v18 = vpop.f32.mrb[10].mxu1 }
 0x357   : > { %v1282_v45 = vmul.f32 0.17677669, %v3444_v18  ;;  %v1251_v28 = vpop.f32.mrb[11].mxu1  ;;  %v4474_v18 = vadd.f32 %v4107_v38, %v1281_v51 }
 0x358   : > { %v1280_v39 = vmul.f32 0.17677669, %v1251_v28  ;;  %v4461_v49 = vadd.f32 %v4107_v38, %v1279_v12 }
 0x359   : > { %v4469_v55 = vadd.f32 %v4107_v38, %v1282_v45 }
 0x35a   : > { %v1304_v57 = vsel %vm811_vm2, %v4461_v49, -inf  ;;  %v4466_v58 = vadd.f32 %v4107_v38, %v1280_v39 }
 0x35b   : > { %1305 = vmax.xlane.f32.xlu1 %v1304_v57  ;;  %v1313_v28 = vsel %vm811_vm2, %v4469_v55, -inf  ;;  %v1310_v57 = vsel %vm811_vm2, %v4474_v18, -inf }
 0x35c   : > { %v1307_v0 = vsel %vm811_vm2, %v4466_v58, -inf  ;;  %v3447_v4 = vpop.f32.mrb[12].mxu1 }
 0x35d   : > { %1308 = vmax.xlane.f32.xlu0 %v1307_v0  ;;  %v1264_v12 = vpop.f32.mrb[13].mxu1  ;;  %v1285_v46 = vmul.f32 0.17677669, %v3447_v4 }
 0x35e   : > { %v1283_v22 = vmul.f32 0.17677669, %v1264_v12  ;;  %v3448_v39 = vpop.f32.mrb[14].mxu1 }
 0x35f   : > { %1314 = vmax.xlane.f32.xlu1 %v1313_v28  ;;  %v1286_v52 = vmul.f32 0.17677669, %v3448_v39  ;;  %v1267_v45 = vpop.f32.mrb[15].mxu1  ;;  %v4492_v12 = vadd.f32 %v4107_v38, %v1285_v46  ;;  %v4500_v39 = vld [vmem:[#allocation2 + $0x40] sm:$0xff] }
 0x360   : > { %v1284_v17 = vmul.f32 0.17677669, %v1267_v45  ;;  %v4481_v40 = vadd.f32 %v4107_v38, %v1283_v22  ;;  %v4502_v45 = vld [vmem:[#allocation2 + $0x48] sm:$0xff] }
 0x361   : > { %1311 = vmax.xlane.f32.xlu0 %v1310_v57  ;;  %v4489_v4 = vadd.f32 %v4107_v38, %v1286_v52 }
 0x362   : > { %v4484_v51 = vadd.f32 %v4107_v38, %v1284_v17  ;;  %v1316_v0 = vsel %vm811_vm2, %v4481_v40, -inf  ;;  %v1322_v17 = vsel %vm811_vm2, %v4492_v12, -inf }
 0x363   : > { %v1325_v22 = vsel %vm811_vm2, %v4489_v4, -inf }
 0x364   : > { %v1319_v28 = vsel %vm811_vm2, %v4484_v51, -inf }
 0x365   : > { %1320 = vmax.xlane.f32.xlu1 %v1319_v28  ;;  %1317 = vmax.xlane.f32.xlu0 %v1316_v0 }
 0x369   : > { %1326 = vmax.xlane.f32.xlu1 %v1325_v22  ;;  %1323 = vmax.xlane.f32.xlu0 %v1322_v17  ;;  %v4517_v17 = vld [vmem:[#allocation2 + $0x50] sm:$0xff] }
 0x3e8   : > { %v1306_v52 = vpop.xlane.xlu1 %1305 }
 0x3e9   : > { %v4505_v46 = vmax.f32 %v4500_v39, %v1306_v52  ;;  %v4536_v52 = vld [vmem:[#allocation2 + $0x60] sm:$0xff] }
 0x3ea   : > { %v1309_v57 = vpop.xlane.xlu0 %1308 }
 0x3eb   : > { %1647 = vst.msk [vmem:[#allocation2 + $0x40] sm:$0xff] %vm528_vm1, %v4505_v46  ;;  %v4514_v28 = vmax.f32 %v4502_v45, %v1309_v57  ;;  %1362 = vperm.xlu0 %3592, %v4505_v46  }
 0x3ec   : > { %v1315_v22 = vpop.xlane.xlu1 %1314 }
 0x3ed   : > { %1648 = vst.msk [vmem:[#allocation2 + $0x48] sm:$0xff] %vm528_vm1, %v4514_v28  ;;  %v4524_v26 = vmax.f32 %v4507_v15, %v1315_v22 }
 0x3ee   : > { %v1312_v0 = vpop.xlane.xlu0 %1311 }
 0x3ef   : > { %5524 = vst [vmem:[#allocation17_spill] sm:$0xff] %v4524_v26  ;;  %1650 = vst.msk [vmem:[#allocation2 + $0x58] sm:$0xff] %vm528_vm1, %v4524_v26  ;;  %v4531_v57 = vmax.f32 %v4517_v17, %v1312_v0  ;;  %1377 = vperm.xlu0 %3592, %v4524_v26  }
 0x3f1   : > { %1649 = vst.msk [vmem:[#allocation2 + $0x50] sm:$0xff] %vm528_vm1, %v4531_v57  ;;  %1372 = vperm.xlu1 %3593, %v4531_v57  }
 0x3f2   : > { %v1321_v3 = vpop.xlane.xlu1 %1320  ;;  %v1318_v59 = vpop.xlane.xlu0 %1317 }
 0x3f3   : > { %1544 = vrot.lane.b32.xlu0 %v4347_v44, %s3914_s7  ;;  %v4546_v0 = vmax.f32 %v4534_v63, %v1321_v3  ;;  %v4549_v1 = vmax.f32 %v4536_v52, %v1318_v59 }
 0x3f5   : > { %5526 = vst [vmem:[#allocation19_spill] sm:$0xff] %v4546_v0  ;;  %1367 = vperm.xlu1 %3593, %v4514_v28   ;;  %1652 = vst.msk [vmem:[#allocation2 + $0x68] sm:$0xff] %vm528_vm1, %v4546_v0 }
 0x3f6   : > { %1651 = vst.msk [vmem:[#allocation2 + $0x60] sm:$0xff] %vm528_vm1, %v4549_v1  ;;  %v1327_v59 = vpop.xlane.xlu1 %1326  ;;  %v1324_v3 = vpop.xlane.xlu0 %1323 }
 0x3f7   : > { %1548 = vrot.lane.b32.xlu0 %v4381_v56, %s3914_s7  ;;  %v4567_v62 = vmax.f32 %v4551_v61, %v1327_v59  ;;  %v4570_v26 = vmax.f32 %v4553_v2, %v1324_v3  ;;  %v4761_v2 = vld [vmem:[#allocation2 + $0xb0] sm:$0xff] }
 0x3f9   : > { %5529 = vst [vmem:[#allocation22_spill] sm:$0xff] %v4567_v62  ;;  %5530 = vst [vmem:[#allocation23_spill] sm:$0xff] %v4570_v26  ;;  %1542 = vrot.lane.b32.xlu1 %v4331_v37, %s3914_s7 }
 0x3fa   : > { %1654 = vst.msk [vmem:[#allocation2 + $0x78] sm:$0xff] %vm528_vm1, %v4567_v62  ;;  %1653 = vst.msk [vmem:[#allocation2 + $0x70] sm:$0xff] %vm528_vm1, %v4570_v26 }
 0x3fb   : > { %1387 = vperm.xlu0 %3592, %v4546_v0  }
 0x3fd   : > { %1546 = vrot.lane.b32.xlu1 %v4369_v54, %s3914_s7 }
 0x3ff   : > { %1397 = vperm.xlu0 %3592, %v4567_v62  }
 0x401   : > { %1392 = vperm.xlu1 %3593, %v4570_v26  }
 0x403   : > { %1665 = vrot.lane.b32.xlu0 %v4017_v25, %s3915_s9 }
 0x405   : > { %1382 = vperm.xlu1 %3593, %v4549_v1  }
 0x407   : > { %1669 = vrot.lane.b32.xlu0 %v4043_v31, %s3915_s9 }
 0x409   : > { %1663 = vrot.lane.b32.xlu1 %v4014_v24, %s3915_s9 }
 0x40b   : > { %1657 = vrot.lane.b32.xlu0 %v4050_v33, %s3915_s9 }
 0x40d   : > { %1667 = vrot.lane.b32.xlu1 %v4036_v29, %s3915_s9 }
 0x40f   : > { %1661 = vrot.lane.b32.xlu0 %v4060_v35, %s3915_s9 }
 0x411   : > { %1655 = vrot.lane.b32.xlu1 %v4029_v27, %s3915_s9 }
 0x415   : > { %1659 = vrot.lane.b32.xlu1 %v4053_v34, %s3915_s9 }
 0x46a   : > { %v1363_v25 = vpop.permute.xlu0 %1362 }
 0x46b   : > { %v1400_v59 = vsub.f32 %v4461_v49, %v1363_v25 }
 0x46d   : > { %v1408_v22 = vmul.f32 1.442695, %v1400_v59 }
 0x46e   : > { %v1378_v31 = vpop.permute.xlu0 %1377 }
 0x46f   : > { %v1403_v29 = vsub.f32 %v4469_v55, %v1378_v31  ;;  %3682 = vpow2.f32 %v1408_v22 }
 0x470   : > { %v1373_v24 = vpop.permute.xlu1 %1372 }
 0x471   : > { %v1402_v3 = vsub.f32 %v4474_v18, %v1373_v24  ;;  %v1414_v0 = vmul.f32 1.442695, %v1403_v29 }
 0x472   : > { %v1545_v33 = vpop.permute.xlu0 %1544 }
 0x473   : > { %v1412_v62 = vmul.f32 1.442695, %v1402_v3 }
 0x474   : > { %v1368_v60 = vpop.permute.xlu1 %1367 }
 0x475   : > { %v1401_v35 = vsub.f32 %v4466_v58, %v1368_v60 }
 0x476   : > { %v1549_v61 = vpop.permute.xlu0 %1548 }
 0x477   : > { %v1410_v27 = vmul.f32 1.442695, %v1401_v35 }
 0x478   : > { %v1543_v34 = vpop.permute.xlu1 %1542 }
 0x479   : > { %3684 = vpow2.f32 %v1410_v27  ;;  %3449 = vmatprep.subr.bf16.mxu0 %v1543_v34  ;;  %v4610_v31 = vpop.eup %3682 }
 0x47a   : > { %3686 = vpow2.f32 %v1412_v62  ;;  %v1388_v49 = vpop.permute.xlu0 %1387  ;;  %3450 = vmatpush3.bf16.msra.mxu0 %v1543_v34 }
 0x47b   : > { %3451 = vmatprep.subr.bf16.mxu0 %v1545_v33  ;;  %3688 = vpow2.f32 %v1414_v0  ;;  %v1405_v55 = vsub.f32 %v4484_v51, %v1388_v49 }
 0x47c   : > { %v1547_v18 = vpop.permute.xlu1 %1546 }
 0x47d   : > { %v1418_v62 = vmul.f32 1.442695, %v1405_v55 }
 0x47e   : > { %3452 = vmatpush3.bf16.msra.mxu0 %v1545_v33  ;;  %v1398_v25 = vpop.permute.xlu0 %1397 }
 0x47f   : > { %3453 = vmatprep.subr.bf16.mxu0 %v1547_v18  ;;  %v1407_v22 = vsub.f32 %v4489_v4, %v1398_v25  ;;  %3690 = vpow2.f32 %v1418_v62 }
 0x480   : > { %v1393_v60 = vpop.permute.xlu1 %1392 }
 0x481   : > { %v1406_v58 = vsub.f32 %v4492_v12, %v1393_v60  ;;  %v1422_v12 = vmul.f32 1.442695, %v1407_v22 }
 0x482   : > { %3454 = vmatpush3.bf16.msra.mxu0 %v1547_v18  ;;  %v1666_v34 = vpop.permute.xlu0 %1665 }
 0x483   : > { %v4613_v59 = vpop.eup %3684  ;;  %3455 = vmatprep.subr.bf16.mxu0 %v1549_v61  ;;  %v1420_v0 = vmul.f32 1.442695, %v1406_v58  ;;  %v1687_v22 = vsel %vm593_vm0, %v1666_v34, 0 }
 0x484   : > { %v4615_v24 = vpop.eup %3686  ;;  %v1383_v3 = vpop.permute.xlu1 %1382  ;;  %v1538_v51 = vpack.c.bf16 %v4613_v59, %v4610_v31 }
 0x485   : > { %v1404_v33 = vsub.f32 %v4481_v40, %v1383_v3  ;;  %v4620_v29 = vpop.eup %3688  ;;  %3692 = vpow2.f32 %v1420_v0 }
 0x486   : > { %3456 = vmatpush3.bf16.msra.mxu0 %v1549_v61  ;;  %3457 = vmatprep.mubr.msk.bf16.mxu0 %vm811_vm2, %v1538_v51  ;;  %v1539_v4 = vpack.c.bf16 %v4620_v29, %v4615_v24  ;;  %v1670_v3 = vpop.permute.xlu0 %1669 }
 0x487   : > { %v1416_v35 = vmul.f32 1.442695, %v1404_v33  ;;  %v1693_v51 = vsel %vm593_vm0, %v1670_v3, 0 }
 0x488   : > { %v1664_v27 = vpop.permute.xlu1 %1663 }
 0x489   : > { %3694 = vpow2.f32 %v1416_v35  ;;  %3458 = vmatmul.mubr.msk.bf16.vlgmr.msra.gmra.mrb[8].mxu0 %vm811_vm2, %v1539_v4  ;;  %3537 = vmatprep.subr.msk.bf16.mxu0 %vm593_vm0, %v1664_v27  ;;  %v1684_v40 = vsel %vm593_vm0, %v1664_v27, 0  ;;  %v4629_v61 = vpop.eup %3690 }
 0x48a   : > { %3696 = vpow2.f32 %v1422_v12  ;;  %v1658_v33 = vpop.permute.xlu0 %1657 }
 0x48c   : > { %v1668_v49 = vpop.permute.xlu1 %1667 }
 0x48d   : > { %v1690_v0 = vsel %vm593_vm0, %v1668_v49, 0 }
 0x48e   : > { %v1662_v4 = vpop.permute.xlu0 %1661 }
 0x48f   : > { %3466 = vmatpush3.bf16.xpose.msra.mxu0 %v1684_v40  ;;  %v4631_v18 = vpop.eup %3692 }
 0x490   : > { %3538 = vmatprep.subr.msk.bf16.mxu0 %vm593_vm0, %v1666_v34  ;;  %v1656_v62 = vpop.permute.xlu1 %1655 }
 0x493   : > { %v4633_v55 = vpop.eup %3694 }
 0x494   : > { %v4635_v25 = vpop.eup %3696  ;;  %v1540_v60 = vpack.c.bf16 %v4629_v61, %v4633_v55  ;;  %v1660_v12 = vpop.permute.xlu1 %1659 }
 0x495   : > { %v1541_v58 = vpack.c.bf16 %v4635_v25, %v4631_v18 }
 0x496   : > { %3461 = vmatprep.mubr.msk.bf16.mxu0 %vm811_vm2, %v1540_v60 }
 0x497   : > { %3462 = vmatmul.mubr.msk.bf16.gmra.mrb[12].mxu0 %vm811_vm2, %v1541_v58 }
 0x498   : > { %3468 = vmatpush3.bf16.xpose.msra.mxu0 %v1687_v22  ;;  %3473 = vmatprep.mubr.msk.bf16.mxu0 %vm593_vm0, %v1656_v62 }
 0x499   : > { %3539 = vmatprep.subr.msk.bf16.mxu0 %vm593_vm0, %v1668_v49 }
 0x4a0   : > { %3470 = vmatpush3.bf16.xpose.msra.mxu0 %v1690_v0 }
 0x4a1   : > { %3540 = vmatprep.subr.msk.bf16.mxu0 %vm593_vm0, %v1670_v3 }
 0x4a8   : > { %3472 = vmatpush3.bf16.xpose.msra.mxu0 %v1693_v51 }
 0x4af   : > { %3474 = vmatmul.mubr.msk.bf16.vlgmr.msra.gmra.mrb[16].mxu0 %vm593_vm0, %v1658_v33 }
 0x4b0   : > { %3477 = vmatprep.mubr.msk.bf16.mxu0 %vm593_vm0, %v1660_v12 }
 0x4b7   : > { %3478 = vmatmul.mubr.msk.bf16.gmra.mrb[20].mxu0 %vm593_vm0, %v1662_v4 }
 0x55c   : > { %v4652_v35 = vpop.f32.mrb[8].mxu0 }
 0x55d   : > { %5531 = vst [vmem:[#allocation24_spill] sm:$0xff] %v4652_v35  ;;  %v4654_v27 = vpop.f32.mrb[9].mxu0 }
 0x55e   : > { %5532 = vst [vmem:[#allocation25_spill] sm:$0xff] %v4654_v27  ;;  %v4656_v40 = vpop.f32.mrb[10].mxu0 }
 0x55f   : > { %5533 = vst [vmem:[#allocation26_spill] sm:$0xff] %v4656_v40  ;;  %v4658_v34 = vpop.f32.mrb[11].mxu0 }
 0x560   : > { %5534 = vst [vmem:[#allocation27_spill] sm:$0xff] %v4658_v34 }
 0x56a   : > { %v4660_v49 = vpop.f32.mrb[12].mxu0 }
 0x56b   : > { %5535 = vst [vmem:[#allocation28_spill] sm:$0xff] %v4660_v49  ;;  %v4662_v60 = vpop.f32.mrb[13].mxu0 }
 0x56c   : > { %5536 = vst [vmem:[#allocation29_spill] sm:$0xff] %v4662_v60  ;;  %v4664_v58 = vpop.f32.mrb[14].mxu0 }
 0x56d   : > { %5537 = vst [vmem:[#allocation30_spill] sm:$0xff] %v4664_v58  ;;  %v4666_v22 = vpop.f32.mrb[15].mxu0 }
 0x56e   : > { %5538 = vst [vmem:[#allocation31_spill] sm:$0xff] %v4666_v22 }
 0x582   : > { %v3475_v62 = vpop.f32.mrb[16].mxu0 }
 0x583   : > { %v1729_v0 = vpop.f32.mrb[17].mxu0  ;;  %v1762_v4 = vmul.f32 0.17677669, %v3475_v62 }
 0x584   : > { %v1760_v3 = vmul.f32 0.17677669, %v1729_v0  ;;  %v3476_v51 = vpop.f32.mrb[18].mxu0 }
 0x585   : > { %v1763_v33 = vmul.f32 0.17677669, %v3476_v51  ;;  %v1732_v12 = vpop.f32.mrb[19].mxu0  ;;  %v4682_v51 = vadd.f32 %v4107_v38, %v1762_v4 }
 0x586   : > { %v1761_v35 = vmul.f32 0.17677669, %v1732_v12  ;;  %v4669_v40 = vadd.f32 %v4107_v38, %v1760_v3 }
 0x587   : > { %v4677_v58 = vadd.f32 %v4107_v38, %v1763_v33 }
 0x588   : > { %v1785_v49 = vsel %vm811_vm2, %v4669_v40, -inf  ;;  %v4674_v34 = vadd.f32 %v4107_v38, %v1761_v35 }
 0x589   : > { %1786 = vmax.xlane.f32.xlu1 %v1785_v49  ;;  %v1794_v12 = vsel %vm811_vm2, %v4677_v58, -inf  ;;  %v1791_v49 = vsel %vm811_vm2, %v4682_v51, -inf }
 0x58a   : > { %v1788_v0 = vsel %vm811_vm2, %v4674_v34, -inf  ;;  %v3479_v62 = vpop.f32.mrb[20].mxu0 }
 0x58b   : > { %1789 = vmax.xlane.f32.xlu0 %v1788_v0  ;;  %v1745_v3 = vpop.f32.mrb[21].mxu0  ;;  %v1766_v22 = vmul.f32 0.17677669, %v3479_v62 }
 0x58c   : > { %v1764_v60 = vmul.f32 0.17677669, %v1745_v3  ;;  %v3480_v35 = vpop.f32.mrb[22].mxu0 }
 0x58d   : > { %1795 = vmax.xlane.f32.xlu1 %v1794_v12  ;;  %v1767_v27 = vmul.f32 0.17677669, %v3480_v35  ;;  %v1748_v33 = vpop.f32.mrb[23].mxu0  ;;  %v4700_v3 = vadd.f32 %v4107_v38, %v1766_v22  ;;  %v4708_v35 = vld [vmem:[#allocation2 + $0x80] sm:$0xff] }
 0x58e   : > { %v1765_v63 = vmul.f32 0.17677669, %v1748_v33  ;;  %v4689_v15 = vadd.f32 %v4107_v38, %v1764_v60  ;;  %5539 = vst [vmem:[#allocation32_spill] sm:$0xff] %v4708_v35  ;;  %v4710_v33 = vld [vmem:[#allocation2 + $0x88] sm:$0xff] }
 0x58f   : > { %1792 = vmax.xlane.f32.xlu0 %v1791_v49  ;;  %v4697_v62 = vadd.f32 %v4107_v38, %v1767_v27  ;;  %5540 = vst [vmem:[#allocation33_spill] sm:$0xff] %v4710_v33  ;;  %v4715_v49 = vld [vmem:[#allocation2 + $0x98] sm:$0xff] }
 0x590   : > { %v4692_v4 = vadd.f32 %v4107_v38, %v1765_v63  ;;  %v1797_v0 = vsel %vm811_vm2, %v4689_v15, -inf  ;;  %v1803_v63 = vsel %vm811_vm2, %v4700_v3, -inf  ;;  %5542 = vst [vmem:[#allocation35_spill] sm:$0xff] %v4715_v49 }
 0x591   : > { %v1806_v60 = vsel %vm811_vm2, %v4697_v62, -inf }
 0x592   : > { %v1800_v12 = vsel %vm811_vm2, %v4692_v4, -inf }
 0x593   : > { %1801 = vmax.xlane.f32.xlu1 %v1800_v12  ;;  %1798 = vmax.xlane.f32.xlu0 %v1797_v0 }
 0x597   : > { %1807 = vmax.xlane.f32.xlu1 %v1806_v60  ;;  %1804 = vmax.xlane.f32.xlu0 %v1803_v63  ;;  %v4725_v63 = vld [vmem:[#allocation2 + $0x90] sm:$0xff] }
 0x616   : > { %v1787_v27 = vpop.xlane.xlu1 %1786 }
 0x617   : > { %v4713_v38 = vmax.f32 %v4708_v35, %v1787_v27  ;;  %v4744_v27 = vld [vmem:[#allocation2 + $0xa0] sm:$0xff] }
 0x618   : > { %v1790_v22 = vpop.xlane.xlu0 %1789 }
 0x619   : > { %5541 = vst [vmem:[#allocation34_spill] sm:$0xff] %v4713_v38  ;;  %2128 = vst.msk [vmem:[#allocation2 + $0x80] sm:$0xff] %vm528_vm1, %v4713_v38  ;;  %v4722_v12 = vmax.f32 %v4710_v33, %v1790_v22  ;;  %1843 = vperm.xlu0 %3592, %v4713_v38   ;;  %v4742_v38 = vld [vmem:[#allocation2 + $0xa8] sm:$0xff]  ;;  %v4759_v33 = vld [vmem:[#allocation2 + $0xb8] sm:$0xff] }
 0x61a   : > { %v1796_v60 = vpop.xlane.xlu1 %1795 }
 0x61b   : > { %5543 = vst [vmem:[#allocation36_spill] sm:$0xff] %v4722_v12  ;;  %2129 = vst.msk [vmem:[#allocation2 + $0x88] sm:$0xff] %vm528_vm1, %v4722_v12  ;;  %v4732_v26 = vmax.f32 %v4715_v49, %v1796_v60 }
 0x61c   : > { %v1793_v0 = vpop.xlane.xlu0 %1792 }
 0x61d   : > { %5544 = vst [vmem:[#allocation37_spill] sm:$0xff] %v4732_v26  ;;  %2131 = vst.msk [vmem:[#allocation2 + $0x98] sm:$0xff] %vm528_vm1, %v4732_v26  ;;  %v4739_v22 = vmax.f32 %v4725_v63, %v1793_v0  ;;  %1858 = vperm.xlu0 %3592, %v4732_v26  }
 0x61f   : > { %2130 = vst.msk [vmem:[#allocation2 + $0x90] sm:$0xff] %vm528_vm1, %v4739_v22  ;;  %1853 = vperm.xlu1 %3593, %v4739_v22  }
 0x620   : > { %v1802_v35 = vpop.xlane.xlu1 %1801  ;;  %v1799_v49 = vpop.xlane.xlu0 %1798 }
 0x621   : > { %2025 = vrot.lane.b32.xlu0 %v4347_v44, %s3915_s9  ;;  %v4754_v0 = vmax.f32 %v4742_v38, %v1802_v35  ;;  %v4757_v26 = vmax.f32 %v4744_v27, %v1799_v49  ;;  %v3863_v44 = vld [vmem:[%s4026_s15 + $0x18] sm:$0xff]  }
 0x623   : > { %1848 = vperm.xlu1 %3593, %v4722_v12   ;;  %2133 = vst.msk [vmem:[#allocation2 + $0xa8] sm:$0xff] %vm528_vm1, %v4754_v0  ;;  %2132 = vst.msk [vmem:[#allocation2 + $0xa0] sm:$0xff] %vm528_vm1, %v4757_v26 }
 0x624   : > { %v1808_v35 = vpop.xlane.xlu1 %1807  ;;  %v1805_v49 = vpop.xlane.xlu0 %1804 }
 0x625   : > { %2029 = vrot.lane.b32.xlu0 %v4381_v56, %s3915_s9  ;;  %v4775_v12 = vmax.f32 %v4759_v33, %v1808_v35  ;;  %v4778_v60 = vmax.f32 %v4761_v2, %v1805_v49  ;;  %v3859_v35 = vld [vmem:[%s4011_s29 + $0x18] sm:$0xff]   ;;  %v3860_v49 = vld [vmem:[%s4011_s29] sm:$0xff]   ;;  %v3861_v56 = vld [vmem:[%s4026_s15 + $0x8] sm:$0xff]  }
 0x627   : > { %5545 = vst [vmem:[#allocation38_spill] sm:$0xff] %v4778_v60  ;;  %2023 = vrot.lane.b32.xlu1 %v4331_v37, %s3915_s9  ;;  %2135 = vst.msk [vmem:[#allocation2 + $0xb8] sm:$0xff] %vm528_vm1, %v4775_v12  ;;  %v3858_v37 = vld [vmem:[%s4011_s29 + $0x8] sm:$0xff]  }
 0x628   : > { %2134 = vst.msk [vmem:[#allocation2 + $0xb0] sm:$0xff] %vm528_vm1, %v4778_v60 }
 0x629   : > { %1868 = vperm.xlu0 %3592, %v4754_v0  }
 0x62b   : > { %2027 = vrot.lane.b32.xlu1 %v4369_v54, %s3915_s9  ;;  %v3862_v54 = vld [vmem:[%s4011_s29 + $0x10] sm:$0xff]  }
 0x62d   : > { %1878 = vperm.xlu0 %3592, %v4775_v12  }
 0x62f   : > { %1873 = vperm.xlu1 %3593, %v4778_v60   ;;  %v3864_v60 = vld [vmem:[%s4026_s15] sm:$0xff]  }
 0x631   : > { %2146 = vrot.lane.b32.xlu0 %v3858_v37, %s3916_s10  ;;  %v3865_v37 = vld [vmem:[%s4026_s15 + $0x10] sm:$0xff]  }
 0x633   : > { %1863 = vperm.xlu1 %3593, %v4757_v26  }
 0x635   : > { %2150 = vrot.lane.b32.xlu0 %v3859_v35, %s3916_s10  ;;  %v951_v35 = vsel %vm811_vm2, %v4402_v47, 0.0  ;;  %v957_v47 = vsel %vm811_vm2, %v4412_v50, 0.0  ;;  %v1453_v50 = vsel %vm811_vm2, %v4633_v55, 0.0  ;;  %v1462_v55 = vsel %vm811_vm2, %v4635_v25, 0.0 }
 0x637   : > { %2144 = vrot.lane.b32.xlu1 %v3860_v49, %s3916_s10  ;;  %v954_v49 = vsel %vm811_vm2, %v4408_v42, 0.0  ;;  %v1444_v42 = vsel %vm811_vm2, %v4613_v59, 0.0  ;;  %v1441_v59 = vsel %vm811_vm2, %v4610_v31, 0.0 }
 0x639   : > { %2138 = vrot.lane.b32.xlu0 %v3861_v56, %s3916_s10  ;;  %v960_v56 = vsel %vm811_vm2, %v4422_v5, 0.0  ;;  %v963_v5 = vsel %vm811_vm2, %v4426_v7, 0.0  ;;  %v1459_v7 = vsel %vm811_vm2, %v4631_v18, 0.0 }
 0x63b   : > { %2148 = vrot.lane.b32.xlu1 %v3862_v54, %s3916_s10 }
 0x63d   : > { %2142 = vrot.lane.b32.xlu0 %v3863_v44, %s3916_s10  ;;  %v948_v44 = vsel %vm811_vm2, %v4400_v20, 0.0  ;;  %v1447_v20 = vsel %vm811_vm2, %v4615_v24, 0.0  ;;  %v1450_v24 = vsel %vm811_vm2, %v4620_v29, 0.0 }
 0x63f   : > { %2136 = vrot.lane.b32.xlu1 %v3864_v60, %s3916_s10  ;;  %v966_v60 = vsel %vm811_vm2, %v4429_v10, 0.0  ;;  %v969_v10 = vsel %vm811_vm2, %v4424_v6, 0.0  ;;  %v1456_v6 = vsel %vm811_vm2, %v4629_v61, 0.0 }
 0x643   : > { %2140 = vrot.lane.b32.xlu1 %v3865_v37, %s3916_s10 }
 0x65c   : > { %952 = vadd.xlane.f32.xlu0 %v951_v35 }
 0x660   : > { %955 = vadd.xlane.f32.xlu0 %v954_v49 }
 0x664   : > { %961 = vadd.xlane.f32.xlu0 %v960_v56 }
 0x667   : > { %949 = vadd.xlane.f32.xlu1 %v948_v44 }
 0x668   : > { %967 = vadd.xlane.f32.xlu0 %v966_v60 }
 0x66b   : > { %958 = vadd.xlane.f32.xlu1 %v957_v47 }
 0x66c   : > { %1445 = vadd.xlane.f32.xlu0 %v1444_v42 }
 0x66f   : > { %964 = vadd.xlane.f32.xlu1 %v963_v5 }
 0x670   : > { %1448 = vadd.xlane.f32.xlu0 %v1447_v20 }
 0x673   : > { %970 = vadd.xlane.f32.xlu1 %v969_v10 }
 0x674   : > { %1454 = vadd.xlane.f32.xlu0 %v1453_v50 }
 0x677   : > { %1442 = vadd.xlane.f32.xlu1 %v1441_v59 }
 0x678   : > { %1460 = vadd.xlane.f32.xlu0 %v1459_v7 }
 0x67b   : > { %1451 = vadd.xlane.f32.xlu1 %v1450_v24 }
 0x67f   : > { %1457 = vadd.xlane.f32.xlu1 %v1456_v6 }
 0x683   : > { %1463 = vadd.xlane.f32.xlu1 %v1462_v55 }
 0x698   : > { %v1844_v54 = vpop.permute.xlu0 %1843 }
 0x699   : > { %v1881_v31 = vsub.f32 %v4669_v40, %v1844_v54 }
 0x69b   : > { %v1889_v56 = vmul.f32 1.442695, %v1881_v31 }
 0x69c   : > { %v1859_v37 = vpop.permute.xlu0 %1858 }
 0x69d   : > { %v1884_v29 = vsub.f32 %v4677_v58, %v1859_v37  ;;  %3698 = vpow2.f32 %v1889_v56 }
 0x69e   : > { %v1854_v35 = vpop.permute.xlu1 %1853 }
 0x69f   : > { %v1883_v18 = vsub.f32 %v4682_v51, %v1854_v35  ;;  %v1895_v25 = vmul.f32 1.442695, %v1884_v29 }
 0x6a0   : > { %v2026_v49 = vpop.permute.xlu0 %2025 }
 0x6a1   : > { %v1893_v61 = vmul.f32 1.442695, %v1883_v18 }
 0x6a2   : > { %v1849_v44 = vpop.permute.xlu1 %1848 }
 0x6a3   : > { %v1882_v60 = vsub.f32 %v4674_v34, %v1849_v44 }
 0x6a4   : > { %v2030_v47 = vpop.permute.xlu0 %2029 }
 0x6a5   : > { %v1891_v42 = vmul.f32 1.442695, %v1882_v60 }
 0x6a6   : > { %v2024_v5 = vpop.permute.xlu1 %2023 }
 0x6a7   : > { %3700 = vpow2.f32 %v1891_v42  ;;  %3481 = vmatprep.subr.bf16.mxu1 %v2024_v5  ;;  %v4850_v50 = vpop.eup %3698 }
 0x6a8   : > { %3702 = vpow2.f32 %v1893_v61  ;;  %v1869_v40 = vpop.permute.xlu0 %1868  ;;  %3482 = vmatpush3.bf16.msra.mxu1 %v2024_v5 }
 0x6a9   : > { %3483 = vmatprep.subr.bf16.mxu1 %v2026_v49  ;;  %3704 = vpow2.f32 %v1895_v25  ;;  %v1886_v58 = vsub.f32 %v4692_v4, %v1869_v40 }
 0x6aa   : > { %v2028_v51 = vpop.permute.xlu1 %2027 }
 0x6ab   : > { %v1899_v24 = vmul.f32 1.442695, %v1886_v58 }
 0x6ac   : > { %3484 = vmatpush3.bf16.msra.mxu1 %v2026_v49  ;;  %v1879_v20 = vpop.permute.xlu0 %1878 }
 0x6ad   : > { %3485 = vmatprep.subr.bf16.mxu1 %v2028_v51  ;;  %v1888_v59 = vsub.f32 %v4697_v62, %v1879_v20  ;;  %3706 = vpow2.f32 %v1899_v24  ;;  %v5546_v20 = vsub.f32 %v4294_v16, %v4305_v21  ;;  %v5549_v16 = vsub.f32 %v4279_v9, %v4285_v13 }
 0x6ae   : > { %v1874_v34 = vpop.permute.xlu1 %1873  ;;  %v5552_v9 = vsub.f32 %v4502_v45, %v4514_v28 }
 0x6af   : > { %v1887_v10 = vsub.f32 %v4700_v3, %v1874_v34  ;;  %v1903_v3 = vmul.f32 1.442695, %v1888_v59  ;;  %v854_v34 = vmul.f32 1.442695, %v5546_v20  ;;  %v5547_v59 = vsub.f32 %v4277_v8, %v4282_v11 }
 0x6b0   : > { %3486 = vmatpush3.bf16.msra.mxu1 %v2028_v51  ;;  %v2147_v49 = vpop.permute.xlu0 %2146  ;;  %v852_v21 = vmul.f32 1.442695, %v5549_v16  ;;  %v5550_v8 = vsub.f32 %v4328_v36, %v4354_v48  ;;  %v1346_v13 = vmul.f32 1.442695, %v5552_v9  ;;  %v934_v48 = vld [vmem:[#allocation3 + $0x10] sm:$0xff] }
 0x6b1   : > { %v4853_v7 = vpop.eup %3700  ;;  %3487 = vmatprep.subr.bf16.mxu1 %v2030_v47  ;;  %v1901_v55 = vmul.f32 1.442695, %v1887_v10  ;;  %v2168_v25 = vsel %vm593_vm0, %v2147_v49, 0  ;;  %v856_v24 = vmul.f32 1.442695, %v5547_v59 }
 0x6b2   : > { %v4855_v6 = vpop.eup %3702  ;;  %v1864_v54 = vpop.permute.xlu1 %1863  ;;  %v2019_v4 = vpack.c.bf16 %v4853_v7, %v4850_v50  ;;  %v864_v11 = vmul.f32 1.442695, %v5550_v8  ;;  %v1426_v8 = vld [vmem:[#allocation3 + $0x48] sm:$0xff] }
 0x6b3   : > { %v1885_v37 = vsub.f32 %v4689_v15, %v1864_v54  ;;  %v4860_v31 = vpop.eup %3704  ;;  %3708 = vpow2.f32 %v1901_v55  ;;  %v5548_v54 = vsub.f32 %v4311_v23, %v4326_v32  ;;  %v5551_v23 = vsub.f32 %v4287_v14, %v4302_v19 }
 0x6b4   : > { %3488 = vmatpush3.bf16.msra.mxu1 %v2030_v47  ;;  %3489 = vmatprep.mubr.msk.bf16.mxu1 %vm811_vm2, %v2019_v4  ;;  %v2020_v62 = vpack.c.bf16 %v4860_v31, %v4855_v6  ;;  %v2151_v51 = vpop.permute.xlu0 %2150  ;;  %v5554_v14 = vsub.f32 %v4517_v17, %v4531_v57 }
 0x6b5   : > { %v1897_v35 = vmul.f32 1.442695, %v1885_v37  ;;  %v2174_v58 = vsel %vm593_vm0, %v2151_v51, 0  ;;  %v860_v4 = vmul.f32 1.442695, %v5548_v54 }
 0x6b6   : > { %v2145_v18 = vpop.permute.xlu1 %2144  ;;  %v858_v32 = vmul.f32 1.442695, %v5551_v23  ;;  %v1348_v19 = vmul.f32 1.442695, %v5554_v14 }
 0x6b7   : > { %3710 = vpow2.f32 %v1897_v35  ;;  %3490 = vmatmul.mubr.msk.bf16.vlgmr.msra.gmra.mrb[16].mxu1 %vm811_vm2, %v2020_v62  ;;  %3541 = vmatprep.subr.msk.bf16.mxu1 %vm593_vm0, %v2145_v18  ;;  %v2165_v15 = vsel %vm593_vm0, %v2145_v18, 0  ;;  %v4869_v56 = vpop.eup %3706  ;;  %v933_v62 = vld [vmem:[#allocation3 + $0x8] sm:$0xff] }
 0x6b8   : > { %3712 = vpow2.f32 %v1903_v3  ;;  %v2139_v10 = vpop.permute.xlu0 %2138 }
 0x6b9   : > { %3714 = vpow2.f32 %v854_v34  ;;  %v938_v34 = vld [vmem:[#allocation3 + $0x30] sm:$0xff] }
 0x6ba   : > { %v2149_v29 = vpop.permute.xlu1 %2148  ;;  %3716 = vpow2.f32 %v856_v24 }
 0x6bb   : > { %v2171_v40 = vsel %vm593_vm0, %v2149_v29, 0  ;;  %3718 = vpow2.f32 %v860_v4 }
 0x6bc   : > { %v2143_v37 = vpop.permute.xlu0 %2142  ;;  %3720 = vpow2.f32 %v852_v21  ;;  %v935_v21 = vld [vmem:[#allocation3 + $0x18] sm:$0xff] }
 0x6bd   : > { %3498 = vmatpush3.bf16.xpose.msra.mxu1 %v2165_v15  ;;  %v4871_v44 = vpop.eup %3708  ;;  %3722 = vpow2.f32 %v864_v11  ;;  %v5553_v15 = vsub.f32 %v4320_v30, %v4338_v41  ;;  %v5561_v11 = vld [vmem:[#allocation16_spill] sm:$0xff] }
 0x6be   : > { %3542 = vmatprep.subr.msk.bf16.mxu1 %vm593_vm0, %v2147_v49  ;;  %v2137_v5 = vpop.permute.xlu1 %2136  ;;  %3724 = vpow2.f32 %v858_v32 }
 0x6bf   : > { %v862_v49 = vmul.f32 1.442695, %v5553_v15  ;;  %3726 = vpow2.f32 %v1346_v13  ;;  %v937_v15 = vld [vmem:[#allocation3 + $0x28] sm:$0xff] }
 0x6c1   : > { %v4873_v60 = vpop.eup %3710  ;;  %3728 = vpow2.f32 %v862_v49 }
 0x6c2   : > { %v4875_v61 = vpop.eup %3712  ;;  %v2021_v47 = vpack.c.bf16 %v4869_v56, %v4873_v60  ;;  %v2141_v55 = vpop.permute.xlu1 %2140  ;;  %3730 = vpow2.f32 %v1348_v19  ;;  %v1427_v19 = vld [vmem:[#allocation3 + $0x50] sm:$0xff] }
 0x6c3   : > { %v2022_v42 = vpack.c.bf16 %v4875_v61, %v4871_v44  ;;  %v4906_v3 = vpop.eup %3714 }
 0x6c4   : > { %3493 = vmatprep.mubr.msk.bf16.mxu1 %vm811_vm2, %v2021_v47  ;;  %v941_v35 = vmul.f32 %v4906_v3, %v933_v62  ;;  %v4916_v18 = vpop.eup %3716  ;;  %v5562_v62 = vld [vmem:[#allocation17_spill] sm:$0xff] }
 0x6c5   : > { %3494 = vmatmul.mubr.msk.bf16.gmra.mrb[20].mxu1 %vm811_vm2, %v2022_v42  ;;  %v942_v45 = vmul.f32 %v4916_v18, %v934_v48  ;;  %v4926_v28 = vpop.eup %3718  ;;  %v936_v42 = vld [vmem:[#allocation3 + $0x20] sm:$0xff]  ;;  %v5563_v23 = vsub.f32 %v5561_v11, %v5562_v62  ;;  %v1431_v62 = vld [vmem:[#allocation3 + $0x70] sm:$0xff] }
 0x6c6   : > { %3500 = vmatpush3.bf16.xpose.msra.mxu1 %v2168_v25  ;;  %3505 = vmatprep.mubr.msk.bf16.mxu1 %vm593_vm0, %v2137_v5  ;;  %v5555_v25 = vsub.f32 %v4343_v43, %v4363_v53  ;;  %v5556_v5 = vsub.f32 %v4536_v52, %v4549_v1  ;;  %v4934_v57 = vpop.eup %3720  ;;  %v5557_v43 = vsub.f32 %v4500_v39, %v4505_v46  ;;  %v5558_v1 = vld [vmem:[#allocation21_spill] sm:$0xff]  ;;  %v5559_v52 = vld [vmem:[#allocation23_spill] sm:$0xff] }
 0x6c7   : > { %3543 = vmatprep.subr.msk.bf16.mxu1 %vm593_vm0, %v2149_v29  ;;  %v5560_v59 = vsub.f32 %v5558_v1, %v5559_v52  ;;  %v1350_v32 = vmul.f32 1.442695, %v5563_v23  ;;  %v5568_v1 = vld [vmem:[#allocation22_spill] sm:$0xff] }
 0x6c8   : > { %v866_v30 = vmul.f32 1.442695, %v5555_v25  ;;  %v1352_v17 = vmul.f32 1.442695, %v5556_v5  ;;  %v1344_v53 = vmul.f32 1.442695, %v5557_v43 }
 0x6c9   : > { %v1356_v24 = vmul.f32 1.442695, %v5560_v59 }
 0x6ca   : > { %3732 = vpow2.f32 %v866_v30 }
 0x6cb   : > { %3734 = vpow2.f32 %v1352_v17 }
 0x6cc   : > { %3736 = vpow2.f32 %v1344_v53  ;;  %v1429_v53 = vld [vmem:[#allocation3 + $0x60] sm:$0xff] }
 0x6cd   : > { %3738 = vpow2.f32 %v1356_v24 }
 0x6ce   : > { %3502 = vmatpush3.bf16.xpose.msra.mxu1 %v2171_v40  ;;  %v944_v40 = vmul.f32 %v4926_v28, %v936_v42  ;;  %3740 = vpow2.f32 %v1350_v32 }
 0x6cf   : > { %3544 = vmatprep.subr.msk.bf16.mxu1 %vm593_vm0, %v2151_v51  ;;  %v932_v51 = vld [vmem:[#allocation3] sm:$0xff] }
 0x6d6   : > { %3504 = vmatpush3.bf16.xpose.msra.mxu1 %v2174_v58  ;;  %v4938_v58 = vpop.eup %3722 }
 0x6d7   : > { %v4947_v54 = vpop.eup %3724  ;;  %v946_v16 = vmul.f32 %v4938_v58, %v938_v34 }
 0x6d8   : > { %v943_v13 = vmul.f32 %v4947_v54, %v935_v21 }
 0x6dd   : > { %3506 = vmatmul.mubr.msk.bf16.vlgmr.msra.gmra.mrb[24].mxu1 %vm593_vm0, %v2139_v10 }
 0x6de   : > { %3509 = vmatprep.mubr.msk.bf16.mxu1 %vm593_vm0, %v2141_v55  ;;  %v940_v55 = vmul.f32 %v4934_v57, %v932_v51  ;;  %v939_v51 = vld [vmem:[#allocation3 + $0x38] sm:$0xff] }
 0x6e5   : > { %3510 = vmatmul.mubr.msk.bf16.gmra.mrb[28].mxu1 %vm593_vm0, %v2143_v37  ;;  %v4951_v37 = vpop.eup %3726 }
 0x6e6   : > { %v1434_v48 = vmul.f32 %v4951_v37, %v1426_v8 }
 0x6e9   : > { %v953_v36 = vpop.xlane.xlu0 %952 }
 0x6ea   : > { %v973_v29 = vadd.f32 %v953_v36, %v941_v35  ;;  %v4958_v35 = vpop.eup %3728 }
 0x6eb   : > { %v4962_v49 = vpop.eup %3730 }
 0x6ec   : > { %982 = vst.msk [vmem:[#allocation3 + $0x8] sm:$0xff] %vm528_vm1, %v973_v29  ;;  %v4969_v5 = vpop.eup %3732 }
 0x6ed   : > { %v956_v47 = vpop.xlane.xlu0 %955 }
 0x6ee   : > { %v974_v41 = vadd.f32 %v956_v47, %v942_v45  ;;  %v5564_v45 = vld [vmem:[#allocation18_spill] sm:$0xff]  ;;  %v5565_v47 = vld [vmem:[#allocation19_spill] sm:$0xff] }
 0x6ef   : > { %v5566_v42 = vsub.f32 %v5564_v45, %v5565_v47 }
 0x6f0   : > { %983 = vst.msk [vmem:[#allocation3 + $0x10] sm:$0xff] %vm528_vm1, %v974_v41  ;;  %v945_v41 = vmul.f32 %v4958_v35, %v937_v15 }
 0x6f1   : > { %v962_v20 = vpop.xlane.xlu0 %961  ;;  %v1354_v25 = vmul.f32 1.442695, %v5566_v42  ;;  %v1430_v42 = vld [vmem:[#allocation3 + $0x68] sm:$0xff] }
 0x6f2   : > { %v976_v10 = vadd.f32 %v962_v20, %v944_v40  ;;  %v1435_v40 = vmul.f32 %v4962_v49, %v1427_v19  ;;  %v4973_v20 = vpop.eup %3734 }
 0x6f3   : > { %3742 = vpow2.f32 %v1354_v25  ;;  %v1437_v21 = vmul.f32 %v4973_v20, %v1429_v53 }
 0x6f4   : > { %985 = vst.msk [vmem:[#allocation3 + $0x20] sm:$0xff] %vm528_vm1, %v976_v10  ;;  %v950_v4 = vpop.xlane.xlu1 %949  ;;  %v5567_v10 = vld [vmem:[#allocation20_spill] sm:$0xff] }
 0x6f5   : > { %v972_v39 = vadd.f32 %v950_v4, %v940_v55  ;;  %v968_v46 = vpop.xlane.xlu0 %967  ;;  %v5569_v52 = vsub.f32 %v5567_v10, %v5568_v1  ;;  %v947_v55 = vmul.f32 %v4969_v5, %v939_v51  ;;  %v4980_v4 = vpop.eup %3736 }
 0x6f6   : > { %v978_v9 = vadd.f32 %v968_v46, %v946_v16  ;;  %v4984_v46 = vpop.eup %3738 }
 0x6f7   : > { %981 = vst.msk [vmem:[#allocation3] sm:$0xff] %vm528_vm1, %v972_v39  ;;  %v1358_v59 = vmul.f32 1.442695, %v5569_v52  ;;  %v1425_v39 = vld [vmem:[#allocation3 + $0x40] sm:$0xff] }
 0x6f8   : > { %987 = vst.msk [vmem:[#allocation3 + $0x30] sm:$0xff] %vm528_vm1, %v978_v9  ;;  %v959_v36 = vpop.xlane.xlu1 %958  ;;  %v1433_v32 = vmul.f32 %v4980_v4, %v1425_v39  ;;  %v4988_v9 = vpop.eup %3740 }
 0x6f9   : > { %v975_v29 = vadd.f32 %v959_v36, %v943_v13  ;;  %v1446_v14 = vpop.xlane.xlu0 %1445  ;;  %3744 = vpow2.f32 %v1358_v59  ;;  %v1439_v36 = vmul.f32 %v4984_v46, %v1431_v62 }
 0x6fa   : > { %v1466_v30 = vadd.f32 %v1446_v14, %v1434_v48  ;;  %v1428_v48 = vld [vmem:[#allocation3 + $0x58] sm:$0xff] }
 0x6fb   : > { %984 = vst.msk [vmem:[#allocation3 + $0x18] sm:$0xff] %vm528_vm1, %v975_v29  ;;  %v1436_v19 = vmul.f32 %v4988_v9, %v1428_v48 }
 0x6fc   : > { %1474 = vst.msk [vmem:[#allocation3 + $0x48] sm:$0xff] %vm528_vm1, %v1466_v30  ;;  %v965_v17 = vpop.xlane.xlu1 %964 }
 0x6fd   : > { %v977_v34 = vadd.f32 %v965_v17, %v945_v41  ;;  %v1449_v43 = vpop.xlane.xlu0 %1448  ;;  %v4994_v45 = vpop.eup %3742 }
 0x6fe   : > { %v1467_v24 = vadd.f32 %v1449_v43, %v1435_v40  ;;  %v1438_v30 = vmul.f32 %v4994_v45, %v1430_v42  ;;  %v1432_v40 = vld [vmem:[#allocation3 + $0x78] sm:$0xff] }
 0x6ff   : > { %986 = vst.msk [vmem:[#allocation3 + $0x28] sm:$0xff] %vm528_vm1, %v977_v34 }
 0x700   : > { %1475 = vst.msk [vmem:[#allocation3 + $0x50] sm:$0xff] %vm528_vm1, %v1467_v24  ;;  %v971_v16 = vpop.xlane.xlu1 %970 }
 0x701   : > { %v979_v8 = vadd.f32 %v971_v16, %v947_v55  ;;  %v1455_v11 = vpop.xlane.xlu0 %1454 }
 0x702   : > { %v1469_v23 = vadd.f32 %v1455_v11, %v1437_v21 }
 0x703   : > { %988 = vst.msk [vmem:[#allocation3 + $0x38] sm:$0xff] %vm528_vm1, %v979_v8  ;;  %v4999_v41 = vpop.eup %3744 }
 0x704   : > { %1477 = vst.msk [vmem:[#allocation3 + $0x60] sm:$0xff] %vm528_vm1, %v1469_v23  ;;  %v1443_v13 = vpop.xlane.xlu1 %1442  ;;  %v1440_v34 = vmul.f32 %v4999_v41, %v1432_v40 }
 0x705   : > { %v1465_v15 = vadd.f32 %v1443_v13, %v1433_v32  ;;  %v1461_v29 = vpop.xlane.xlu0 %1460  ;;  %v3866_v32 = vld [vmem:[%s4104_s6] ss:$0 sm:$0xff] }
 0x706   : > { %v1471_v14 = vadd.f32 %v1461_v29, %v1439_v36 }
 0x707   : > { %1473 = vst.msk [vmem:[#allocation3 + $0x40] sm:$0xff] %vm528_vm1, %v1465_v15 }
 0x708   : > { %1479 = vst.msk [vmem:[#allocation3 + $0x70] sm:$0xff] %vm528_vm1, %v1471_v14  ;;  %v1452_v47 = vpop.xlane.xlu1 %1451 }
 0x709   : > { %v1468_v25 = vadd.f32 %v1452_v47, %v1436_v19 }
 0x70b   : > { %1476 = vst.msk [vmem:[#allocation3 + $0x58] sm:$0xff] %vm528_vm1, %v1468_v25 }
 0x70c   : > { %v1458_v17 = vpop.xlane.xlu1 %1457 }
 0x70d   : > { %v1470_v51 = vadd.f32 %v1458_v17, %v1438_v30 }
 0x70f   : > { %1478 = vst.msk [vmem:[#allocation3 + $0x68] sm:$0xff] %vm528_vm1, %v1470_v51 }
 0x710   : > { %v1464_v43 = vpop.xlane.xlu1 %1463 }
 0x711   : > { %v1472_v53 = vadd.f32 %v1464_v43, %v1440_v34 }
 0x713   : > { %1480 = vst.msk [vmem:[#allocation3 + $0x78] sm:$0xff] %vm528_vm1, %v1472_v53 }
 0x78a   : > { %v5004_v10 = vpop.f32.mrb[16].mxu1 }
 0x78b   : > { %v5006_v1 = vpop.f32.mrb[17].mxu1 }
 0x78c   : > { %v5008_v52 = vpop.f32.mrb[18].mxu1 }
 0x78d   : > { %v5010_v59 = vpop.f32.mrb[19].mxu1 }
 0x798   : > { %v5012_v24 = vpop.f32.mrb[20].mxu1 }
 0x799   : > { %5570 = vst [vmem:[#allocation21_spill] sm:$0xff] %v5012_v24  ;;  %v5014_v55 = vpop.f32.mrb[21].mxu1 }
 0x79a   : > { %5571 = vst [vmem:[#allocation23_spill] sm:$0xff] %v5014_v55  ;;  %v5016_v16 = vpop.f32.mrb[22].mxu1  ;;  %v5583_v55 = vld [vmem:[#allocation12_spill] sm:$0xff] }
 0x79b   : > { %5572 = vst [vmem:[#allocation16_spill] sm:$0xff] %v5016_v16  ;;  %v5018_v21 = vpop.f32.mrb[23].mxu1  ;;  %v3868_v16 = vld [vmem:[%s4323_s8 + $0x8] sm:$0xff]  }
 0x79c   : > { %5573 = vst [vmem:[#allocation17_spill] sm:$0xff] %v5018_v21  ;;  %v3869_v21 = vld [vmem:[%s4323_s8 + $0x10] sm:$0xff]  }
 0x7b0   : > { %v3507_v39 = vpop.f32.mrb[24].mxu1 }
 0x7b1   : > { %v2243_v8 = vmul.f32 0.17677669, %v3507_v39  ;;  %v2210_v11 = vpop.f32.mrb[25].mxu1 }
 0x7b2   : > { %v2241_v62 = vmul.f32 0.17677669, %v2210_v11  ;;  %v3508_v23 = vpop.f32.mrb[26].mxu1 }
 0x7b3   : > { %v5021_v13 = vadd.f32 %v3866_v32, %v2243_v8  ;;  %v2213_v36 = vpop.f32.mrb[27].mxu1  ;;  %v2244_v15 = vmul.f32 0.17677669, %v3508_v23 }
 0x7b4   : > { %v5023_v48 = vadd.f32 %v3866_v32, %v2241_v62  ;;  %v2242_v47 = vmul.f32 0.17677669, %v2213_v36 }
 0x7b5   : > { %v2272_v29 = vsel %vm811_vm2, %v5021_v13, -inf  ;;  %v5027_v19 = vadd.f32 %v3866_v32, %v2244_v15 }
 0x7b6   : > { %2273 = vmax.xlane.f32.xlu1 %v2272_v29  ;;  %v2266_v25 = vsel %vm811_vm2, %v5023_v48, -inf  ;;  %v5031_v34 = vadd.f32 %v3866_v32, %v2242_v47 }
 0x7b7   : > { %v2275_v43 = vsel %vm811_vm2, %v5027_v19, -inf }
 0x7b8   : > { %v3511_v14 = vpop.f32.mrb[28].mxu1  ;;  %v2269_v62 = vsel %vm811_vm2, %v5031_v34, -inf }
 0x7b9   : > { %v2226_v42 = vpop.f32.mrb[29].mxu1  ;;  %v2247_v11 = vmul.f32 0.17677669, %v3511_v14 }
 0x7ba   : > { %2267 = vmax.xlane.f32.xlu1 %v2266_v25  ;;  %v3512_v30 = vpop.f32.mrb[30].mxu1  ;;  %v2245_v17 = vmul.f32 0.17677669, %v2226_v42 }
 0x7bb   : > { %v2229_v40 = vpop.f32.mrb[31].mxu1  ;;  %v5045_v36 = vadd.f32 %v3866_v32, %v2247_v11  ;;  %v2248_v15 = vmul.f32 0.17677669, %v3512_v30  ;;  %v5112_v30 = vld [vmem:[#allocation2 + $0xe0] sm:$0xff]  ;;  %v991_v11 = vld [vmem:[#allocation4 + $0x10] sm:$0xff] }
 0x7bc   : > { %v2246_v51 = vmul.f32 0.17677669, %v2229_v40  ;;  %v5037_v39 = vadd.f32 %v3866_v32, %v2245_v17 }
 0x7bd   : > { %v5047_v29 = vadd.f32 %v3866_v32, %v2248_v15  ;;  %v2284_v47 = vsel %vm811_vm2, %v5045_v36, -inf }
 0x7be   : > { %v5035_v53 = vadd.f32 %v3866_v32, %v2246_v51  ;;  %2276 = vmax.xlane.f32.xlu1 %v2275_v43  ;;  %v2278_v23 = vsel %vm811_vm2, %v5037_v39, -inf  ;;  %v989_v43 = vld [vmem:[#allocation4] sm:$0xff] }
 0x7bf   : > { %v2287_v14 = vsel %vm811_vm2, %v5047_v29, -inf }
 0x7c0   : > { %v2281_v8 = vsel %vm811_vm2, %v5035_v53, -inf }
 0x7c1   : > { %2282 = vmax.xlane.f32.xlu0 %v2281_v8  ;;  %v5122_v8 = vld [vmem:[#allocation2 + $0xf0] sm:$0xff] }
 0x7c2   : > { %2270 = vmax.xlane.f32.xlu1 %v2269_v62 }
 0x7c6   : > { %2279 = vmax.xlane.f32.xlu1 %v2278_v23 }
 0x7ca   : > { %2285 = vmax.xlane.f32.xlu1 %v2284_v47 }
 0x7ce   : > { %2288 = vmax.xlane.f32.xlu1 %v2287_v14  ;;  %v992_v14 = vld [vmem:[#allocation4 + $0x18] sm:$0xff] }
 0x7d7   : > { %999 = vperm.xlu0 %3592, %v4934_v57   ;;  %v5074_v57 = vld [vmem:[#allocation2 + $0xc0] sm:$0xff] }
 0x7db   : > { %1014 = vperm.xlu0 %3592, %v4947_v54  }
 0x7df   : > { %1004 = vperm.xlu1 %3593, %v4906_v3   ;;  %1024 = vperm.xlu0 %3592, %v4958_v35   ;;  %v5069_v3 = vld [vmem:[#allocation2 + $0xd0] sm:$0xff]  ;;  %v5084_v35 = vld [vmem:[#allocation2 + $0xd8] sm:$0xff] }
 0x7e3   : > { %1009 = vperm.xlu1 %3593, %v4916_v18   ;;  %1034 = vperm.xlu0 %3592, %v4969_v5  }
 0x7e7   : > { %1019 = vperm.xlu1 %3593, %v4926_v28   ;;  %1492 = vperm.xlu0 %3592, %v4980_v4   ;;  %v5094_v4 = vld [vmem:[#allocation2 + $0xe8] sm:$0xff] }
 0x7eb   : > { %1029 = vperm.xlu1 %3593, %v4938_v58   ;;  %1512 = vperm.xlu0 %3592, %v4973_v20   ;;  %v3867_v58 = vld [vmem:[%s4323_s8] sm:$0xff]  }
 0x7ef   : > { %1497 = vperm.xlu1 %3593, %v4951_v37  }
 0x7f3   : > { %1502 = vperm.xlu1 %3593, %v4962_v49   ;;  %v5577_v49 = vld [vmem:[#allocation11_spill] sm:$0xff] }
 0x7f7   : > { %1507 = vperm.xlu1 %3593, %v4988_v9  }
 0x7fb   : > { %1517 = vperm.xlu1 %3593, %v4994_v45  }
 0x7ff   : > { %1522 = vperm.xlu1 %3593, %v4984_v46   ;;  %v5096_v46 = vld [vmem:[#allocation2 + $0xc8] sm:$0xff] }
 0x803   : > { %1527 = vperm.xlu1 %3593, %v4999_v41  }
 0x843   : > { %v2274_v18 = vpop.xlane.xlu1 %2273 }
 0x844   : > { %v5072_v28 = vmax.f32 %v5069_v3, %v2274_v18  ;;  %v5574_v18 = vld [vmem:[#allocation9_spill] sm:$0xff] }
 0x846   : > { %2611 = vst.msk [vmem:[#allocation2 + $0xd0] sm:$0xff] %vm528_vm1, %v5072_v28  ;;  %2334 = vperm.xlu0 %3592, %v5072_v28  }
 0x847   : > { %v2268_v54 = vpop.xlane.xlu1 %2267 }
 0x848   : > { %v5082_v37 = vmax.f32 %v5074_v57, %v2268_v54 }
 0x84a   : > { %2609 = vst.msk [vmem:[#allocation2 + $0xc0] sm:$0xff] %vm528_vm1, %v5082_v37  ;;  %2324 = vperm.xlu1 %3593, %v5082_v37  }
 0x84b   : > { %v2277_v5 = vpop.xlane.xlu1 %2276 }
 0x84c   : > { %v5092_v20 = vmax.f32 %v5084_v35, %v2277_v5  ;;  %v5133_v5 = vld [vmem:[#allocation2 + $0xf8] sm:$0xff] }
 0x84e   : > { %2612 = vst.msk [vmem:[#allocation2 + $0xd8] sm:$0xff] %vm528_vm1, %v5092_v20  ;;  %v2283_v45 = vpop.xlane.xlu0 %2282 }
 0x84f   : > { %v2271_v41 = vpop.xlane.xlu1 %2270  ;;  %v5103_v32 = vmax.f32 %v5094_v4, %v2283_v45  ;;  %v990_v45 = vld [vmem:[#allocation4 + $0x8] sm:$0xff] }
 0x850   : > { %v5106_v42 = vmax.f32 %v5096_v46, %v2271_v41 }
 0x851   : > { %2614 = vst.msk [vmem:[#allocation2 + $0xe8] sm:$0xff] %vm528_vm1, %v5103_v32 }
 0x852   : > { %2610 = vst.msk [vmem:[#allocation2 + $0xc8] sm:$0xff] %vm528_vm1, %v5106_v42  ;;  %2329 = vperm.xlu1 %3593, %v5106_v42  }
 0x853   : > { %v2280_v40 = vpop.xlane.xlu1 %2279 }
 0x854   : > { %v5120_v51 = vmax.f32 %v5112_v30, %v2280_v40 }
 0x856   : > { %2613 = vst.msk [vmem:[#allocation2 + $0xe0] sm:$0xff] %vm528_vm1, %v5120_v51  ;;  %v1000_v62 = vpop.permute.xlu0 %999  ;;  %2339 = vperm.xlu1 %3593, %v5092_v20  }
 0x857   : > { %v1037_v23 = vmul.f32 %v1000_v62, %v989_v43  ;;  %v2286_v15 = vpop.xlane.xlu1 %2285 }
 0x858   : > { %v5130_v47 = vmax.f32 %v5122_v8, %v2286_v15  ;;  %v5575_v15 = vld [vmem:[#allocation10_spill] sm:$0xff] }
 0x859   : > { %v1150_v54 = vadd.f32 %v5574_v18, %v1037_v23  ;;  %v994_v23 = vld [vmem:[#allocation4 + $0x28] sm:$0xff] }
 0x85a   : > { %2615 = vst.msk [vmem:[#allocation2 + $0xf0] sm:$0xff] %vm528_vm1, %v5130_v47  ;;  %v1015_v41 = vpop.permute.xlu0 %1014  ;;  %2349 = vperm.xlu1 %3593, %v5103_v32   ;;  %2354 = vperm.xlu0 %3592, %v5130_v47  }
 0x85b   : > { %1158 = vst.msk [vmem:[#allocation4] sm:$0xff] %vm593_vm0, %v1150_v54  ;;  %v1040_v40 = vmul.f32 %v1015_v41, %v992_v14  ;;  %v2289_v43 = vpop.xlane.xlu1 %2288 }
 0x85c   : > { %v5143_v62 = vmax.f32 %v5133_v5, %v2289_v43  ;;  %v5576_v43 = vld [vmem:[#allocation15_spill] sm:$0xff] }
 0x85d   : > { %v1153_v18 = vadd.f32 %v5575_v15, %v1040_v40  ;;  %v996_v40 = vld [vmem:[#allocation4 + $0x38] sm:$0xff] }
 0x85e   : > { %2616 = vst.msk [vmem:[#allocation2 + $0xf8] sm:$0xff] %vm528_vm1, %v5143_v62  ;;  %v1025_v9 = vpop.permute.xlu0 %1024  ;;  %2344 = vperm.xlu0 %3592, %v5120_v51   ;;  %2359 = vperm.xlu1 %3593, %v5143_v62  }
 0x85f   : > { %1161 = vst.msk [vmem:[#allocation4 + $0x18] sm:$0xff] %vm593_vm0, %v1153_v18  ;;  %v1042_v14 = vmul.f32 %v1025_v9, %v994_v23  ;;  %v1005_v54 = vpop.permute.xlu1 %1004  ;;  %v1482_v18 = vld [vmem:[#allocation4 + $0x40] sm:$0xff] }
 0x860   : > { %v1038_v41 = vmul.f32 %v1005_v54, %v990_v45 }
 0x861   : > { %v1155_v15 = vadd.f32 %v5576_v43, %v1042_v14  ;;  %v5578_v14 = vld [vmem:[#allocation14_spill] sm:$0xff] }
 0x862   : > { %v1151_v25 = vadd.f32 %v5577_v49, %v1038_v41  ;;  %v1035_v17 = vpop.permute.xlu0 %1034  ;;  %2504 = vrot.lane.b32.xlu0 %v3867_v58, %s3916_s10  ;;  %2506 = vrot.lane.b32.xlu1 %v3868_v16, %s3916_s10  ;;  %v993_v49 = vld [vmem:[#allocation4 + $0x20] sm:$0xff]  ;;  %v3870_v58 = vld [vmem:[%s4323_s8 + $0x18] sm:$0xff]  }
 0x863   : > { %1163 = vst.msk [vmem:[#allocation4 + $0x28] sm:$0xff] %vm593_vm0, %v1155_v15  ;;  %v1044_v9 = vmul.f32 %v1035_v17, %v996_v40  ;;  %v1010_v23 = vpop.permute.xlu1 %1009  ;;  %v5579_v41 = vld [vmem:[#allocation8_spill] sm:$0xff]  ;;  %v5580_v40 = vld [vmem:[#allocation25_spill] sm:$0xff] }
 0x864   : > { %1159 = vst.msk [vmem:[#allocation4 + $0x8] sm:$0xff] %vm593_vm0, %v1151_v25  ;;  %v1039_v45 = vmul.f32 %v1010_v23, %v991_v11  ;;  %v1486_v11 = vld [vmem:[#allocation4 + $0x60] sm:$0xff]  ;;  %v5581_v23 = vld [vmem:[#allocation13_spill] sm:$0xff] }
 0x865   : > { %v1157_v54 = vadd.f32 %v5578_v14, %v1044_v9  ;;  %v995_v9 = vld [vmem:[#allocation4 + $0x30] sm:$0xff] }
 0x866   : > { %v1152_v43 = vadd.f32 %v5579_v41, %v1039_v45  ;;  %v1493_v24 = vpop.permute.xlu0 %1492  ;;  %2508 = vrot.lane.b32.xlu0 %v3869_v21, %s3916_s10  ;;  %2510 = vrot.lane.b32.xlu1 %v3870_v58, %s3916_s10 }
 0x867   : > { %1165 = vst.msk [vmem:[#allocation4 + $0x38] sm:$0xff] %vm593_vm0, %v1157_v54  ;;  %v1530_v16 = vmul.f32 %v1493_v24, %v1482_v18  ;;  %v1020_v17 = vpop.permute.xlu1 %1019  ;;  %v5582_v54 = vld [vmem:[#allocation29_spill] sm:$0xff] }
 0x868   : > { %1160 = vst.msk [vmem:[#allocation4 + $0x10] sm:$0xff] %vm593_vm0, %v1152_v43  ;;  %v1041_v25 = vmul.f32 %v1020_v17, %v993_v49  ;;  %v1483_v18 = vld [vmem:[#allocation4 + $0x48] sm:$0xff]  ;;  %v1484_v17 = vld [vmem:[#allocation4 + $0x50] sm:$0xff] }
 0x869   : > { %v1631_v15 = vadd.f32 %v5580_v40, %v1530_v16 }
 0x86a   : > { %v1154_v45 = vadd.f32 %v5581_v23, %v1041_v25  ;;  %v1513_v14 = vpop.permute.xlu0 %1512  ;;  %v5584_v25 = vld [vmem:[#allocation27_spill] sm:$0xff] }
 0x86b   : > { %1639 = vst.msk [vmem:[#allocation4 + $0x40] sm:$0xff] %vm593_vm0, %v1631_v15  ;;  %v1534_v21 = vmul.f32 %v1513_v14, %v1486_v11  ;;  %v1030_v41 = vpop.permute.xlu1 %1029  ;;  %v1485_v23 = vld [vmem:[#allocation4 + $0x58] sm:$0xff] }
 0x86c   : > { %1162 = vst.msk [vmem:[#allocation4 + $0x20] sm:$0xff] %vm593_vm0, %v1154_v45  ;;  %v1043_v58 = vmul.f32 %v1030_v41, %v995_v9  ;;  %v5585_v9 = vld [vmem:[#allocation24_spill] sm:$0xff]  ;;  %v5586_v41 = vld [vmem:[#allocation26_spill] sm:$0xff] }
 0x86d   : > { %v1635_v24 = vadd.f32 %v5582_v54, %v1534_v21  ;;  %v1487_v21 = vld [vmem:[#allocation4 + $0x68] sm:$0xff] }
 0x86e   : > { %v1156_v43 = vadd.f32 %v5583_v55, %v1043_v58 }
 0x86f   : > { %1643 = vst.msk [vmem:[#allocation4 + $0x60] sm:$0xff] %vm593_vm0, %v1635_v24  ;;  %v1498_v49 = vpop.permute.xlu1 %1497 }
 0x870   : > { %1164 = vst.msk [vmem:[#allocation4 + $0x30] sm:$0xff] %vm593_vm0, %v1156_v43  ;;  %v1531_v16 = vmul.f32 %v1498_v49, %v1483_v18  ;;  %v1488_v18 = vld [vmem:[#allocation4 + $0x70] sm:$0xff]  ;;  %v5587_v43 = vld [vmem:[#allocation31_spill] sm:$0xff] }
 0x872   : > { %v1632_v40 = vadd.f32 %v5584_v25, %v1531_v16  ;;  %v1489_v25 = vld [vmem:[#allocation4 + $0x78] sm:$0xff] }
 0x873   : > { %v1503_v15 = vpop.permute.xlu1 %1502 }
 0x874   : > { %1640 = vst.msk [vmem:[#allocation4 + $0x48] sm:$0xff] %vm593_vm0, %v1632_v40  ;;  %v1532_v11 = vmul.f32 %v1503_v15, %v1484_v17  ;;  %v5588_v40 = vld [vmem:[#allocation28_spill] sm:$0xff] }
 0x876   : > { %v1633_v45 = vadd.f32 %v5585_v9, %v1532_v11  ;;  %v1922_v9 = vsel %vm811_vm2, %v4850_v50, 0.0  ;;  %v1934_v50 = vsel %vm811_vm2, %v4873_v60, 0.0  ;;  %v5593_v60 = vsub.f32 %v4725_v63, %v4739_v22 }
 0x877   : > { %v1508_v14 = vpop.permute.xlu1 %1507 }
 0x878   : > { %1641 = vst.msk [vmem:[#allocation4 + $0x50] sm:$0xff] %vm593_vm0, %v1633_v45  ;;  %v1533_v55 = vmul.f32 %v1508_v14, %v1485_v23  ;;  %v5589_v45 = vld [vmem:[#allocation30_spill] sm:$0xff] }
 0x87a   : > { %v1634_v58 = vadd.f32 %v5586_v41, %v1533_v55  ;;  %v1928_v55 = vsel %vm811_vm2, %v4855_v6, 0.0  ;;  %v1931_v41 = vsel %vm811_vm2, %v4860_v31, 0.0  ;;  %v1940_v6 = vsel %vm811_vm2, %v4871_v44, 0.0  ;;  %v5598_v44 = vld [vmem:[#allocation37_spill] sm:$0xff] }
 0x87b   : > { %v1518_v54 = vpop.permute.xlu1 %1517  ;;  %v1943_v31 = vsel %vm811_vm2, %v4875_v61, 0.0 }
 0x87c   : > { %1642 = vst.msk [vmem:[#allocation4 + $0x58] sm:$0xff] %vm593_vm0, %v1634_v58  ;;  %v1535_v24 = vmul.f32 %v1518_v54, %v1487_v21  ;;  %v1925_v21 = vsel %vm811_vm2, %v4853_v7, 0.0  ;;  %v1937_v58 = vsel %vm811_vm2, %v4869_v56, 0.0  ;;  %v5590_v54 = vld [vmem:[#allocation32_spill] sm:$0xff] }
 0x87d   : > { %v5595_v56 = vld [vmem:[#allocation36_spill] sm:$0xff] }
 0x87e   : > { %v1636_v49 = vadd.f32 %v5587_v43, %v1535_v24  ;;  %v5591_v24 = vld [vmem:[#allocation34_spill] sm:$0xff]  ;;  %v1829_v43 = vmul.f32 1.442695, %v5593_v60 }
 0x87f   : > { %v1523_v16 = vpop.permute.xlu1 %1522  ;;  %v5592_v7 = vsub.f32 %v5590_v54, %v5591_v24 }
 0x880   : > { %1644 = vst.msk [vmem:[#allocation4 + $0x68] sm:$0xff] %vm593_vm0, %v1636_v49  ;;  %v1536_v17 = vmul.f32 %v1523_v16, %v1488_v18  ;;  %v5594_v49 = vld [vmem:[#allocation33_spill] sm:$0xff] }
 0x881   : > { %v1825_v18 = vmul.f32 1.442695, %v5592_v7  ;;  %v5596_v16 = vsub.f32 %v5594_v49, %v5595_v56 }
 0x882   : > { %v1637_v15 = vadd.f32 %v5588_v40, %v1536_v17 }
 0x883   : > { %v1528_v11 = vpop.permute.xlu1 %1527  ;;  %3746 = vpow2.f32 %v1825_v18  ;;  %v1827_v17 = vmul.f32 1.442695, %v5596_v16 }
 0x884   : > { %1645 = vst.msk [vmem:[#allocation4 + $0x70] sm:$0xff] %vm593_vm0, %v1637_v15  ;;  %v1537_v23 = vmul.f32 %v1528_v11, %v1489_v25  ;;  %v5597_v25 = vld [vmem:[#allocation35_spill] sm:$0xff]  ;;  %3748 = vpow2.f32 %v1829_v43  ;;  %v5600_v11 = vsub.f32 %v4742_v38, %v4754_v0 }
 0x885   : > { %1923 = vadd.xlane.f32.xlu0 %v1922_v9  ;;  %v5599_v40 = vsub.f32 %v5597_v25, %v5598_v44  ;;  %3750 = vpow2.f32 %v1827_v17  ;;  %v5602_v9 = vsub.f32 %v4759_v33, %v4775_v12  ;;  %v5606_v33 = vsub.f32 %v5096_v46, %v5106_v42 }
 0x886   : > { %v1638_v14 = vadd.f32 %v5589_v45, %v1537_v23  ;;  %v1835_v61 = vmul.f32 1.442695, %v5600_v11  ;;  %v5601_v23 = vsub.f32 %v4744_v27, %v4757_v26  ;;  %v5605_v26 = vsub.f32 %v5069_v3, %v5072_v28 }
 0x887   : > { %v1831_v15 = vmul.f32 1.442695, %v5599_v40  ;;  %v1839_v45 = vmul.f32 1.442695, %v5602_v9  ;;  %v2308_v12 = vmul.f32 1.442695, %v5606_v33  ;;  %v5608_v3 = vsub.f32 %v5112_v30, %v5120_v51 }
 0x888   : > { %1646 = vst.msk [vmem:[#allocation4 + $0x78] sm:$0xff] %vm593_vm0, %v1638_v14  ;;  %v1833_v63 = vmul.f32 1.442695, %v5601_v23  ;;  %v5603_v14 = vld [vmem:[#allocation38_spill] sm:$0xff]  ;;  %v2310_v27 = vmul.f32 1.442695, %v5605_v26  ;;  %v5610_v30 = vsub.f32 %v5094_v4, %v5103_v32 }
 0x889   : > { %1929 = vadd.xlane.f32.xlu0 %v1928_v55  ;;  %3752 = vpow2.f32 %v1831_v15  ;;  %v5604_v55 = vsub.f32 %v4761_v2, %v5603_v14  ;;  %v5607_v2 = vsub.f32 %v5074_v57, %v5082_v37  ;;  %v2314_v28 = vmul.f32 1.442695, %v5608_v3 }
 0x88a   : > { %1926 = vadd.xlane.f32.xlu1 %v1925_v21  ;;  %3754 = vpow2.f32 %v1835_v61  ;;  %v5609_v57 = vsub.f32 %v5084_v35, %v5092_v20  ;;  %v2316_v51 = vmul.f32 1.442695, %v5610_v30 }
 0x88b   : > { %3756 = vpow2.f32 %v1833_v63  ;;  %v1837_v38 = vmul.f32 1.442695, %v5604_v55 }
 0x88c   : > { %3758 = vpow2.f32 %v1839_v45  ;;  %v2312_v37 = vmul.f32 1.442695, %v5609_v57 }
 0x88d   : > { %1932 = vadd.xlane.f32.xlu0 %v1931_v41  ;;  %v5223_v22 = vpop.eup %3746  ;;  %3760 = vpow2.f32 %v1837_v38 }
 0x88e   : > { %1935 = vadd.xlane.f32.xlu1 %v1934_v50  ;;  %v5232_v0 = vpop.eup %3748  ;;  %3762 = vpow2.f32 %v2310_v27  ;;  %v2306_v50 = vmul.f32 1.442695, %v5607_v2 }
 0x88f   : > { %v5241_v21 = vpop.eup %3750  ;;  %3764 = vpow2.f32 %v2308_v12 }
 0x890   : > { %3766 = vpow2.f32 %v2306_v50 }
 0x891   : > { %1938 = vadd.xlane.f32.xlu0 %v1937_v58  ;;  %3768 = vpow2.f32 %v2314_v28 }
 0x892   : > { %1941 = vadd.xlane.f32.xlu1 %v1940_v6  ;;  %3770 = vpow2.f32 %v2312_v37 }
 0x893   : > { %v5243_v41 = vpop.eup %3752  ;;  %3772 = vpow2.f32 %v2316_v51 }
 0x894   : > { %v5253_v46 = vpop.eup %3754 }
 0x895   : > { %1944 = vadd.xlane.f32.xlu0 %v1943_v31  ;;  %v5255_v42 = vpop.eup %3756 }
 0x896   : > { %v5262_v58 = vpop.eup %3758 }
 0x897   : > { %v5264_v6 = vpop.eup %3760 }
 0x898   : > { %v5271_v54 = vpop.eup %3762 }
 0x899   : > { %v5273_v24 = vpop.eup %3764 }
 0x89a   : > { %v5277_v35 = vpop.eup %3766 }
 0x89b   : > { %v5279_v20 = vpop.eup %3768 }
 0x89c   : > { %v5283_v7 = vpop.eup %3770 }
 0x89d   : > { %v5286_v4 = vpop.eup %3772 }
 0x8a3   : > { %1973 = vperm.xlu1 %3593, %v5223_v22  }
 0x8a7   : > { %1983 = vperm.xlu1 %3593, %v5232_v0  }
 0x8ab   : > { %1978 = vperm.xlu0 %3592, %v5241_v21   ;;  %1988 = vperm.xlu1 %3593, %v5243_v41  }
 0x8af   : > { %1993 = vperm.xlu0 %3592, %v5255_v42   ;;  %1998 = vperm.xlu1 %3593, %v5253_v46  }
 0x8b3   : > { %2003 = vperm.xlu0 %3592, %v5264_v6   ;;  %2008 = vperm.xlu1 %3593, %v5262_v58  }
 0x8b7   : > { %2459 = vperm.xlu0 %3592, %v5273_v24   ;;  %2464 = vperm.xlu1 %3593, %v5271_v54  }
 0x8bb   : > { %2474 = vperm.xlu0 %3592, %v5279_v20   ;;  %2454 = vperm.xlu1 %3593, %v5277_v35  }
 0x8bf   : > { %2469 = vperm.xlu1 %3593, %v5283_v7  }
 0x8c3   : > { %2479 = vperm.xlu1 %3593, %v5286_v4  }
 0x8c5   : > { %v2335_v32 = vpop.permute.xlu0 %2334 }
 0x8c6   : > { %v2364_v18 = vsub.f32 %v5021_v13, %v2335_v32 }
 0x8c8   : > { %v2374_v31 = vmul.f32 1.442695, %v2364_v18 }
 0x8c9   : > { %v2325_v60 = vpop.permute.xlu1 %2324 }
 0x8ca   : > { %v2362_v43 = vsub.f32 %v5023_v48, %v2325_v60  ;;  %3774 = vpow2.f32 %v2374_v31  ;;  %v5611_v31 = vsub.f32 %v5133_v5, %v5143_v62  ;;  %v2633_v5 = vld [vmem:[#allocation3 + $0x28] sm:$0xff] }
 0x8cc   : > { %v2370_v49 = vmul.f32 1.442695, %v2362_v43  ;;  %v2320_v60 = vmul.f32 1.442695, %v5611_v31 }
 0x8ce   : > { %3776 = vpow2.f32 %v2370_v49 }
 0x8d1   : > { %v2330_v56 = vpop.permute.xlu1 %2329 }
 0x8d2   : > { %v2363_v16 = vsub.f32 %v5031_v34, %v2330_v56 }
 0x8d4   : > { %v2372_v17 = vmul.f32 1.442695, %v2363_v16  ;;  %v3775_v44 = vpop.eup %3774  ;;  %v2629_v16 = vld [vmem:[#allocation3 + $0x8] sm:$0xff] }
 0x8d5   : > { %v2340_v25 = vpop.permute.xlu1 %2339  ;;  %v2409_v13 = vsel %vm811_vm2, %v3775_v44, 0.0 }
 0x8d6   : > { %3778 = vpow2.f32 %v2372_v17  ;;  %v2365_v40 = vsub.f32 %v5027_v19, %v2340_v25  ;;  %v2631_v25 = vld [vmem:[#allocation3 + $0x18] sm:$0xff] }
 0x8d8   : > { %v2376_v15 = vmul.f32 1.442695, %v2365_v40  ;;  %v3777_v23 = vpop.eup %3776  ;;  %v5612_v40 = vsub.f32 %v5122_v8, %v5130_v47  ;;  %v2701_v8 = vld [vmem:[#allocation3 + $0x48] sm:$0xff] }
 0x8d9   : > { %v2355_v11 = vpop.permute.xlu0 %2354  ;;  %v2350_v61 = vpop.permute.xlu1 %2349  ;;  %v2403_v14 = vsel %vm811_vm2, %v3777_v23, 0.0 }
 0x8da   : > { %3780 = vpow2.f32 %v2376_v15  ;;  %v2368_v48 = vsub.f32 %v5045_v36, %v2355_v11  ;;  %2410 = vadd.xlane.f32.xlu0 %v2409_v13  ;;  %v2367_v9 = vsub.f32 %v5035_v53, %v2350_v61  ;;  %v2318_v15 = vmul.f32 1.442695, %v5612_v40  ;;  %v2635_v11 = vld [vmem:[#allocation3 + $0x38] sm:$0xff]  ;;  %v2630_v13 = vld [vmem:[#allocation3 + $0x10] sm:$0xff] }
 0x8db   : > { %v1912_v40 = vld [vmem:[#allocation3 + $0xb0] sm:$0xff] }
 0x8dc   : > { %v2382_v63 = vmul.f32 1.442695, %v2368_v48  ;;  %v2380_v33 = vmul.f32 1.442695, %v2367_v9 }
 0x8dd   : > { %v2345_v34 = vpop.permute.xlu0 %2344  ;;  %v2360_v45 = vpop.permute.xlu1 %2359 }
 0x8de   : > { %3782 = vpow2.f32 %v2382_v63  ;;  %v2366_v19 = vsub.f32 %v5037_v39, %v2345_v34  ;;  %v2369_v55 = vsub.f32 %v5047_v29, %v2360_v45  ;;  %2404 = vadd.xlane.f32.xlu0 %v2403_v14  ;;  %v2703_v63 = vld [vmem:[#allocation3 + $0x58] sm:$0xff]  ;;  %v2634_v34 = vld [vmem:[#allocation3 + $0x30] sm:$0xff]  ;;  %v2705_v14 = vld [vmem:[#allocation3 + $0x68] sm:$0xff] }
 0x8e0   : > { %v3779_v38 = vpop.eup %3778  ;;  %v2378_v26 = vmul.f32 1.442695, %v2366_v19  ;;  %v2384_v27 = vmul.f32 1.442695, %v2369_v55  ;;  %v1906_v19 = vld [vmem:[#allocation3 + $0x80] sm:$0xff] }
 0x8e1   : > { %v2505_v12 = vpop.permute.xlu0 %2504  ;;  %v2500_v36 = vpack.c.bf16 %v3779_v38, %v3777_v23  ;;  %v2507_v53 = vpop.permute.xlu1 %2506  ;;  %v2406_v29 = vsel %vm811_vm2, %v3779_v38, 0.0  ;;  %v2632_v23 = vld [vmem:[#allocation3 + $0x20] sm:$0xff] }
 0x8e2   : > { %3784 = vpow2.f32 %v2378_v26  ;;  %3513 = vmatprep.subr.bf16.mxu0 %v2505_v12  ;;  %v2700_v38 = vld [vmem:[#allocation3 + $0x40] sm:$0xff] }
 0x8e3   : > { %3786 = vpow2.f32 %v2384_v27  ;;  %3514 = vmatpush3.bf16.msra.mxu0 %v2505_v12  ;;  %3521 = vmatprep.mubr.msk.bf16.mxu0 %vm811_vm2, %v2500_v36  ;;  %v1914_v27 = vmul.f32 %v5223_v22, %v1906_v19  ;;  %v1908_v36 = vld [vmem:[#allocation3 + $0x90] sm:$0xff] }
 0x8e4   : > { %v3781_v2 = vpop.eup %3780  ;;  %3515 = vmatprep.subr.bf16.mxu0 %v2507_v53  ;;  %3788 = vpow2.f32 %v2380_v33  ;;  %v2707_v33 = vld [vmem:[#allocation3 + $0x78] sm:$0xff] }
 0x8e5   : > { %v2412_v39 = vsel %vm811_vm2, %v3781_v2, 0.0  ;;  %v2509_v50 = vpop.permute.xlu0 %2508  ;;  %v2511_v57 = vpop.permute.xlu1 %2510  ;;  %v2501_v43 = vpack.c.bf16 %v3781_v2, %v3775_v44  ;;  %3790 = vpow2.f32 %v2320_v60  ;;  %v2628_v44 = vld [vmem:[#allocation3] sm:$0xff]  ;;  %v2702_v2 = vld [vmem:[#allocation3 + $0x50] sm:$0xff] }
 0x8e6   : > { %2413 = vadd.xlane.f32.xlu0 %v2412_v39  ;;  %3792 = vrcp.f32 %v2629_v16  ;;  %v2706_v16 = vld [vmem:[#allocation3 + $0x70] sm:$0xff] }
 0x8e7   : > { %2407 = vadd.xlane.f32.xlu1 %v2406_v29  ;;  %3516 = vmatpush3.bf16.msra.mxu0 %v2507_v53  ;;  %3794 = vrcp.f32 %v2631_v25  ;;  %v1907_v29 = vld [vmem:[#allocation3 + $0x88] sm:$0xff] }
 0x8e8   : > { %v3783_v3 = vpop.eup %3782  ;;  %3517 = vmatprep.subr.bf16.mxu0 %v2509_v50  ;;  %3796 = vpow2.f32 %v2318_v15  ;;  %v1915_v22 = vmul.f32 %v5241_v21, %v1907_v29  ;;  %v1966_v29 = vld [vmem:[#allocation4 + $0x98] sm:$0xff] }
 0x8e9   : > { %v2421_v28 = vsel %vm811_vm2, %v3783_v3, 0.0  ;;  %3798 = vrcp.f32 %v2633_v5 }
 0x8ea   : > { %3800 = vrcp.f32 %v2628_v44 }
 0x8eb   : > { %2422 = vadd.xlane.f32.xlu1 %v2421_v28  ;;  %3518 = vmatpush3.bf16.msra.mxu0 %v2509_v50  ;;  %3802 = vrcp.f32 %v2635_v11 }
 0x8ec   : > { %v3785_v37 = vpop.eup %3784  ;;  %3519 = vmatprep.subr.bf16.mxu0 %v2511_v57  ;;  %3804 = vrcp.f32 %v2630_v13 }
 0x8ed   : > { %v3787_v30 = vpop.eup %3786  ;;  %v2415_v51 = vsel %vm811_vm2, %v3785_v37, 0.0  ;;  %3806 = vrcp.f32 %v2701_v8 }
 0x8ee   : > { %v2424_v32 = vsel %vm811_vm2, %v3787_v30, 0.0  ;;  %v3789_v18 = vpop.eup %3788  ;;  %v2503_v17 = vpack.c.bf16 %v3787_v30, %v3783_v3  ;;  %3808 = vrcp.f32 %v2632_v23  ;;  %v1916_v3 = vmul.f32 %v5232_v0, %v1908_v36  ;;  %v2704_v30 = vld [vmem:[#allocation3 + $0x60] sm:$0xff] }
 0x8ef   : > { %2425 = vadd.xlane.f32.xlu0 %v2424_v32  ;;  %2416 = vadd.xlane.f32.xlu1 %v2415_v51  ;;  %v2418_v49 = vsel %vm811_vm2, %v3789_v18, 0.0  ;;  %v2502_v56 = vpack.c.bf16 %v3789_v18, %v3785_v37  ;;  %v5315_v62 = vpop.eup %3790  ;;  %3810 = vrcp.f32 %v2703_v63  ;;  %v1910_v18 = vld [vmem:[#allocation3 + $0xa0] sm:$0xff] }
 0x8f0   : > { %3520 = vmatpush3.bf16.msra.mxu0 %v2511_v57  ;;  %v3793_v61 = vpop.eup %3792  ;;  %3812 = vrcp.f32 %v2634_v34  ;;  %v1909_v57 = vld [vmem:[#allocation3 + $0x98] sm:$0xff]  ;;  %v1918_v21 = vmul.f32 %v5255_v42, %v1910_v18  ;;  %v1920_v42 = vmul.f32 %v5264_v6, %v1912_v40  ;;  %v1963_v34 = vld [vmem:[#allocation4 + $0x80] sm:$0xff]  ;;  %v5614_v40 = vld [vmem:[#allocation17_spill] sm:$0xff] }
 0x8f1   : > { %v3795_v47 = vpop.eup %3794  ;;  %3814 = vrcp.f32 %v2705_v14 }
 0x8f2   : > { %v5318_v48 = vpop.eup %3796  ;;  %3816 = vrcp.f32 %v2700_v38 }
 0x8f3   : > { %2419 = vadd.xlane.f32.xlu0 %v2418_v49  ;;  %3522 = vmatmul.mubr.msk.bf16.vlgmr.msra.gmra.mrb[24].mxu0 %vm811_vm2, %v2501_v43  ;;  %v3799_v9 = vpop.eup %3798  ;;  %3818 = vrcp.f32 %v2707_v33  ;;  %v1917_v43 = vmul.f32 %v5243_v41, %v1909_v57  ;;  %v1911_v49 = vld [vmem:[#allocation3 + $0xa8] sm:$0xff] }
 0x8f4   : > { %3525 = vmatprep.mubr.msk.bf16.mxu0 %vm811_vm2, %v2502_v56  ;;  %v3801_v45 = vpop.eup %3800  ;;  %3820 = vrcp.f32 %v2702_v2  ;;  %v1919_v41 = vmul.f32 %v5253_v46, %v1911_v49 }
 0x8f5   : > { %v3803_v55 = vpop.eup %3802  ;;  %3822 = vrcp.f32 %v2704_v30 }
 0x8f6   : > { %v3805_v26 = vpop.eup %3804  ;;  %3824 = vrcp.f32 %v2706_v16  ;;  %v1969_v16 = vld [vmem:[#allocation4 + $0xb0] sm:$0xff] }
 0x8f7   : > { %v3807_v53 = vpop.eup %3806 }
 0x8f8   : > { %v3809_v50 = vpop.eup %3808 }
 0x8f9   : > { %v3811_v37 = vpop.eup %3810 }
 0x8fa   : > { %v3813_v31 = vpop.eup %3812 }
 0x8fb   : > { %3526 = vmatmul.mubr.msk.bf16.gmra.mrb[28].mxu0 %vm811_vm2, %v2503_v17  ;;  %v3815_v56 = vpop.eup %3814 }
 0x8fc   : > { %v3817_v15 = vpop.eup %3816 }
 0x8fd   : > { %v3819_v13 = vpop.eup %3818 }
 0x8fe   : > { %v3821_v23 = vpop.eup %3820 }
 0x900   : > { %2489 = vperm.xlu1 %3593, %v5315_v62  }
 0x904   : > { %2651 = vperm.xlu1 %3593, %v3793_v61   ;;  %v1913_v61 = vld [vmem:[#allocation3 + $0xb8] sm:$0xff] }
 0x905   : > { %v1921_v46 = vmul.f32 %v5262_v58, %v1913_v61  ;;  %v5615_v61 = vld [vmem:[#allocation21_spill] sm:$0xff] }
 0x908   : > { %2661 = vperm.xlu1 %3593, %v3795_v47  }
 0x909   : > { %2484 = vperm.xlu0 %3592, %v5318_v48  }
 0x90c   : > { %2671 = vperm.xlu1 %3593, %v3799_v9  }
 0x90d   : > { %2646 = vperm.xlu0 %3592, %v3801_v45  }
 0x910   : > { %2681 = vperm.xlu1 %3593, %v3803_v55   ;;  %v3823_v55 = vpop.eup %3822 }
 0x911   : > { %2656 = vperm.xlu0 %3592, %v3805_v26   ;;  %v3825_v36 = vpop.eup %3824 }
 0x912   : > { %v1924_v12 = vpop.xlane.xlu0 %1923 }
 0x913   : > { %v1946_v39 = vadd.f32 %v1924_v12, %v1914_v27  ;;  %v1965_v27 = vld [vmem:[#allocation4 + $0x90] sm:$0xff] }
 0x914   : > { %2723 = vperm.xlu1 %3593, %v3807_v53  }
 0x915   : > { %1954 = vst.msk [vmem:[#allocation3 + $0x80] sm:$0xff] %vm528_vm1, %v1946_v39  ;;  %2666 = vperm.xlu0 %3592, %v3809_v50   ;;  %v1964_v39 = vld [vmem:[#allocation4 + $0x88] sm:$0xff] }
 0x916   : > { %v1930_v28 = vpop.xlane.xlu0 %1929 }
 0x917   : > { %v1948_v51 = vadd.f32 %v1930_v28, %v1916_v3  ;;  %v1927_v32 = vpop.xlane.xlu1 %1926 }
 0x918   : > { %v1947_v60 = vadd.f32 %v1927_v32, %v1915_v22  ;;  %2733 = vperm.xlu1 %3593, %v3811_v37   ;;  %v1967_v32 = vld [vmem:[#allocation4 + $0xa0] sm:$0xff] }
 0x919   : > { %1956 = vst.msk [vmem:[#allocation3 + $0x90] sm:$0xff] %vm528_vm1, %v1948_v51  ;;  %2676 = vperm.xlu0 %3592, %v3813_v31   ;;  %v1968_v31 = vld [vmem:[#allocation4 + $0xa8] sm:$0xff] }
 0x91a   : > { %1955 = vst.msk [vmem:[#allocation3 + $0x88] sm:$0xff] %vm528_vm1, %v1947_v60  ;;  %v1933_v0 = vpop.xlane.xlu0 %1932 }
 0x91b   : > { %v1949_v17 = vadd.f32 %v1933_v0, %v1917_v43  ;;  %v1936_v25 = vpop.xlane.xlu1 %1935 }
 0x91c   : > { %v1950_v5 = vadd.f32 %v1936_v25, %v1918_v21  ;;  %2743 = vperm.xlu1 %3593, %v3815_v56   ;;  %v2772_v44 = vld [vmem:[#allocation3 + $0x80] sm:$0xff] }
 0x91d   : > { %1957 = vst.msk [vmem:[#allocation3 + $0x98] sm:$0xff] %vm528_vm1, %v1949_v17  ;;  %2718 = vperm.xlu0 %3592, %v3817_v15   ;;  %3826 = vrcp.f32 %v2772_v44  ;;  %v5613_v17 = vld [vmem:[#allocation23_spill] sm:$0xff] }
 0x91e   : > { %1958 = vst.msk [vmem:[#allocation3 + $0xa0] sm:$0xff] %vm528_vm1, %v1950_v5  ;;  %v1939_v11 = vpop.xlane.xlu0 %1938 }
 0x91f   : > { %v1951_v8 = vadd.f32 %v1939_v11, %v1919_v41  ;;  %v1942_v47 = vpop.xlane.xlu1 %1941 }
 0x920   : > { %v1952_v63 = vadd.f32 %v1942_v47, %v1920_v42  ;;  %2753 = vperm.xlu1 %3593, %v3819_v13   ;;  %v2774_v6 = vld [vmem:[#allocation3 + $0x90] sm:$0xff] }
 0x921   : > { %v2773_v9 = vld [vmem:[#allocation3 + $0x88] sm:$0xff]  ;;  %1959 = vst.msk [vmem:[#allocation3 + $0xa8] sm:$0xff] %vm528_vm1, %v1951_v8  ;;  %2728 = vperm.xlu0 %3592, %v3821_v23   ;;  %v5616_v8 = vld [vmem:[#allocation16_spill] sm:$0xff] }
 0x922   : > { %3828 = vrcp.f32 %v2773_v9  ;;  %1960 = vst.msk [vmem:[#allocation3 + $0xb0] sm:$0xff] %vm528_vm1, %v1952_v63  ;;  %v1945_v45 = vpop.xlane.xlu0 %1944 }
 0x923   : > { %v1953_v14 = vadd.f32 %v1945_v45, %v1921_v46  ;;  %v1974_v19 = vpop.permute.xlu1 %1973  ;;  %v2389_v45 = vld [vmem:[#allocation3 + $0xd0] sm:$0xff] }
 0x924   : > { %v2775_v38 = vld [vmem:[#allocation3 + $0x98] sm:$0xff]  ;;  %v2011_v26 = vmul.f32 %v1974_v19, %v1963_v34 }
 0x925   : > { %3830 = vrcp.f32 %v2775_v38  ;;  %1961 = vst.msk [vmem:[#allocation3 + $0xb8] sm:$0xff] %vm528_vm1, %v1953_v14  ;;  %2738 = vperm.xlu0 %3592, %v3823_v55   ;;  %v2776_v58 = vld [vmem:[#allocation3 + $0xa0] sm:$0xff]  ;;  %v2397_v14 = vmul.f32 %v5271_v54, %v2389_v45 }
 0x926   : > { %3832 = vrcp.f32 %v2774_v6  ;;  %v2112_v33 = vadd.f32 %v5006_v1, %v2011_v26  ;;  %v2387_v55 = vld [vmem:[#allocation3 + $0xc0] sm:$0xff] }
 0x927   : > { %v1984_v12 = vpop.permute.xlu1 %1983  ;;  %v3827_v28 = vpop.eup %3826 }
 0x928   : > { %v2777_v53 = vld [vmem:[#allocation3 + $0xa8] sm:$0xff]  ;;  %2120 = vst.msk [vmem:[#allocation4 + $0x80] sm:$0xff] %vm593_vm0, %v2112_v33  ;;  %v2013_v2 = vmul.f32 %v1984_v12, %v1965_v27  ;;  %v2395_v27 = vmul.f32 %v5277_v35, %v2387_v55  ;;  %v2390_v12 = vld [vmem:[#allocation3 + $0xd8] sm:$0xff]  ;;  %v2692_v55 = vld [vmem:[#allocation4 + $0x40] sm:$0xff] }
 0x929   : > { %3834 = vrcp.f32 %v2777_v53  ;;  %2748 = vperm.xlu0 %3592, %v3825_v36   ;;  %v2778_v22 = vld [vmem:[#allocation3 + $0xb0] sm:$0xff]  ;;  %v2388_v53 = vld [vmem:[#allocation3 + $0xc8] sm:$0xff]  ;;  %v2398_v54 = vmul.f32 %v5283_v7, %v2390_v12  ;;  %v2695_v12 = vld [vmem:[#allocation4 + $0x58] sm:$0xff] }
 0x92a   : > { %3836 = vrcp.f32 %v2776_v58  ;;  %v2114_v50 = vadd.f32 %v5004_v10, %v2013_v2  ;;  %v1979_v3 = vpop.permute.xlu0 %1978 }
 0x92b   : > { %v2012_v57 = vmul.f32 %v1979_v3, %v1964_v39  ;;  %v1989_v37 = vpop.permute.xlu1 %1988 }
 0x92c   : > { %v3829_v1 = vpop.eup %3828  ;;  %v2779_v30 = vld [vmem:[#allocation3 + $0xb8] sm:$0xff]  ;;  %2122 = vst.msk [vmem:[#allocation4 + $0x90] sm:$0xff] %vm593_vm0, %v2114_v50  ;;  %v2014_v51 = vmul.f32 %v1989_v37, %v1966_v29  ;;  %v2396_v29 = vmul.f32 %v5273_v24, %v2388_v53 }
 0x92d   : > { %3838 = vrcp.f32 %v2779_v30  ;;  %v2113_v18 = vadd.f32 %v5010_v59, %v2012_v57  ;;  %2790 = vperm.xlu0 %3592, %v3827_v28   ;;  %2795 = vperm.xlu1 %3593, %v3829_v1   ;;  %v1970_v59 = vld [vmem:[#allocation4 + $0xb8] sm:$0xff]  ;;  %v2393_v28 = vld [vmem:[#allocation3 + $0xf0] sm:$0xff]  ;;  %v2391_v30 = vld [vmem:[#allocation3 + $0xe0] sm:$0xff] }
 0x92e   : > { %3840 = vrcp.f32 %v2778_v22  ;;  %v2115_v10 = vadd.f32 %v5008_v52, %v2014_v51  ;;  %v1994_v60 = vpop.permute.xlu0 %1993  ;;  %v2401_v57 = vmul.f32 %v5318_v48, %v2393_v28  ;;  %v2394_v1 = vld [vmem:[#allocation3 + $0xf8] sm:$0xff]  ;;  %v2399_v7 = vmul.f32 %v5279_v20, %v2391_v30  ;;  %v2696_v28 = vld [vmem:[#allocation4 + $0x60] sm:$0xff] }
 0x92f   : > { %v3831_v43 = vpop.eup %3830  ;;  %2121 = vst.msk [vmem:[#allocation4 + $0x88] sm:$0xff] %vm593_vm0, %v2113_v18  ;;  %v2015_v0 = vmul.f32 %v1994_v60, %v1967_v32  ;;  %v1999_v21 = vpop.permute.xlu1 %1998  ;;  %v2402_v24 = vmul.f32 %v5315_v62, %v2394_v1  ;;  %v2699_v30 = vld [vmem:[#allocation4 + $0x78] sm:$0xff] }
 0x930   : > { %v3833_v49 = vpop.eup %3832  ;;  %2123 = vst.msk [vmem:[#allocation4 + $0x98] sm:$0xff] %vm593_vm0, %v2115_v10  ;;  %v2016_v56 = vmul.f32 %v1999_v21, %v1968_v31  ;;  %v2392_v10 = vld [vmem:[#allocation3 + $0xe8] sm:$0xff] }
 0x931   : > { %v2116_v25 = vadd.f32 %v5613_v17, %v2015_v0  ;;  %2800 = vperm.xlu0 %3592, %v3833_v49   ;;  %2805 = vperm.xlu1 %3593, %v3831_v43   ;;  %v2400_v21 = vmul.f32 %v5286_v4, %v2392_v10  ;;  %v2764_v10 = vld [vmem:[#allocation4 + $0x80] sm:$0xff] }
 0x932   : > { %v2117_v15 = vadd.f32 %v5614_v40, %v2016_v56  ;;  %v2004_v5 = vpop.permute.xlu0 %2003 }
 0x933   : > { %v3835_v52 = vpop.eup %3834  ;;  %2124 = vst.msk [vmem:[#allocation4 + $0xa0] sm:$0xff] %vm593_vm0, %v2116_v25  ;;  %v2017_v41 = vmul.f32 %v2004_v5, %v1969_v16  ;;  %v2009_v44 = vpop.permute.xlu1 %2008 }
 0x934   : > { %v3837_v11 = vpop.eup %3836  ;;  %2125 = vst.msk [vmem:[#allocation4 + $0xa8] sm:$0xff] %vm593_vm0, %v2117_v15  ;;  %v2018_v42 = vmul.f32 %v2009_v44, %v1970_v59 }
 0x935   : > { %v2118_v13 = vadd.f32 %v5615_v61, %v2017_v41  ;;  %2810 = vperm.xlu0 %3592, %v3837_v11   ;;  %2815 = vperm.xlu1 %3593, %v3835_v52  }
 0x936   : > { %v2119_v47 = vadd.f32 %v5616_v8, %v2018_v42  ;;  %v5353_v9 = vpop.permute.xlu0 %2459 }
 0x937   : > { %v3839_v23 = vpop.eup %3838  ;;  %2126 = vst.msk [vmem:[#allocation4 + $0xb0] sm:$0xff] %vm593_vm0, %v2118_v13  ;;  %v5355_v46 = vpop.permute.xlu1 %2464 }
 0x938   : > { %v3841_v63 = vpop.eup %3840  ;;  %2127 = vst.msk [vmem:[#allocation4 + $0xb8] sm:$0xff] %vm593_vm0, %v2119_v47 }
 0x939   : > { %2820 = vperm.xlu0 %3592, %v3841_v63   ;;  %2825 = vperm.xlu1 %3593, %v3839_v23  }
 0x93a   : > { %v5357_v34 = vpop.permute.xlu0 %2474 }
 0x93b   : > { %v5359_v6 = vpop.permute.xlu1 %2454 }
 0x93f   : > { %v5362_v26 = vpop.permute.xlu1 %2469 }
 0x943   : > { %v5367_v36 = vpop.permute.xlu1 %2479 }
 0x967   : > { %v2411_v19 = vpop.xlane.xlu0 %2410 }
 0x968   : > { %v2429_v38 = vadd.f32 %v2411_v19, %v2397_v14  ;;  %v2693_v19 = vld [vmem:[#allocation4 + $0x48] sm:$0xff] }
 0x96a   : > { %2437 = vst.msk [vmem:[#allocation3 + $0xd0] sm:$0xff] %vm528_vm1, %v2429_v38 }
 0x96b   : > { %v2405_v33 = vpop.xlane.xlu0 %2404 }
 0x96c   : > { %v2427_v58 = vadd.f32 %v2405_v33, %v2395_v27 }
 0x96e   : > { %2435 = vst.msk [vmem:[#allocation3 + $0xc0] sm:$0xff] %vm528_vm1, %v2427_v58 }
 0x971   : > { %v2846_v2 = vld [vmem:[#allocation3 + $0xd0] sm:$0xff] }
 0x972   : > { %3842 = vrcp.f32 %v2846_v2  ;;  %v2694_v2 = vld [vmem:[#allocation4 + $0x50] sm:$0xff] }
 0x973   : > { %v2414_v39 = vpop.xlane.xlu0 %2413 }
 0x974   : > { %v2430_v50 = vadd.f32 %v2414_v39, %v2398_v54  ;;  %v2408_v3 = vpop.xlane.xlu1 %2407 }
 0x975   : > { %v2844_v22 = vld [vmem:[#allocation3 + $0xc0] sm:$0xff]  ;;  %v2428_v35 = vadd.f32 %v2408_v3, %v2396_v29  ;;  %v2697_v3 = vld [vmem:[#allocation4 + $0x68] sm:$0xff] }
 0x976   : > { %3844 = vrcp.f32 %v2844_v22  ;;  %2438 = vst.msk [vmem:[#allocation3 + $0xd8] sm:$0xff] %vm528_vm1, %v2430_v50 }
 0x977   : > { %2436 = vst.msk [vmem:[#allocation3 + $0xc8] sm:$0xff] %vm528_vm1, %v2428_v35 }
 0x978   : > { %v2423_v37 = vpop.xlane.xlu1 %2422 }
 0x979   : > { %v2433_v51 = vadd.f32 %v2423_v37, %v2401_v57 }
 0x97b   : > { %2441 = vst.msk [vmem:[#allocation3 + $0xf0] sm:$0xff] %vm528_vm1, %v2433_v51  ;;  %v2698_v51 = vld [vmem:[#allocation4 + $0x70] sm:$0xff] }
 0x97c   : > { %v3843_v32 = vpop.eup %3842  ;;  %v2426_v18 = vpop.xlane.xlu0 %2425 }
 0x97d   : > { %v2417_v31 = vpop.xlane.xlu1 %2416  ;;  %v2847_v60 = vld [vmem:[#allocation3 + $0xd8] sm:$0xff]  ;;  %v2434_v43 = vadd.f32 %v2426_v18, %v2402_v24  ;;  %2872 = vperm.xlu0 %3592, %v3843_v32  }
 0x97e   : > { %v2431_v0 = vadd.f32 %v2417_v31, %v2399_v7  ;;  %3846 = vrcp.f32 %v2847_v60  ;;  %v2845_v48 = vld [vmem:[#allocation3 + $0xc8] sm:$0xff] }
 0x97f   : > { %2442 = vst.msk [vmem:[#allocation3 + $0xf8] sm:$0xff] %vm528_vm1, %v2434_v43  ;;  %3848 = vrcp.f32 %v2845_v48  ;;  %v2765_v60 = vld [vmem:[#allocation4 + $0x88] sm:$0xff] }
 0x980   : > { %2439 = vst.msk [vmem:[#allocation3 + $0xe0] sm:$0xff] %vm528_vm1, %v2431_v0  ;;  %v3845_v49 = vpop.eup %3844  ;;  %v2420_v62 = vpop.xlane.xlu0 %2419 }
 0x981   : > { %v5380_v56 = vpop.permute.xlu1 %2489  ;;  %v2432_v20 = vadd.f32 %v2420_v62, %v2400_v21  ;;  %2862 = vperm.xlu0 %3592, %v3845_v49   ;;  %v2766_v62 = vld [vmem:[#allocation4 + $0x90] sm:$0xff] }
 0x982   : > { %v2850_v15 = vld [vmem:[#allocation3 + $0xf0] sm:$0xff] }
 0x983   : > { %2440 = vst.msk [vmem:[#allocation3 + $0xe8] sm:$0xff] %vm528_vm1, %v2432_v20  ;;  %v2767_v20 = vld [vmem:[#allocation4 + $0x98] sm:$0xff] }
 0x985   : > { %v5383_v16 = vpop.permute.xlu1 %2651 }
 0x986   : > { %v2851_v52 = vld [vmem:[#allocation3 + $0xf8] sm:$0xff] }
 0x987   : > { %v2848_v17 = vld [vmem:[#allocation3 + $0xe0] sm:$0xff] }
 0x988   : > { %v3847_v25 = vpop.eup %3846  ;;  %3850 = vrcp.f32 %v2848_v17  ;;  %v5385_v59 = vpop.permute.xlu0 %2484 }
 0x989   : > { %v5387_v40 = vpop.permute.xlu1 %2661  ;;  %2877 = vperm.xlu1 %3593, %v3847_v25   ;;  %v3849_v5 = vpop.eup %3848 }
 0x98a   : > { %v2849_v4 = vld [vmem:[#allocation3 + $0xe8] sm:$0xff] }
 0x98b   : > { %3852 = vrcp.f32 %v2849_v4 }
 0x98c   : > { %3854 = vrcp.f32 %v2850_v15  ;;  %v5389_v41 = vpop.permute.xlu0 %2646 }
 0x98d   : > { %v5391_v44 = vpop.permute.xlu1 %2671  ;;  %2867 = vperm.xlu1 %3593, %v3849_v5   ;;  %3856 = vrcp.f32 %v2851_v52  ;;  %v2768_v5 = vld [vmem:[#allocation4 + $0xa0] sm:$0xff] }
 0x990   : > { %v5393_v11 = vpop.permute.xlu0 %2656 }
 0x991   : > { %v5395_v42 = vpop.permute.xlu1 %2681 }
 0x992   : > { %v3851_v61 = vpop.eup %3850 }
 0x993   : > { %2882 = vperm.xlu0 %3592, %v3851_v61   ;;  %v2769_v61 = vld [vmem:[#allocation4 + $0xa8] sm:$0xff] }
 0x994   : > { %v5397_v13 = vpop.permute.xlu0 %2666 }
 0x995   : > { %v2724_v8 = vpop.permute.xlu1 %2723  ;;  %v3853_v47 = vpop.eup %3852 }
 0x996   : > { %v3855_v23 = vpop.eup %3854  ;;  %2887 = vperm.xlu1 %3593, %v3853_v47   ;;  %v2757_v27 = vmul.f32 %v2724_v8, %v2693_v19 }
 0x997   : > { %2892 = vperm.xlu0 %3592, %v3855_v23   ;;  %v3857_v45 = vpop.eup %3856 }
 0x998   : > { %v5399_v63 = vpop.permute.xlu0 %2676 }
 0x999   : > { %v2734_v14 = vpop.permute.xlu1 %2733 }
 0x99a   : > { %2897 = vperm.xlu1 %3593, %v3857_v45   ;;  %v2759_v39 = vmul.f32 %v2734_v14, %v2695_v12  ;;  %v2770_v14 = vld [vmem:[#allocation4 + $0xb0] sm:$0xff] }
 0x99b   : > { %v2446_v12 = vld [vmem:[#allocation4 + $0xd0] sm:$0xff] }
 0x99c   : > { %v2719_v38 = vpop.permute.xlu0 %2718 }
 0x99d   : > { %v2756_v33 = vmul.f32 %v2719_v38, %v2692_v55  ;;  %v2744_v53 = vpop.permute.xlu1 %2743  ;;  %v2771_v55 = vld [vmem:[#allocation4 + $0xb8] sm:$0xff] }
 0x99e   : > { %v2761_v35 = vmul.f32 %v2744_v53, %v2697_v3  ;;  %v2444_v53 = vld [vmem:[#allocation4 + $0xc0] sm:$0xff] }
 0x99f   : > { %v3594_v58 = vpack.i.bf16 %v2757_v27, %v2756_v33 }
 0x9a0   : > { %v2729_v54 = vpop.permute.xlu0 %2728 }
 0x9a1   : > { %v2758_v29 = vmul.f32 %v2729_v54, %v2694_v2  ;;  %3595 = vrot.lane.b32.xlu0 %v3594_v58, %s3916_s10  ;;  %v2754_v37 = vpop.permute.xlu1 %2753  ;;  %v2447_v2 = vld [vmem:[#allocation4 + $0xd8] sm:$0xff]  ;;  %v2445_v54 = vld [vmem:[#allocation4 + $0xc8] sm:$0xff] }
 0x9a2   : > { %v2763_v7 = vmul.f32 %v2754_v37, %v2699_v30  ;;  %v2495_v3 = vmul.f32 %v5362_v26, %v2447_v2  ;;  %v2449_v26 = vld [vmem:[#allocation4 + $0xe8] sm:$0xff] }
 0x9a3   : > { %v3599_v50 = vpack.i.bf16 %v2759_v39, %v2758_v29  ;;  %v2494_v39 = vmul.f32 %v5355_v46, %v2446_v12  ;;  %v2492_v29 = vmul.f32 %v5359_v6, %v2444_v53  ;;  %v2448_v46 = vld [vmem:[#allocation4 + $0xe0] sm:$0xff]  ;;  %v2451_v6 = vld [vmem:[#allocation4 + $0xf8] sm:$0xff] }
 0x9a4   : > { %v2739_v22 = vpop.permute.xlu0 %2738 }
 0x9a5   : > { %v2760_v57 = vmul.f32 %v2739_v22, %v2696_v28  ;;  %3600 = vrot.lane.b32.xlu1 %v3599_v50, %s3916_s10 }
 0x9a7   : > { %v3604_v1 = vpack.i.bf16 %v2761_v35, %v2760_v57  ;;  %v2493_v35 = vmul.f32 %v5353_v9, %v2445_v54  ;;  %v2496_v9 = vmul.f32 %v5357_v34, %v2448_v46 }
 0x9a8   : > { %v2749_v24 = vpop.permute.xlu0 %2748 }
 0x9a9   : > { %v2762_v32 = vmul.f32 %v2749_v24, %v2698_v51  ;;  %3605 = vrot.lane.b32.xlu0 %v3604_v1, %s3916_s10  ;;  %v2450_v51 = vld [vmem:[#allocation4 + $0xf0] sm:$0xff] }
 0x9ab   : > { %v3609_v18 = vpack.i.bf16 %v2763_v7, %v2762_v32  ;;  %v2498_v7 = vmul.f32 %v5385_v59, %v2450_v51 }
 0x9ac   : > { %v2791_v31 = vpop.permute.xlu0 %2790  ;;  %v2796_v43 = vpop.permute.xlu1 %2795 }
 0x9ad   : > { %v2828_v0 = vmul.f32 %v2791_v31, %v2764_v10  ;;  %3610 = vrot.lane.b32.xlu1 %v3609_v18, %s3916_s10  ;;  %v2829_v48 = vmul.f32 %v2796_v43, %v2765_v60  ;;  %v2499_v18 = vmul.f32 %v5380_v56, %v2451_v6  ;;  %v2497_v60 = vmul.f32 %v5367_v36, %v2449_v26 }
 0x9af   : > { %v3614_v21 = vpack.i.bf16 %v2829_v48, %v2828_v0 }
 0x9b0   : > { %v2801_v49 = vpop.permute.xlu0 %2800  ;;  %v2806_v17 = vpop.permute.xlu1 %2805 }
 0x9b1   : > { %v2830_v25 = vmul.f32 %v2801_v49, %v2766_v62  ;;  %v2831_v15 = vmul.f32 %v2806_v17, %v2767_v20  ;;  %3615 = vrot.lane.b32.xlu0 %v3614_v21, %s3915_s9 }
 0x9b3   : > { %v3619_v4 = vpack.i.bf16 %v2831_v15, %v2830_v25 }
 0x9b4   : > { %v2811_v52 = vpop.permute.xlu0 %2810  ;;  %v2816_v8 = vpop.permute.xlu1 %2815 }
 0x9b5   : > { %v2832_v47 = vmul.f32 %v2811_v52, %v2768_v5  ;;  %v2833_v23 = vmul.f32 %v2816_v8, %v2769_v61  ;;  %3620 = vrot.lane.b32.xlu1 %v3619_v4, %s3915_s9 }
 0x9b7   : > { %v3624_v45 = vpack.i.bf16 %v2833_v23, %v2832_v47 }
 0x9b8   : > { %v2821_v19 = vpop.permute.xlu0 %2820  ;;  %v2826_v38 = vpop.permute.xlu1 %2825 }
 0x9b9   : > { %v2834_v27 = vmul.f32 %v2821_v19, %v2770_v14  ;;  %v2835_v33 = vmul.f32 %v2826_v38, %v2771_v55  ;;  %3625 = vrot.lane.b32.xlu0 %v3624_v45, %s3915_s9 }
 0x9bb   : > { %v3629_v58 = vpack.i.bf16 %v2835_v33, %v2834_v27 }
 0x9bd   : > { %3630 = vrot.lane.b32.xlu1 %v3629_v58, %s3915_s9 }
 0x9c6   : > { %v3523_v50 = vpop.f32.mrb[24].mxu0 }
 0x9c7   : > { %v2595_v28 = vadd.f32 %v3523_v50, %v2494_v39  ;;  %v2562_v22 = vpop.f32.mrb[25].mxu0 }
 0x9c8   : > { %v2593_v57 = vadd.f32 %v2562_v22, %v2492_v29  ;;  %v3524_v37 = vpop.f32.mrb[26].mxu0 }
 0x9c9   : > { %2603 = vst.msk [vmem:[#allocation4 + $0xd0] sm:$0xff] %vm593_vm0, %v2595_v28  ;;  %v2596_v1 = vadd.f32 %v3524_v37, %v2495_v3  ;;  %v2565_v30 = vpop.f32.mrb[27].mxu0 }
 0x9ca   : > { %2601 = vst.msk [vmem:[#allocation4 + $0xc0] sm:$0xff] %vm593_vm0, %v2593_v57  ;;  %v2594_v24 = vadd.f32 %v2565_v30, %v2493_v35  ;;  %v2622_v30 = vld [vmem:[#allocation4 + $0x10] sm:$0xff] }
 0x9cb   : > { %2604 = vst.msk [vmem:[#allocation4 + $0xd8] sm:$0xff] %vm593_vm0, %v2596_v1  ;;  %v2623_v1 = vld [vmem:[#allocation4 + $0x18] sm:$0xff]  ;;  %v2686_v6 = vmul.f32 %v5393_v11, %v2622_v30 }
 0x9cc   : > { %2602 = vst.msk [vmem:[#allocation4 + $0xc8] sm:$0xff] %vm593_vm0, %v2594_v24  ;;  %v2687_v46 = vmul.f32 %v5387_v40, %v2623_v1 }
 0x9ce   : > { %v3527_v32 = vpop.f32.mrb[28].mxu0 }
 0x9cf   : > { %v2599_v31 = vadd.f32 %v3527_v32, %v2498_v7  ;;  %v2578_v10 = vpop.f32.mrb[29].mxu0 }
 0x9d0   : > { %v2597_v43 = vadd.f32 %v2578_v10, %v2496_v9  ;;  %v3528_v0 = vpop.f32.mrb[30].mxu0  ;;  %v2838_v59 = vld [vmem:[#allocation4 + $0xd0] sm:$0xff] }
 0x9d1   : > { %2607 = vst.msk [vmem:[#allocation4 + $0xf0] sm:$0xff] %vm593_vm0, %v2599_v31  ;;  %v2600_v48 = vadd.f32 %v3528_v0, %v2499_v18  ;;  %v2581_v21 = vpop.f32.mrb[31].mxu0  ;;  %v2836_v15 = vld [vmem:[#allocation4 + $0xc0] sm:$0xff] }
 0x9d2   : > { %2605 = vst.msk [vmem:[#allocation4 + $0xe0] sm:$0xff] %vm593_vm0, %v2597_v43  ;;  %v2598_v49 = vadd.f32 %v2581_v21, %v2497_v60  ;;  %v2839_v56 = vld [vmem:[#allocation4 + $0xd8] sm:$0xff]  ;;  %v2621_v43 = vld [vmem:[#allocation4 + $0x8] sm:$0xff]  ;;  %v2620_v0 = vld [vmem:[#allocation4] sm:$0xff] }
 0x9d3   : > { %2608 = vst.msk [vmem:[#allocation4 + $0xf8] sm:$0xff] %vm593_vm0, %v2600_v48  ;;  %v2837_v4 = vld [vmem:[#allocation4 + $0xc8] sm:$0xff] }
 0x9d4   : > { %2606 = vst.msk [vmem:[#allocation4 + $0xe8] sm:$0xff] %vm593_vm0, %v2598_v49  ;;  %v2685_v49 = vmul.f32 %v5383_v16, %v2621_v43 }
 0x9d8   : > { %v2842_v33 = vld [vmem:[#allocation4 + $0xf0] sm:$0xff] }
 0x9d9   : > { %v2840_v23 = vld [vmem:[#allocation4 + $0xe0] sm:$0xff] }
 0x9da   : > { %v2843_v58 = vld [vmem:[#allocation4 + $0xf8] sm:$0xff] }
 0x9db   : > { %v2841_v45 = vld [vmem:[#allocation4 + $0xe8] sm:$0xff] }
 0x9fc   : > { %v2873_v34 = vpop.permute.xlu0 %2872 }
 0x9fd   : > { %v2902_v20 = vmul.f32 %v2873_v34, %v2838_v59  ;;  %v2684_v34 = vmul.f32 %v5389_v41, %v2620_v0 }
 0xa00   : > { %v2863_v36 = vpop.permute.xlu0 %2862 }
 0xa01   : > { %v2900_v52 = vmul.f32 %v2863_v36, %v2836_v15 }
 0xa08   : > { %v2878_v62 = vpop.permute.xlu1 %2877 }
 0xa09   : > { %v2903_v17 = vmul.f32 %v2878_v62, %v2839_v56 }
 0xa0b   : > { %v3634_v25 = vpack.i.bf16 %v2903_v17, %v2902_v20 }
 0xa0c   : > { %v2868_v5 = vpop.permute.xlu1 %2867 }
 0xa0d   : > { %v2901_v61 = vmul.f32 %v2868_v5, %v2837_v4  ;;  %3635 = vrot.lane.b32.xlu1 %v3634_v25, %s3914_s7 }
 0xa0f   : > { %v3639_v8 = vpack.i.bf16 %v2901_v61, %v2900_v52 }
 0xa11   : > { %3640 = vrot.lane.b32.xlu0 %v3639_v8, %s3914_s7 }
 0xa12   : > { %v2883_v47 = vpop.permute.xlu0 %2882 }
 0xa13   : > { %v2904_v19 = vmul.f32 %v2883_v47, %v2840_v23  ;;  %v2625_v47 = vld [vmem:[#allocation4 + $0x28] sm:$0xff]  ;;  %v2624_v23 = vld [vmem:[#allocation4 + $0x20] sm:$0xff] }
 0xa15   : > { %v2888_v14 = vpop.permute.xlu1 %2887 }
 0xa16   : > { %v2905_v55 = vmul.f32 %v2888_v14, %v2841_v45  ;;  %v2893_v38 = vpop.permute.xlu0 %2892  ;;  %v2689_v45 = vmul.f32 %v5391_v44, %v2625_v47  ;;  %v2688_v14 = vmul.f32 %v5397_v13, %v2624_v23 }
 0xa17   : > { %v2906_v53 = vmul.f32 %v2893_v38, %v2842_v33 }
 0xa18   : > { %v3644_v27 = vpack.i.bf16 %v2905_v55, %v2904_v19 }
 0xa19   : > { %v2898_v12 = vpop.permute.xlu1 %2897 }
 0xa1a   : > { %v2907_v2 = vmul.f32 %v2898_v12, %v2843_v58  ;;  %3645 = vrot.lane.b32.xlu0 %v3644_v27, %s3914_s7  ;;  %v3596_v29 = vpop.permute.xlu0 %3595 }
 0xa1b   : > { %v3598_v26 = vunpack.i.h.bf16 %v3596_v29  ;;  %v3597_v7 = vunpack.i.l.bf16 %v3596_v29 }
 0xa1c   : > { %v3649_v54 = vpack.i.bf16 %v2907_v2, %v2906_v53 }
 0xa1d   : > { %v3601_v39 = vpop.permute.xlu1 %3600  ;;  %v3005_v17 = vsel %vm593_vm0, %v2685_v49, %v3598_v26  ;;  %v3004_v36 = vsel %vm593_vm0, %v2684_v34, %v3597_v7 }
 0xa1e   : > { %3650 = vrot.lane.b32.xlu1 %v3649_v54, %s3914_s7  ;;  %v3606_v3 = vpop.permute.xlu0 %3605  ;;  %v3603_v57 = vunpack.i.h.bf16 %v3601_v39  ;;  %v3602_v37 = vunpack.i.l.bf16 %v3601_v39  ;;  %v2627_v54 = vld [vmem:[#allocation4 + $0x38] sm:$0xff]  ;;  %v2626_v39 = vld [vmem:[#allocation4 + $0x30] sm:$0xff] }
 0xa1f   : > { %v3608_v61 = vunpack.i.h.bf16 %v3606_v3  ;;  %v3607_v8 = vunpack.i.l.bf16 %v3606_v3 }
 0xa20   : > { %v3007_v18 = vsel %vm593_vm0, %v2687_v46, %v3603_v57  ;;  %v3006_v31 = vsel %vm593_vm0, %v2686_v6, %v3602_v37 }
 0xa21   : > { %v5429_v50 = vpop.permute.xlu1 %3610  ;;  %v3009_v38 = vsel %vm593_vm0, %v2689_v45, %v3608_v61  ;;  %v3008_v27 = vsel %vm593_vm0, %v2688_v14, %v3607_v8 }
 0xa22   : > { %v3613_v58 = vunpack.i.h.bf16 %v5429_v50  ;;  %v3612_v12 = vunpack.i.l.bf16 %v5429_v50 }
 0xa23   : > { %v3616_v22 = vpop.permute.xlu0 %3615 }
 0xa24   : > { %v3618_v48 = vunpack.i.h.bf16 %v3616_v22  ;;  %v3617_v21 = vunpack.i.l.bf16 %v3616_v22  ;;  %v2690_v22 = vmul.f32 %v5399_v63, %v2626_v39 }
 0xa26   : > { %v3013_v41 = vsel %vm811_vm2, %v3005_v17, %v3618_v48  ;;  %v3012_v15 = vsel %vm811_vm2, %v3004_v36, %v3617_v21 }
 0xa27   : > { %v3621_v28 = vpop.permute.xlu1 %3620 }
 0xa28   : > { %v3623_v51 = vunpack.i.h.bf16 %v3621_v28  ;;  %v3622_v24 = vunpack.i.l.bf16 %v3621_v28  ;;  %v2691_v28 = vmul.f32 %v5395_v42, %v2627_v54 }
 0xa2a   : > { %v3014_v40 = vsel %vm811_vm2, %v3006_v31, %v3622_v24  ;;  %v3015_v11 = vsel %vm811_vm2, %v3007_v18, %v3623_v51  ;;  %v3011_v30 = vsel %vm593_vm0, %v2691_v28, %v3613_v58  ;;  %v3010_v51 = vsel %vm593_vm0, %v2690_v22, %v3612_v12 }
 0xa2b   : > { %v3626_v9 = vpop.permute.xlu0 %3625 }
 0xa2c   : > { %v3628_v19 = vunpack.i.h.bf16 %v3626_v9  ;;  %v3627_v55 = vunpack.i.l.bf16 %v3626_v9 }
 0xa2e   : > { %v3017_v29 = vsel %vm811_vm2, %v3009_v38, %v3628_v19  ;;  %v3016_v44 = vsel %vm811_vm2, %v3008_v27, %v3627_v55 }
 0xa2f   : > { %v5431_v35 = vpop.permute.xlu1 %3630 }
 0xa30   : > { %v3633_v13 = vunpack.i.h.bf16 %v5431_v35  ;;  %v3632_v3 = vunpack.i.l.bf16 %v5431_v35 }
 0xa32   : > { %v3018_v6 = vsel %vm811_vm2, %v3010_v51, %v3632_v3  ;;  %v3019_v35 = vsel %vm811_vm2, %v3011_v30, %v3633_v13 }
 0xa7f   : > { %v3636_v32 = vpop.permute.xlu1 %3635 }
 0xa80   : > { %v3638_v10 = vunpack.i.h.bf16 %v3636_v32  ;;  %v3637_v60 = vunpack.i.l.bf16 %v3636_v32 }
 0xa82   : > { %v3023_v59 = vsel %vm3020_vm3, %v3014_v40, %v3637_v60  ;;  %v3024_v56 = vsel %vm3020_vm3, %v3015_v11, %v3638_v10 }
 0xa83   : > { %v3322_v62 = vpack.c.bf16 %v3024_v56, %v3023_v59  ;;  %v3641_v20 = vpop.permute.xlu0 %3640 }
 0xa84   : > { %v3643_v16 = vunpack.i.h.bf16 %v3641_v20  ;;  %v3642_v25 = vunpack.i.l.bf16 %v3641_v20 }
 0xa85   : > { %3334 = vst [vmem:[%s5445_s13 + $0x8] sm:$0xff] %v3322_v62  }
 0xa86   : > { %v3022_v4 = vsel %vm3020_vm3, %v3013_v41, %v3643_v16  ;;  %v3021_v5 = vsel %vm3020_vm3, %v3012_v15, %v3642_v25 }
 0xa87   : > { %v3317_v52 = vpack.c.bf16 %v3022_v4, %v3021_v5 }
 0xa89   : > { %3318 = vst [vmem:[%s5445_s13] sm:$0xff] %v3317_v52  }
 0xa8c   : > { %v3646_v33 = vpop.permute.xlu0 %3645 }
 0xa8d   : > { %v3648_v53 = vunpack.i.h.bf16 %v3646_v33  ;;  %v3647_v2 = vunpack.i.l.bf16 %v3646_v33 }
 0xa8f   : > { %v3026_v50 = vsel %vm3020_vm3, %v3017_v29, %v3648_v53  ;;  %v3025_v57 = vsel %vm3020_vm3, %v3016_v44, %v3647_v2 }
 0xa90   : > { %v3327_v37 = vpack.c.bf16 %v3026_v50, %v3025_v57  ;;  %v3651_v1 = vpop.permute.xlu1 %3650 }
 0xa91   : > { %v3653_v24 = vunpack.i.h.bf16 %v3651_v1  ;;  %v3652_v46 = vunpack.i.l.bf16 %v3651_v1 }
 0xa92   : > { %3335 = vst [vmem:[%s5445_s13 + $0x10] sm:$0xff] %v3327_v37  }
 0xa93   : > { %v3027_v42 = vsel %vm3020_vm3, %v3018_v6, %v3652_v46  ;;  %v3028_v63 = vsel %vm3020_vm3, %v3019_v35, %v3653_v24 }
 0xa94   : > { %v3332_v26 = vpack.c.bf16 %v3028_v63, %v3027_v42 }
 0xa96   : > { %3336 = vst [vmem:[%s5445_s13 + $0x18] sm:$0xff] %v3332_v26  }
 0xa97 PF: > { %s14_s19 = sadd.s32 1, %s3909_s19   ;;  %s5617_s15 = smov %s3897_s16 }
 0xa98   : > { %p11_p10 = scmp.ge.s32.totalorder %s14_s19, 4   ;;  %s5618_s16 = smov %s3981_s24 }
 0xa99   : > { %s5619_s17 = smov %s3905_s18  ;;  %s5620_s18 = smov %s5622_s20 }
 0xa9a   :  { %13 = sbr.rel (!%p11_p10) target bundleno = 3 (0x3), region = 230 }

</bundles_post_ra>
